<compile_context>
chip_gen: v5e
topology: v5e:2x2
jax: 0.10.0
libtpu: 0.0.40
codegen_flags: <defaults>
</compile_context>

<pallas_src>
import jax
import jax.numpy as jnp
from jax.experimental import pallas as pl
from jax.experimental.pallas import tpu as pltpu


def _round_up(x, m):
    return (x + m - 1) // m * m


def _pick_hw_chunk(hw, cap=512):
    """Largest multiple-of-8 divisor of hw that is <= cap (or hw itself)."""
    if hw <= cap:
        return hw
    for c in range(cap - cap % 8, 7, -8):
        if hw % c == 0:
            return c
    return hw


# -----------------------------------------------------------------------------
# Pallas kernel: conv(im2col matmul) -> +lambda bias -> dual-BN affine -> ReLU
#                -> running sum-pool -> (last HW chunk) FC
# -----------------------------------------------------------------------------
def _oat_fused_kernel(patches_ref,  # (Nb, Ch, Pp)  bf16 im2col patches (no lambda chan)
                      convw_ref,    # (Pp, Cp)      bf16 flattened 3x3 conv weight
                      lamb_ref,     # (1, Ch, Cp)   f32 per-pixel lambda-channel conv bias
                      ss_ref,       # (Nb, 2, Cp)   f32 folded dual-BN [scale; shift]
                      fcw_ref,      # (Cp, NCp)     bf16 classifier weight (1/HW folded)
                      fcb_ref,      # (1, NCp)      f32 classifier bias
                      out_ref,      # (Nb, NCp)     f32 logits
                      pooled_ref):  # (Nb, Cp)      f32 scratch: running spatial sum
    h = pl.program_id(1)

    @pl.when(h == 0)
    def _():
        pooled_ref[...] = jnp.zeros_like(pooled_ref)

    Nb, Ch, Pp = patches_ref.shape
    Cp = convw_ref.shape[1]

    # Conv over this HW chunk: one lane-dense MXU matmul, f32 accumulation.
    y = jnp.dot(patches_ref[...].reshape(Nb * Ch, Pp), convw_ref[...],
                preferred_element_type=jnp.float32).reshape(Nb, Ch, Cp)

    # Exact lambda-channel contribution, then folded dual-BN affine + ReLU (f32 VPU).
    ss = ss_ref[...]
    scale = ss[:, 0:1, :]                               # (Nb, 1, Cp)
    shift = ss[:, 1:2, :]
    y = jnp.maximum((y + lamb_ref[...]) * scale + shift, 0.0)

    # Running global sum pool (the 1/HW factor lives in fc_w).
    pooled_ref[...] += jnp.sum(y, axis=1)

    @pl.when(h == pl.num_programs(1) - 1)
    def _():
        logits = jnp.dot(pooled_ref[...].astype(fcw_ref.dtype), fcw_ref[...],
                         preferred_element_type=jnp.float32) + fcb_ref[...]
        out_ref[...] = logits


def _im2col_3x3(x_nhwc):
    """3x3, stride 1, pad 1 patches. Last-dim order: (kh, kw, c) with c minor."""
    N, H, W, C = x_nhwc.shape
    xp = jnp.pad(x_nhwc, ((0, 0), (1, 1), (1, 1), (0, 0)))
    cols = []
    for dh in range(3):
        for dw in range(3):
            cols.append(xp[:, dh:dh + H, dw:dw + W, :])
    return jnp.concatenate(cols, axis=-1).reshape(N, H * W, 9 * C)


def wrap_oat_forward(x_nchw, _lambda, idx2BN, params, *, block_n=32):
    """Forward pass of WrapOATModel (fused OAT-cat inner model).

    x_nchw : (N, C, H, W) float32   (PyTorch NCHW convention)
    _lambda: scalar in [0,1]
    idx2BN : int; samples [0, idx2BN) use BN_clean, the rest BN_adv
    """
    N, C, H, W = x_nchw.shape
    HW = H * W
    C_cat = C + 1

    conv_w = params["conv_w"]                  # (9*(C+1), C_out), taps (kh,kw,c) c-minor
    C_out = conv_w.shape[1]
    NC = params["fc_w"].shape[1]

    # ---- split conv weight: image-channel taps vs lambda-channel taps ----------
    w_full = conv_w.reshape(9, C_cat, C_out)
    w_img = w_full[:, :C, :].reshape(9 * C, C_out)       # (9C, C_out)
    w_lam = w_full[:, C, :]                               # (9,  C_out)

    # ---- padded sizes / blocking ------------------------------------------------
    P = 9 * C
    P_pad = _round_up(P, 64)          # lane-friendly; 2x less HBM than padding to 128
    C_pad = _round_up(C_out, 128)
    NC_pad = _round_up(NC, 128)

    Nb = max(8, min(block_n, _round_up(-(-N // 2), 8)))
    n_blk = max(2, -(-N // Nb))       # >=2 grid steps so v7x megacore shards batch axis
    N_pad = n_blk * Nb

    hw_chunk = _pick_hw_chunk(HW)     # bounds the f32 conv intermediate in VMEM
    n_hw = HW // hw_chunk

    # ---- lambda channel folded algebraically (exact incl. zero-padded borders) ---
    tap_valid = _im2col_3x3(jnp.ones((1, H, W, 1), jnp.float32)).reshape(HW, 9)
    lam_bias = jnp.asarray(_lambda, jnp.float32) * (tap_valid @ w_lam)   # (HW, C_out)
    lam_bias = jnp.pad(lam_bias, ((0, 0), (0, C_pad - C_out))).reshape(1, HW, C_pad)

    # ---- im2col patches: bf16 before layout prep; lambda channel never streamed --
    x_nhwc = jnp.transpose(x_nchw, (0, 2, 3, 1)).astype(jnp.bfloat16)
    patches = _im2col_3x3(x_nhwc)                                        # (N, HW, 9C)
    patches = jnp.pad(patches, ((0, N_pad - N), (0, 0), (0, P_pad - P)))

    conv_w_img = jnp.pad(w_img, ((0, P_pad - P),
                                 (0, C_pad - C_out))).astype(jnp.bfloat16)

    # ---- fold dual BatchNorm (inference) into a per-sample [scale; shift] table --
    eps = 1e-5

    def fold(gamma, beta, mean, var):
        s = gamma * jax.lax.rsqrt(var + eps)
        return s, beta - mean * s

    s0, b0 = fold(params["bn0_gamma"], params["bn0_beta"],
                  params["bn0_mean"], params["bn0_var"])
    s1, b1 = fold(params["bn1_gamma"], params["bn1_beta"],
                  params["bn1_mean"], params["bn1_var"])
    use_clean = (jnp.arange(N_pad) < idx2BN)[:, None]                    # (N_pad, 1)
    scale = jnp.where(use_clean, s0[None, :], s1[None, :])               # (N_pad, C_out)
    shift = jnp.where(use_clean, b0[None, :], b1[None, :])
    ss = jnp.stack([scale, shift], axis=1)                               # (N_pad, 2, C_out)
    ss = jnp.pad(ss, ((0, 0), (0, 0), (0, C_pad - C_out)))

    # ---- classifier (1/HW pooling factor folded into the weight) -----------------
    fc_w = jnp.pad(params["fc_w"] * (1.0 / HW),
                   ((0, C_pad - C_out), (0, NC_pad - NC))).astype(jnp.bfloat16)
    fc_b = jnp.pad(params["fc_b"], (0, NC_pad - NC)).reshape(1, NC_pad)

    out = pl.pallas_call(
        _oat_fused_kernel,
        out_shape=jax.ShapeDtypeStruct((N_pad, NC_pad), jnp.float32),
        grid_spec=pltpu.PrefetchScalarGridSpec(
            num_scalar_prefetch=0,
            grid=(n_blk, n_hw),
            in_specs=[
                pl.BlockSpec((Nb, hw_chunk, P_pad), lambda g, h: (g, h, 0)),  # patches
                pl.BlockSpec((P_pad, C_pad), lambda g, h: (0, 0)),            # conv w
                pl.BlockSpec((1, hw_chunk, C_pad), lambda g, h: (0, h, 0)),   # lam bias
                pl.BlockSpec((Nb, 2, C_pad), lambda g, h: (g, 0, 0)),         # BN table
                pl.BlockSpec((C_pad, NC_pad), lambda g, h: (0, 0)),           # fc w
                pl.BlockSpec((1, NC_pad), lambda g, h: (0, 0)),               # fc b
            ],
            out_specs=pl.BlockSpec((Nb, NC_pad), lambda g, h: (g, 0)),
            scratch_shapes=[pltpu.VMEM((Nb, C_pad), jnp.float32)],
        ),
        compiler_params=pltpu.CompilerParams(
            dimension_semantics=("parallel", "arbitrary"),
            vmem_limit_bytes=32 * 1024 * 1024),
    )(patches, conv_w_img, lam_bias, ss, fc_w, fc_b)

    return out[:N, :NC]                                                  # logits (N, NC)


def init_params(C_in_cat, C_out, num_classes, key):
    """Deterministic synthetic parameters (shapes implied by the module)."""
    ks = jax.random.split(key, 6)
    P = 9 * C_in_cat
    # torch conv weight (C_out, C_in, 3, 3) -> permute (2,3,1,0) -> (9*C_in, C_out)
    conv_w = (jax.random.normal(ks[0], (P, C_out), jnp.float32)
              * (1.0 / jnp.sqrt(P)))
    params = dict(
        conv_w=conv_w,
        bn0_gamma=jnp.ones((C_out,), jnp.float32),
        bn0_beta=jnp.zeros((C_out,), jnp.float32),
        bn0_mean=0.1 * jax.random.normal(ks[1], (C_out,), jnp.float32),
        bn0_var=jnp.ones((C_out,), jnp.float32),
        bn1_gamma=1.0 + 0.05 * jax.random.normal(ks[2], (C_out,), jnp.float32),
        bn1_beta=0.05 * jax.random.normal(ks[3], (C_out,), jnp.float32),
        bn1_mean=0.1 * jax.random.normal(ks[4], (C_out,), jnp.float32),
        bn1_var=jnp.ones((C_out,), jnp.float32) * 1.2,
        fc_w=(jax.random.normal(ks[5], (C_out, num_classes), jnp.float32)
              * (1.0 / jnp.sqrt(C_out))),
        fc_b=jnp.zeros((num_classes,), jnp.float32),
    )
    return params


if __name__ == "__main__":
    key = jax.random.PRNGKey(0)
    k_x, k_p = jax.random.split(key)

    N, C, H, W = 2, 4, 16, 16
    C_out, num_classes = 32, 10
    _lambda = 0.5          # OAT trade-off scalar
    idx2BN = 1             # first sample -> clean BN, rest -> adversarial BN

    x = jax.random.normal(k_x, (N, C, H, W), jnp.float32)
    params = init_params(C + 1, C_out, num_classes, k_p)

    fwd = jax.jit(wrap_oat_forward)   # fuse host-side layout prep into one XLA graph
    logits = fwd(x, _lambda, idx2BN, params)
    jax.block_until_ready(logits)
    assert logits.shape == (N, num_classes)
    print("KERNEL_OK")
</pallas_src>

<mosaic_0001>
module attributes {stable_mosaic.version = 11 : i64} {
  func.func @_oat_fused_kernel(%arg0: i32, %arg1: i32, %arg2: memref<8x256x64xbf16, #tpu.memory_space<vmem>>, %arg3: memref<64x128xbf16, #tpu.memory_space<vmem>>, %arg4: memref<1x256x128xf32, #tpu.memory_space<vmem>>, %arg5: memref<8x2x128xf32, #tpu.memory_space<vmem>>, %arg6: memref<128x128xbf16, #tpu.memory_space<vmem>>, %arg7: memref<1x128xf32, #tpu.memory_space<vmem>>, %arg8: memref<8x128xf32, #tpu.memory_space<vmem>>, %arg9: memref<8x128xf32, #tpu.memory_space<vmem>>) attributes {dimension_semantics = [#tpu.dimension_semantics<parallel>, #tpu.dimension_semantics<arbitrary>], iteration_bounds = array<i64: 2, 1>, scalar_prefetch = 0 : i64, scratch_operands = 1 : i64, tpu.core_type = #tpu.core_type<tc>, window_params = [{transform_indices = @transform_0, window_bounds = array<i64: 8, 256, 64>}, {pipeline_mode = #tpu.pipeline_mode<synchronous>, transform_indices = @transform_1, window_bounds = array<i64: 64, 128>}, {transform_indices = @transform_2, window_bounds = array<i64: 1, 256, 128>}, {transform_indices = @transform_3, window_bounds = array<i64: 8, 2, 128>}, {pipeline_mode = #tpu.pipeline_mode<synchronous>, transform_indices = @transform_4, window_bounds = array<i64: 128, 128>}, {pipeline_mode = #tpu.pipeline_mode<synchronous>, transform_indices = @transform_5, window_bounds = array<i64: 1, 128>}, {transform_indices = @transform_6, window_bounds = array<i64: 8, 128>}]} {
    %c0_i32 = arith.constant 0 : i32
    %0 = arith.cmpi eq, %arg1, %c0_i32 : i32
    %1 = arith.extui %0 : i1 to i32
    %c0_i32_0 = arith.constant 0 : i32
    %2 = arith.cmpi ne, %1, %c0_i32_0 : i32
    scf.if %2 {
      %cst_19 = arith.constant 0.000000e+00 : f32
      %27 = vector.broadcast %cst_19 : f32 to vector<8x128xf32>
      %c0_20 = arith.constant 0 : index
      %c0_21 = arith.constant 0 : index
      %28 = vector.load %arg9[%c0_20, %c0_21] : memref<8x128xf32, #tpu.memory_space<vmem>>, vector<8x128xf32>
      tpu.vector_store %arg9[%c0_20, %c0_21], %27 {strides = array<i32>} : memref<8x128xf32, #tpu.memory_space<vmem>>, vector<8x128xf32>,
    } else {
    }
    %c0 = arith.constant 0 : index
    %c0_1 = arith.constant 0 : index
    %c0_2 = arith.constant 0 : index
    %3 = vector.load %arg2[%c0, %c0_1, %c0_2] : memref<8x256x64xbf16, #tpu.memory_space<vmem>>, vector<8x256x64xbf16>
    %4 = vector.shape_cast %3 : vector<8x256x64xbf16> to vector<2048x64xbf16>
    %c0_3 = arith.constant 0 : index
    %c0_4 = arith.constant 0 : index
    %5 = vector.load %arg3[%c0_3, %c0_4] : memref<64x128xbf16, #tpu.memory_space<vmem>>, vector<64x128xbf16>
    %cst = arith.constant dense<0.000000e+00> : vector<2048x128xf32>
    %6 = tpu.matmul %4, %5, %cst {dimension_numbers = #tpu.dot_dimension_numbers<[1], [0], [0], [1], [0, 0, 1, 1], [], []>} : vector<2048x64xbf16>, vector<64x128xbf16>, vector<2048x128xf32> -> vector<2048x128xf32>
    %7 = vector.shape_cast %6 : vector<2048x128xf32> to vector<8x256x128xf32>
    %c0_5 = arith.constant 0 : index
    %c0_6 = arith.constant 0 : index
    %c0_7 = arith.constant 0 : index
    %8 = vector.load %arg5[%c0_5, %c0_6, %c0_7] : memref<8x2x128xf32, #tpu.memory_space<vmem>>, vector<8x2x128xf32>
    %9 = vector.extract_strided_slice %8 {offsets = [0, 0, 0], sizes = [8, 1, 128], strides = [1, 1, 1]} : vector<8x2x128xf32> to vector<8x1x128xf32>
    %10 = vector.extract_strided_slice %8 {offsets = [0, 1, 0], sizes = [8, 1, 128], strides = [1, 1, 1]} : vector<8x2x128xf32> to vector<8x1x128xf32>
    %c0_8 = arith.constant 0 : index
    %c0_9 = arith.constant 0 : index
    %c0_10 = arith.constant 0 : index
    %11 = vector.load %arg4[%c0_8, %c0_9, %c0_10] : memref<1x256x128xf32, #tpu.memory_space<vmem>>, vector<1x256x128xf32>
    %12 = vector.broadcast %11 : vector<1x256x128xf32> to vector<8x256x128xf32>
    %13 = arith.addf %7, %12 : vector<8x256x128xf32>
    %14 = vector.broadcast %9 : vector<8x1x128xf32> to vector<8x256x128xf32>
    %15 = arith.mulf %13, %14 : vector<8x256x128xf32>
    %16 = vector.broadcast %10 : vector<8x1x128xf32> to vector<8x256x128xf32>
    %17 = arith.addf %15, %16 : vector<8x256x128xf32>
    %cst_11 = arith.constant 0.000000e+00 : f32
    %18 = vector.broadcast %cst_11 : f32 to vector<8x256x128xf32>
    %19 = arith.maximumf %17, %18 : vector<8x256x128xf32>
    %c0_12 = arith.constant 0 : index
    %c0_13 = arith.constant 0 : index
    %20 = vector.load %arg9[%c0_12, %c0_13] : memref<8x128xf32, #tpu.memory_space<vmem>>, vector<8x128xf32>
    %cst_14 = arith.constant dense<0.000000e+00> : vector<8x128xf32>
    %21 = vector.multi_reduction <add>, %19, %cst_14 [1] : vector<8x256x128xf32> to vector<8x128xf32>
    %22 = arith.addf %20, %21 : vector<8x128xf32>
    %c0_15 = arith.constant 0 : index
    %c0_16 = arith.constant 0 : index
    %23 = vector.load %arg9[%c0_15, %c0_16] : memref<8x128xf32, #tpu.memory_space<vmem>>, vector<8x128xf32>
    tpu.vector_store %arg9[%c0_15, %c0_16], %22 {strides = array<i32>} : memref<8x128xf32, #tpu.memory_space<vmem>>, vector<8x128xf32>,
    %c0_i32_17 = arith.constant 0 : i32
    %24 = arith.cmpi eq, %arg1, %c0_i32_17 : i32
    %25 = arith.extui %24 : i1 to i32
    %c0_i32_18 = arith.constant 0 : i32
    %26 = arith.cmpi ne, %25, %c0_i32_18 : i32
    scf.if %26 {
      %c0_19 = arith.constant 0 : index
      %c0_20 = arith.constant 0 : index
      %27 = vector.load %arg9[%c0_19, %c0_20] : memref<8x128xf32, #tpu.memory_space<vmem>>, vector<8x128xf32>
      %28 = arith.truncf %27 : vector<8x128xf32> to vector<8x128xbf16>
      %c0_21 = arith.constant 0 : index
      %c0_22 = arith.constant 0 : index
      %29 = vector.load %arg6[%c0_21, %c0_22] : memref<128x128xbf16, #tpu.memory_space<vmem>>, vector<128x128xbf16>
      %cst_23 = arith.constant dense<0.000000e+00> : vector<8x128xf32>
      %30 = tpu.matmul %28, %29, %cst_23 {dimension_numbers = #tpu.dot_dimension_numbers<[1], [0], [0], [1], [0, 0, 1, 1], [], []>} : vector<8x128xbf16>, vector<128x128xbf16>, vector<8x128xf32> -> vector<8x128xf32>
      %c0_24 = arith.constant 0 : index
      %c0_25 = arith.constant 0 : index
      %31 = vector.load %arg7[%c0_24, %c0_25] : memref<1x128xf32, #tpu.memory_space<vmem>>, vector<1x128xf32>
      %32 = vector.broadcast %31 : vector<1x128xf32> to vector<8x128xf32>
      %33 = arith.addf %30, %32 : vector<8x128xf32>
      %c0_26 = arith.constant 0 : index
      %c0_27 = arith.constant 0 : index
      %34 = vector.load %arg8[%c0_26, %c0_27] : memref<8x128xf32, #tpu.memory_space<vmem>>, vector<8x128xf32>
      tpu.vector_store %arg8[%c0_26, %c0_27], %33 {strides = array<i32>} : memref<8x128xf32, #tpu.memory_space<vmem>>, vector<8x128xf32>,
    } else {
    }
    return
  }
  func.func @transform_0(%arg0: i32, %arg1: i32) -> (i32, i32, i32) {
    %c0_i32 = arith.constant 0 : i32
    %c0_i32_0 = arith.constant 0 : i32
    return %arg0, %arg1, %c0_i32 : i32, i32, i32
  }
  func.func @transform_1(%arg0: i32, %arg1: i32) -> (i32, i32) {
    %c0_i32 = arith.constant 0 : i32
    %c0_i32_0 = arith.constant 0 : i32
    %c0_i32_1 = arith.constant 0 : i32
    return %c0_i32, %c0_i32_0 : i32, i32
  }
  func.func @transform_2(%arg0: i32, %arg1: i32) -> (i32, i32, i32) {
    %c0_i32 = arith.constant 0 : i32
    %c0_i32_0 = arith.constant 0 : i32
    %c0_i32_1 = arith.constant 0 : i32
    return %c0_i32, %arg1, %c0_i32_0 : i32, i32, i32
  }
  func.func @transform_3(%arg0: i32, %arg1: i32) -> (i32, i32, i32) {
    %c0_i32 = arith.constant 0 : i32
    %c0_i32_0 = arith.constant 0 : i32
    %c0_i32_1 = arith.constant 0 : i32
    return %arg0, %c0_i32, %c0_i32_0 : i32, i32, i32
  }
  func.func @transform_4(%arg0: i32, %arg1: i32) -> (i32, i32) {
    %c0_i32 = arith.constant 0 : i32
    %c0_i32_0 = arith.constant 0 : i32
    %c0_i32_1 = arith.constant 0 : i32
    return %c0_i32, %c0_i32_0 : i32, i32
  }
  func.func @transform_5(%arg0: i32, %arg1: i32) -> (i32, i32) {
    %c0_i32 = arith.constant 0 : i32
    %c0_i32_0 = arith.constant 0 : i32
    %c0_i32_1 = arith.constant 0 : i32
    return %c0_i32, %c0_i32_0 : i32, i32
  }
  func.func @transform_6(%arg0: i32, %arg1: i32) -> (i32, i32) {
    %c0_i32 = arith.constant 0 : i32
    %c0_i32_0 = arith.constant 0 : i32
    return %arg0, %c0_i32 : i32, i32
  }
}

</mosaic_0001>

<bundles_post_ra>
// kernel: wrap_oat_forward.1
= control target key start
LH: loop header
LB: loop body
LE: loop exit
PB: predicated region body
PF: predicated region fallthrough
CT: control target
= control target key end

     0   :  { %s4856_s21 = smov 0   ;;  %s4858_s22 = smov 0   ;;  %s6465_s0 = inlined_call_operand.vmem [shape: bf16[16,256,64], index: 0, kind: input, shape index: {}]   ;;  %s6466_s1 = inlined_call_operand.vmem [shape: bf16[64,128], index: 1, kind: input, shape index: {}]   ;;  %s6467_s2 = inlined_call_operand.vmem [shape: f32[1,256,128], index: 2, kind: input, shape index: {}]   ;;  %s6468_s3 = inlined_call_operand.vmem [shape: f32[16,2,128], index: 3, kind: input, shape index: {}]   ;;  %s6469_s4 = inlined_call_operand.vmem [shape: bf16[128,128], index: 4, kind: input, shape index: {}]   ;;  %s6470_s5 = inlined_call_operand.vmem [shape: f32[1,128], index: 5, kind: input, shape index: {}]   ;;  %s6471_s6 = inlined_call_operand.vmem [shape: f32[16,128], index: 6, kind: output, shape index: {}]  }
   0x1   :  { %s4860_s23 = smov 0  }
   0x2 LB: > { %s28_s24 = sadd.s32 1, %s4815_s22  ;;  %p3884_p0 = scmp.ge.s32.totalorder %s4819_s23, 1  ;;  %s4819_s23 = sphi %s4860_s23, %s16_s23   ;;  %s4815_s22 = sphi %s4858_s22, %s6510_s22   ;;  %s4811_s21 = sphi %s4856_s21, %s6509_s21  }
   0x3   : > { %p30_p1 = scmp.ge.s32.totalorder %s28_s24, 2  ;;  %p255_p2 = scmp.lt.s32.totalorder %s4819_s23, 3 }
   0x5   : > { %s6512_s24 = smov (%p30_p1, %s28_s24), 0  ;;  %p256_p3 = pnand %p3884_p0, %p255_p2 }
   0x7   : > { %259 = sbr.rel (%p256_p3) target bundleno = 898 (0x382), region = 44 }
   0xc   : > { %v4713_v0 = vld [vmem:[%s6466_s1 + $0x18] sm:$0xff]  ;;  %s3885_s27 = sshll.u32 %s4811_s21, 3  ;;  %v4712_v1 = vld [vmem:[%s6466_s1 + $0x10] sm:$0xff]  ;;  %v4711_v2 = vld [vmem:[%s6466_s1 + $0x8] sm:$0xff]  ;;  %vm1261_vm0 = vcmask 523264   ;;  %vm3680_vm1 = vcmask 1041409  }
   0xd   : > { %p301_p4 = scmp.lt.s32.totalorder %s3885_s27, 15  ;;  %1650 = vmatpush.bf16.msra.mxu0 %v4713_v0  ;;  %4722 = vmatpush.bf16.msra.mxu1 %v4713_v0  ;;  %v4710_v3 = vld [vmem:[%s6466_s1] sm:$0xff]  ;;  %v4983_v45 = vld [vmem:[%s6467_s2 + $0x10] sm:$0xff]  ;;  %v5018_v62 = vld [vmem:[%s6467_s2 + $0x8] sm:$0xff]  ;;  %vm3682_vm2 = vcmask 1042434   ;;  %vm3684_vm3 = vcmask 1043459  }
   0xe   : > { %4723 = vmatpush.bf16.msra.mxu2 %v4713_v0  ;;  %4724 = vmatpush.bf16.msra.mxu3 %v4713_v0  ;;  %v4972_v38 = vld [vmem:[%s6467_s2] sm:$0xff]  ;;  %v2333_v59 = vld [vmem:[%s6467_s2 + $0xf0] sm:$0xff]  ;;  %vm3686_vm4 = vcmask 1044484   ;;  %vm3688_vm5 = vcmask 1045509   ;;  %vm3690_vm6 = vcmask 1046534   ;;  %vm3692_vm7 = vcmask 1047559  }
   0xf   : > { %s6514_s27 = smov (!%p301_p4, %s3885_s27), 15  ;;  %v2331_v58 = vld [vmem:[%s6467_s2 + $0xe0] sm:$0xff]  ;;  %p323_p5 = scmp.lt.s32.totalorder %s4811_s21, 1 }
  0x10   : > { %s4581_s8 = sshll.u32 %s6514_s27, 7  ;;  %s3889_s14 = sshll.u32 %s6514_s27, 1 }
  0x11   : > { %1651 = vmatpush.bf16.msra.mxu0 %v4712_v1  ;;  %4725 = vmatpush.bf16.msra.mxu1 %v4712_v1  ;;  %s4895_s13 = scalar_lea.vmem %s6465_s0, %s4581_s8  ;;  %s4965_s17 = scalar_lea.vmem %s6468_s3, %s3889_s14 }
  0x12   : > { %4726 = vmatpush.bf16.msra.mxu2 %v4712_v1  ;;  %4727 = vmatpush.bf16.msra.mxu3 %v4712_v1  ;;  %v4582_v4 = vld [vmem:[%s4895_s13] sm:$0xff]  ;;  %v4615_v5 = vld [vmem:[%s4895_s13 + $0x108] sm:$0xff]  ;;  %v4644_v6 = vld [vmem:[%s4895_s13 + $0x1f0] sm:$0xff]  ;;  %s6516_s21 = smov (!%p323_p5, %s4811_s21), 1 }
  0x13   : > { %v4677_v7 = vld [vmem:[%s4895_s13 + $0x2f8] sm:$0xff]  ;;  %v4583_v8 = vld [vmem:[%s4895_s13 + $0x8] sm:$0xff]  ;;  %v4616_v9 = vld [vmem:[%s4895_s13 + $0x110] sm:$0xff]  ;;  %s3890_s28 = sshll.u32 %s6516_s21, 3 }
  0x14   : > { %v4645_v10 = vld [vmem:[%s4895_s13 + $0x1f8] sm:$0xff]  ;;  %v4678_v11 = vld [vmem:[%s4895_s13 + $0x300] sm:$0xff]  ;;  %v4584_v12 = vld [vmem:[%s4895_s13 + $0x10] sm:$0xff]  ;;  %s326_s8 = scalar_lea.vmem %s6471_s6, %s3890_s28 }
  0x15   : > { %1652 = vmatpush.bf16.msra.mxu0 %v4711_v2  ;;  %4728 = vmatpush.bf16.msra.mxu1 %v4711_v2  ;;  %v4617_v13 = vld [vmem:[%s4895_s13 + $0x118] sm:$0xff]  ;;  %v4646_v14 = vld [vmem:[%s4895_s13 + $0x200] sm:$0xff]  ;;  %v4679_v15 = vld [vmem:[%s4895_s13 + $0x308] sm:$0xff] }
  0x16   : > { %4729 = vmatpush.bf16.msra.mxu2 %v4711_v2  ;;  %4730 = vmatpush.bf16.msra.mxu3 %v4711_v2  ;;  %v4585_v16 = vld [vmem:[%s4895_s13 + $0x18] sm:$0xff]  ;;  %v4618_v17 = vld [vmem:[%s4895_s13 + $0x120] sm:$0xff]  ;;  %v4647_v18 = vld [vmem:[%s4895_s13 + $0x208] sm:$0xff] }
  0x17   : > { %v4680_v19 = vld [vmem:[%s4895_s13 + $0x310] sm:$0xff]  ;;  %v4586_v20 = vld [vmem:[%s4895_s13 + $0x20] sm:$0xff]  ;;  %v4619_v21 = vld [vmem:[%s4895_s13 + $0x128] sm:$0xff] }
  0x18   : > { %v4648_v22 = vld [vmem:[%s4895_s13 + $0x210] sm:$0xff]  ;;  %v4681_v23 = vld [vmem:[%s4895_s13 + $0x318] sm:$0xff]  ;;  %v4587_v24 = vld [vmem:[%s4895_s13 + $0x28] sm:$0xff] }
  0x19   : > { %1653 = vmatpush.bf16.msra.mxu0 %v4710_v3  ;;  %4731 = vmatpush.bf16.msra.mxu1 %v4710_v3  ;;  %v4620_v25 = vld [vmem:[%s4895_s13 + $0x130] sm:$0xff]  ;;  %v4649_v26 = vld [vmem:[%s4895_s13 + $0x218] sm:$0xff]  ;;  %v4682_v27 = vld [vmem:[%s4895_s13 + $0x320] sm:$0xff] }
  0x1a   : > { %4732 = vmatpush.bf16.msra.mxu2 %v4710_v3  ;;  %4733 = vmatpush.bf16.msra.mxu3 %v4710_v3  ;;  %v4588_v28 = vld [vmem:[%s4895_s13 + $0x30] sm:$0xff]  ;;  %v4621_v29 = vld [vmem:[%s4895_s13 + $0x138] sm:$0xff]  ;;  %v4650_v30 = vld [vmem:[%s4895_s13 + $0x220] sm:$0xff] }
  0x1b   : > { %v4683_v31 = vld [vmem:[%s4895_s13 + $0x328] sm:$0xff]  ;;  %v4589_v32 = vld [vmem:[%s4895_s13 + $0x38] sm:$0xff]  ;;  %v4622_v33 = vld [vmem:[%s4895_s13 + $0x140] sm:$0xff] }
  0x1c   : > { %4419 = vmatmul.msk.bf16.vlgmr.msra.gmra.mxu0 %vm1261_vm0, %v4582_v4  ;;  %4452 = vmatmul.msk.bf16.vlgmr.msra.gmra.mxu1 %vm1261_vm0, %v4615_v5  ;;  %v4651_v34 = vld [vmem:[%s4895_s13 + $0x228] sm:$0xff]  ;;  %v4684_v35 = vld [vmem:[%s4895_s13 + $0x330] sm:$0xff]  ;;  %v2295_v36 = vld [vmem:[%s4965_s17] sm:$0x3] }
  0x1d   : > { %4481 = vmatmul.msk.bf16.vlgmr.msra.gmra.mxu2 %vm1261_vm0, %v4644_v6  ;;  %4514 = vmatmul.msk.bf16.vlgmr.msra.gmra.mxu3 %vm1261_vm0, %v4677_v7  ;;  %v2297_v37 = vld [vmem:[%s4965_s17 + $0x4] sm:$0x3]  ;;  %v4974_v39 = vperm.slane %v2295_v36, 0  ;;  %v4623_v42 = vld [vmem:[%s4895_s13 + $0x148] sm:$0xff]  ;;  %v4652_v46 = vld [vmem:[%s4895_s13 + $0x230] sm:$0xff]  ;;  %v4988_v49 = vperm.slane %v2295_v36, 1 }
  0x1e   : > { %v4976_v40 = vperm.slane %v2297_v37, 0  ;;  %v4590_v41 = vld [vmem:[%s4895_s13 + $0x40] sm:$0xff]  ;;  %v4685_v47 = vld [vmem:[%s4895_s13 + $0x338] sm:$0xff]  ;;  %v4991_v51 = vperm.slane %v2297_v37, 1  ;;  %v2300_v55 = vld [vmem:[%s4965_s17 + $0xa] sm:$0x3] }
  0x1f   : > { %v2298_v54 = vld [vmem:[%s4965_s17 + $0x6] sm:$0x3]  ;;  %v5013_v61 = vperm.slane %v2300_v55, 0  ;;  %v5022_v4 = vperm.slane %v2300_v55, 1  ;;  %v5027_v7 = vld [vmem:[%s6467_s2 + $0x18] sm:$0xff] }
  0x20   : > { %v5011_v60 = vperm.slane %v2298_v54, 0  ;;  %v5020_v2 = vperm.slane %v2298_v54, 1 }
  0x2c   : > { %4420 = vmatmul.msk.bf16.gmra.mxu0 %vm1261_vm0, %v4583_v8  ;;  %4453 = vmatmul.msk.bf16.gmra.mxu1 %vm1261_vm0, %v4616_v9 }
  0x2d   : > { %4482 = vmatmul.msk.bf16.gmra.mxu2 %vm1261_vm0, %v4645_v10  ;;  %4515 = vmatmul.msk.bf16.gmra.mxu3 %vm1261_vm0, %v4678_v11 }
  0x3c   : > { %4421 = vmatmul.msk.bf16.gmra.mxu0 %vm1261_vm0, %v4584_v12  ;;  %4454 = vmatmul.msk.bf16.gmra.mxu1 %vm1261_vm0, %v4617_v13 }
  0x3d   : > { %4483 = vmatmul.msk.bf16.gmra.mxu2 %vm1261_vm0, %v4646_v14  ;;  %4516 = vmatmul.msk.bf16.gmra.mxu3 %vm1261_vm0, %v4679_v15 }
  0x4c   : > { %4422 = vmatmul.msk.bf16.gmra.mxu0 %vm1261_vm0, %v4585_v16  ;;  %4455 = vmatmul.msk.bf16.gmra.mxu1 %vm1261_vm0, %v4618_v17 }
  0x4d   : > { %4484 = vmatmul.msk.bf16.gmra.mxu2 %vm1261_vm0, %v4647_v18  ;;  %4517 = vmatmul.msk.bf16.gmra.mxu3 %vm1261_vm0, %v4680_v19  ;;  %v2332_v18 = vld [vmem:[%s6467_s2 + $0xe8] sm:$0xff]  ;;  %v2334_v19 = vld [vmem:[%s6467_s2 + $0xf8] sm:$0xff] }
  0x5c   : > { %4423 = vmatmul.msk.bf16.gmra.mxu0 %vm1261_vm0, %v4586_v20  ;;  %4456 = vmatmul.msk.bf16.gmra.mxu1 %vm1261_vm0, %v4619_v21 }
  0x5d   : > { %4485 = vmatmul.msk.bf16.gmra.mxu2 %vm1261_vm0, %v4648_v22  ;;  %4518 = vmatmul.msk.bf16.gmra.mxu3 %vm1261_vm0, %v4681_v23 }
  0x6c   : > { %4424 = vmatmul.msk.bf16.gmra.mxu0 %vm1261_vm0, %v4587_v24  ;;  %4457 = vmatmul.msk.bf16.gmra.mxu1 %vm1261_vm0, %v4620_v25  ;;  %v4591_v24 = vld [vmem:[%s4895_s13 + $0x48] sm:$0xff]  ;;  %v4624_v25 = vld [vmem:[%s4895_s13 + $0x150] sm:$0xff] }
  0x6d   : > { %4486 = vmatmul.msk.bf16.gmra.mxu2 %vm1261_vm0, %v4649_v26  ;;  %4519 = vmatmul.msk.bf16.gmra.mxu3 %vm1261_vm0, %v4682_v27 }
  0x7c   : > { %4425 = vmatmul.msk.bf16.gmra.mxu0 %vm1261_vm0, %v4588_v28  ;;  %4458 = vmatmul.msk.bf16.gmra.mxu1 %vm1261_vm0, %v4621_v29 }
  0x7d   : > { %4487 = vmatmul.msk.bf16.gmra.mxu2 %vm1261_vm0, %v4650_v30  ;;  %4520 = vmatmul.msk.bf16.gmra.mxu3 %vm1261_vm0, %v4683_v31  ;;  %v5056_v30 = vld [vmem:[%s6467_s2 + $0x20] sm:$0xff]  ;;  %v4653_v31 = vld [vmem:[%s4895_s13 + $0x238] sm:$0xff] }
  0x8c   : > { %4426 = vmatmul.msk.bf16.gmra.mxu0 %vm1261_vm0, %v4589_v32  ;;  %4459 = vmatmul.msk.bf16.gmra.mxu1 %vm1261_vm0, %v4622_v33  ;;  %v4686_v32 = vld [vmem:[%s4895_s13 + $0x340] sm:$0xff] }
  0x8d   : > { %4488 = vmatmul.msk.bf16.gmra.mxu2 %vm1261_vm0, %v4651_v34  ;;  %4521 = vmatmul.msk.bf16.gmra.mxu3 %vm1261_vm0, %v4684_v35 }
  0x99   : > { %v1655_v43 = vpop.f32.mrf.mxu0  ;;  %v1820_v44 = vpop.f32.mrf.mxu1 }
  0x9a   : > { %v2335_v48 = vadd.f32 %v4972_v38, %v1655_v43  ;;  %v2401_v50 = vadd.f32 %v4983_v45, %v1820_v44  ;;  %v2301_v43 = vld [vmem:[%s4965_s17 + $0xc] sm:$0x3] }
  0x9c   : > { %v2599_v52 = vmul.f32 %v4974_v39, %v2335_v48  ;;  %v2665_v53 = vmul.f32 %v4976_v40, %v2401_v50  ;;  %4427 = vmatmul.msk.bf16.gmra.mxu0 %vm1261_vm0, %v4590_v41  ;;  %4460 = vmatmul.msk.bf16.gmra.mxu1 %vm1261_vm0, %v4623_v42  ;;  %v5081_v50 = vperm.slane %v2301_v43, 0 }
  0x9d   : > { %4489 = vmatmul.msk.bf16.gmra.mxu2 %vm1261_vm0, %v4652_v46  ;;  %4522 = vmatmul.msk.bf16.gmra.mxu3 %vm1261_vm0, %v4685_v47 }
  0x9e   : > { %v2863_v56 = vadd.f32 %v4988_v49, %v2599_v52  ;;  %v5003_v57 = vadd.f32 %v4991_v51, %v2665_v53 }
  0xa0   : > { %v1965_v63 = vpop.f32.mrf.mxu2  ;;  %v2130_v0 = vpop.f32.mrf.mxu3  ;;  %v3119_v20 = vmax.f32 %v2863_v56, 0.0 }
  0xa1   : > { %v2459_v1 = vadd.f32 %v2331_v58, %v1965_v63  ;;  %v2525_v3 = vadd.f32 %v2333_v59, %v2130_v0  ;;  %v1657_v5 = vpop.f32.mrf.mxu0  ;;  %v1822_v6 = vpop.f32.mrf.mxu1  ;;  %v5084_v58 = vperm.slane %v2301_v43, 1 }
  0xa2   : > { %v2336_v8 = vadd.f32 %v5018_v62, %v1657_v5  ;;  %v2402_v9 = vadd.f32 %v5027_v7, %v1822_v6 }
  0xa3   : > { %v2723_v10 = vmul.f32 %v5011_v60, %v2459_v1  ;;  %v2789_v11 = vmul.f32 %v5013_v61, %v2525_v3  ;;  %v5089_v1 = vld [vmem:[%s6467_s2 + $0x28] sm:$0xff] }
  0xa4   : > { %v2600_v12 = vmul.f32 %v4974_v39, %v2336_v8  ;;  %v2666_v13 = vmul.f32 %v4976_v40, %v2402_v9 }
  0xa5   : > { %v5036_v14 = vadd.f32 %v5020_v2, %v2723_v10  ;;  %v5039_v15 = vadd.f32 %v5022_v4, %v2789_v11 }
  0xa6   : > { %v2864_v16 = vadd.f32 %v4988_v49, %v2600_v12  ;;  %v5043_v17 = vadd.f32 %v4991_v51, %v2666_v13 }
  0xa8   : > { %v3120_v21 = vmax.f32 %v2864_v16, 0.0  ;;  %v1967_v22 = vpop.f32.mrf.mxu2  ;;  %v2132_v23 = vpop.f32.mrf.mxu3 }
  0xa9   : > { %v2460_v26 = vadd.f32 %v2332_v18, %v1967_v22  ;;  %v2526_v27 = vadd.f32 %v2334_v19, %v2132_v23  ;;  %v1660_v28 = vpop.f32.mrf.mxu0  ;;  %v1825_v29 = vpop.f32.mrf.mxu1  ;;  %v4592_v22 = vld [vmem:[%s4895_s13 + $0x50] sm:$0xff]  ;;  %v4625_v23 = vld [vmem:[%s4895_s13 + $0x158] sm:$0xff] }
  0xaa   : > { %v3376_v33 = vadd.f32 %v3120_v21, %v3119_v20  ;;  %v2337_v34 = vadd.f32 %v4983_v45, %v1660_v28  ;;  %v2403_v35 = vadd.f32 %v5056_v30, %v1825_v29  ;;  %v5111_v28 = vld [vmem:[%s6467_s2 + $0x30] sm:$0xff]  ;;  %v4654_v29 = vld [vmem:[%s4895_s13 + $0x240] sm:$0xff] }
  0xab   : > { %v2724_v36 = vmul.f32 %v5011_v60, %v2460_v26  ;;  %v2790_v37 = vmul.f32 %v5013_v61, %v2526_v27 }
  0xac   : > { %v2601_v41 = vmul.f32 %v4974_v39, %v2337_v34  ;;  %v2667_v42 = vmul.f32 %v4976_v40, %v2403_v35  ;;  %4428 = vmatmul.msk.bf16.gmra.mxu0 %vm1261_vm0, %v4591_v24  ;;  %4461 = vmatmul.msk.bf16.gmra.mxu1 %vm1261_vm0, %v4624_v25 }
  0xad   : > { %v5070_v44 = vadd.f32 %v5020_v2, %v2724_v36  ;;  %v5073_v46 = vadd.f32 %v5022_v4, %v2790_v37  ;;  %4490 = vmatmul.msk.bf16.gmra.mxu2 %vm1261_vm0, %v4653_v31  ;;  %4523 = vmatmul.msk.bf16.gmra.mxu3 %vm1261_vm0, %v4686_v32  ;;  %v4687_v31 = vld [vmem:[%s4895_s13 + $0x348] sm:$0xff] }
  0xae   : > { %v2865_v47 = vadd.f32 %v4988_v49, %v2601_v41  ;;  %v5079_v48 = vadd.f32 %v4991_v51, %v2667_v42  ;;  %v2299_v41 = vld [vmem:[%s4965_s17 + $0x8] sm:$0x3] }
  0xb0   : > { %v3121_v52 = vmax.f32 %v2865_v47, 0.0  ;;  %v1970_v53 = vpop.f32.mrf.mxu2  ;;  %v2135_v54 = vpop.f32.mrf.mxu3 }
  0xb1   : > { %v2461_v55 = vadd.f32 %v2333_v59, %v1970_v53  ;;  %v2527_v56 = vadd.f32 %v4972_v38, %v2135_v54  ;;  %v1662_v63 = vpop.f32.mrf.mxu0  ;;  %v1827_v0 = vpop.f32.mrf.mxu1 }
  0xb2   : > { %v3377_v3 = vadd.f32 %v3376_v33, %v3121_v52  ;;  %v2338_v5 = vadd.f32 %v5027_v7, %v1662_v63  ;;  %v2404_v6 = vadd.f32 %v5089_v1, %v1827_v0 }
  0xb3   : > { %v2725_v59 = vmul.f32 %v5011_v60, %v2461_v55  ;;  %v2791_v8 = vmul.f32 %v5081_v50, %v2527_v56  ;;  %v5134_v55 = vperm.slane %v2299_v41, 0 }
  0xb4   : > { %v2602_v9 = vmul.f32 %v4974_v39, %v2338_v5  ;;  %v2668_v10 = vmul.f32 %v4976_v40, %v2404_v6  ;;  %v5137_v6 = vperm.slane %v2299_v41, 1 }
  0xb5   : > { %v5098_v11 = vadd.f32 %v5020_v2, %v2725_v59  ;;  %v3055_v12 = vadd.f32 %v5084_v58, %v2791_v8 }
  0xb6   : > { %v2866_v13 = vadd.f32 %v4988_v49, %v2602_v9  ;;  %v5103_v16 = vadd.f32 %v4991_v51, %v2668_v10  ;;  %v5143_v10 = vld [vmem:[%s6467_s2 + $0x38] sm:$0xff] }
  0xb7   : > { %v3311_v42 = vmax.f32 %v3055_v12, 0.0 }
  0xb8   : > { %v3122_v18 = vmax.f32 %v2866_v13, 0.0  ;;  %v1972_v20 = vpop.f32.mrf.mxu2  ;;  %v2137_v21 = vpop.f32.mrf.mxu3 }
  0xb9   : > { %v2462_v24 = vadd.f32 %v2334_v19, %v1972_v20  ;;  %v2528_v25 = vadd.f32 %v5018_v62, %v2137_v21  ;;  %v1665_v26 = vpop.f32.mrf.mxu0  ;;  %v1830_v27 = vpop.f32.mrf.mxu1 }
  0xba   : > { %v3378_v32 = vadd.f32 %v3377_v3, %v3122_v18  ;;  %v2339_v33 = vadd.f32 %v5056_v30, %v1665_v26  ;;  %v2405_v34 = vadd.f32 %v5111_v28, %v1830_v27 }
  0xbb   : > { %v2726_v35 = vmul.f32 %v5011_v60, %v2462_v24  ;;  %v2792_v19 = vmul.f32 %v5081_v50, %v2528_v25 }
  0xbc   : > { %v2603_v36 = vmul.f32 %v4974_v39, %v2339_v33  ;;  %v2669_v37 = vmul.f32 %v4976_v40, %v2405_v34  ;;  %4429 = vmatmul.msk.bf16.gmra.mxu0 %vm1261_vm0, %v4592_v22  ;;  %4462 = vmatmul.msk.bf16.gmra.mxu1 %vm1261_vm0, %v4625_v23  ;;  %v4593_v33 = vld [vmem:[%s4895_s13 + $0x58] sm:$0xff]  ;;  %v4626_v34 = vld [vmem:[%s4895_s13 + $0x160] sm:$0xff] }
  0xbd   : > { %v5125_v43 = vadd.f32 %v5020_v2, %v2726_v35  ;;  %v3056_v47 = vadd.f32 %v5084_v58, %v2792_v19  ;;  %4491 = vmatmul.msk.bf16.gmra.mxu2 %vm1261_vm0, %v4654_v29  ;;  %4524 = vmatmul.msk.bf16.gmra.mxu3 %vm1261_vm0, %v4687_v31 }
  0xbe   : > { %v2867_v52 = vadd.f32 %v4988_v49, %v2603_v36  ;;  %v5132_v53 = vadd.f32 %v4991_v51, %v2669_v37 }
  0xbf   : > { %v3312_v54 = vmax.f32 %v3056_v47, 0.0  ;;  %v4655_v47 = vld [vmem:[%s4895_s13 + $0x248] sm:$0xff] }
  0xc0   : > { %v3123_v56 = vmax.f32 %v2867_v52, 0.0  ;;  %v1975_v63 = vpop.f32.mrf.mxu2  ;;  %v2140_v0 = vpop.f32.mrf.mxu3  ;;  %v4688_v52 = vld [vmem:[%s4895_s13 + $0x350] sm:$0xff] }
  0xc1   : > { %v3598_v3 = vadd.f32 %v3312_v54, %v3311_v42  ;;  %v2463_v5 = vadd.f32 %v4972_v38, %v1975_v63  ;;  %v2529_v59 = vadd.f32 %v4983_v45, %v2140_v0  ;;  %v1667_v8 = vpop.f32.mrf.mxu0  ;;  %v1832_v9 = vpop.f32.mrf.mxu1  ;;  %v5164_v42 = vld [vmem:[%s6467_s2 + $0x40] sm:$0xff] }
  0xc2   : > { %v3379_v12 = vadd.f32 %v3378_v32, %v3123_v56  ;;  %v2340_v13 = vadd.f32 %v5089_v1, %v1667_v8  ;;  %v2406_v18 = vadd.f32 %v5143_v10, %v1832_v9 }
  0xc3   : > { %v2727_v38 = vmul.f32 %v5134_v55, %v2463_v5  ;;  %v2793_v20 = vmul.f32 %v5081_v50, %v2529_v59 }
  0xc4   : > { %v2604_v21 = vmul.f32 %v4974_v39, %v2340_v13  ;;  %v2670_v22 = vmul.f32 %v4976_v40, %v2406_v18 }
  0xc5   : > { %v2991_v23 = vadd.f32 %v5137_v6, %v2727_v38  ;;  %v3057_v24 = vadd.f32 %v5084_v58, %v2793_v20 }
  0xc6   : > { %v2868_v25 = vadd.f32 %v4988_v49, %v2604_v21  ;;  %v5155_v26 = vadd.f32 %v4991_v51, %v2670_v22 }
  0xc7   : > { %v3313_v27 = vmax.f32 %v3057_v24, 0.0  ;;  %v3247_v59 = vmax.f32 %v2991_v23, 0.0 }
  0xc8   : > { %v3124_v29 = vmax.f32 %v2868_v25, 0.0  ;;  %v1977_v31 = vpop.f32.mrf.mxu2  ;;  %v2142_v32 = vpop.f32.mrf.mxu3 }
  0xc9   : > { %v3599_v35 = vadd.f32 %v3598_v3, %v3313_v27  ;;  %v2464_v19 = vadd.f32 %v5018_v62, %v1977_v31  ;;  %v2530_v36 = vadd.f32 %v5027_v7, %v2142_v32  ;;  %v1670_v37 = vpop.f32.mrf.mxu0  ;;  %v1835_v41 = vpop.f32.mrf.mxu1  ;;  %v5189_v32 = vld [vmem:[%s6467_s2 + $0x48] sm:$0xff] }
  0xca   : > { %v3380_v54 = vadd.f32 %v3379_v12, %v3124_v29  ;;  %v2341_v56 = vadd.f32 %v5111_v28, %v1670_v37  ;;  %v2407_v63 = vadd.f32 %v5164_v42, %v1835_v41 }
  0xcb   : > { %v2728_v0 = vmul.f32 %v5134_v55, %v2464_v19  ;;  %v2794_v62 = vmul.f32 %v5081_v50, %v2530_v36 }
  0xcc   : > { %v2605_v3 = vmul.f32 %v4974_v39, %v2341_v56  ;;  %v2671_v5 = vmul.f32 %v4976_v40, %v2407_v63  ;;  %4430 = vmatmul.msk.bf16.gmra.mxu0 %vm1261_vm0, %v4593_v33  ;;  %4463 = vmatmul.msk.bf16.gmra.mxu1 %vm1261_vm0, %v4626_v34 }
  0xcd   : > { %v2992_v8 = vadd.f32 %v5137_v6, %v2728_v0  ;;  %v3058_v9 = vadd.f32 %v5084_v58, %v2794_v62  ;;  %4492 = vmatmul.msk.bf16.gmra.mxu2 %vm1261_vm0, %v4655_v47  ;;  %4525 = vmatmul.msk.bf16.gmra.mxu3 %vm1261_vm0, %v4688_v52 }
  0xce   : > { %v2869_v12 = vadd.f32 %v4988_v49, %v2605_v3  ;;  %v5182_v13 = vadd.f32 %v4991_v51, %v2671_v5  ;;  %v4594_v5 = vld [vmem:[%s4895_s13 + $0x60] sm:$0xff] }
  0xcf   : > { %v3248_v18 = vmax.f32 %v2992_v8, 0.0  ;;  %v3314_v38 = vmax.f32 %v3058_v9, 0.0 }
  0xd0   : > { %v3125_v20 = vmax.f32 %v2869_v12, 0.0  ;;  %v1980_v21 = vpop.f32.mrf.mxu2  ;;  %v2145_v22 = vpop.f32.mrf.mxu3 }
  0xd1   : > { %v3524_v24 = vadd.f32 %v3248_v18, %v3247_v59  ;;  %v3600_v23 = vadd.f32 %v3599_v35, %v3314_v38  ;;  %v2465_v25 = vadd.f32 %v4983_v45, %v1980_v21  ;;  %v2531_v27 = vadd.f32 %v5056_v30, %v2145_v22  ;;  %v1672_v29 = vpop.f32.mrf.mxu0  ;;  %v1837_v31 = vpop.f32.mrf.mxu1  ;;  %v4627_v59 = vld [vmem:[%s4895_s13 + $0x168] sm:$0xff]  ;;  %v5210_v21 = vld [vmem:[%s6467_s2 + $0x50] sm:$0xff] }
  0xd2   : > { %v3381_v33 = vadd.f32 %v3380_v54, %v3125_v20  ;;  %v2342_v34 = vadd.f32 %v5143_v10, %v1672_v29  ;;  %v2408_v19 = vadd.f32 %v5189_v32, %v1837_v31  ;;  %v4656_v22 = vld [vmem:[%s4895_s13 + $0x250] sm:$0xff] }
  0xd3   : > { %v2729_v35 = vmul.f32 %v5134_v55, %v2465_v25  ;;  %v2795_v45 = vmul.f32 %v5081_v50, %v2531_v27  ;;  %v4689_v25 = vld [vmem:[%s4895_s13 + $0x358] sm:$0xff] }
  0xd4   : > { %v2606_v36 = vmul.f32 %v4974_v39, %v2342_v34  ;;  %v2672_v37 = vmul.f32 %v4976_v40, %v2408_v19 }
  0xd5   : > { %v2993_v41 = vadd.f32 %v5137_v6, %v2729_v35  ;;  %v3059_v47 = vadd.f32 %v5084_v58, %v2795_v45 }
  0xd6   : > { %v2870_v52 = vadd.f32 %v4988_v49, %v2606_v36  ;;  %v5201_v54 = vadd.f32 %v4991_v51, %v2672_v37 }
  0xd7   : > { %v3249_v56 = vmax.f32 %v2993_v41, 0.0  ;;  %v3315_v63 = vmax.f32 %v3059_v47, 0.0 }
  0xd8   : > { %v3126_v0 = vmax.f32 %v2870_v52, 0.0  ;;  %v1982_v62 = vpop.f32.mrf.mxu2  ;;  %v2147_v3 = vpop.f32.mrf.mxu3 }
  0xd9   : > { %v3525_v8 = vadd.f32 %v3524_v24, %v3249_v56  ;;  %v3601_v9 = vadd.f32 %v3600_v23, %v3315_v63  ;;  %v2466_v12 = vadd.f32 %v5027_v7, %v1982_v62  ;;  %v2532_v18 = vadd.f32 %v5089_v1, %v2147_v3  ;;  %v1675_v38 = vpop.f32.mrf.mxu0  ;;  %v1840_v20 = vpop.f32.mrf.mxu1 }
  0xda   : > { %v3382_v27 = vadd.f32 %v3381_v33, %v3126_v0  ;;  %v2343_v29 = vadd.f32 %v5164_v42, %v1675_v38  ;;  %v2409_v31 = vadd.f32 %v5210_v21, %v1840_v20 }
  0xdb   : > { %v2730_v24 = vmul.f32 %v5134_v55, %v2466_v12  ;;  %v2796_v7 = vmul.f32 %v5081_v50, %v2532_v18 }
  0xdc   : > { %v2607_v23 = vmul.f32 %v4974_v39, %v2343_v29  ;;  %v2673_v34 = vmul.f32 %v4976_v40, %v2409_v31  ;;  %4431 = vmatmul.msk.bf16.gmra.mxu0 %vm1261_vm0, %v4594_v5  ;;  %4464 = vmatmul.msk.bf16.gmra.mxu1 %vm1261_vm0, %v4627_v59  ;;  %v5235_v59 = vld [vmem:[%s6467_s2 + $0x58] sm:$0xff] }
  0xdd   : > { %v2994_v19 = vadd.f32 %v5137_v6, %v2730_v24  ;;  %v3060_v33 = vadd.f32 %v5084_v58, %v2796_v7  ;;  %4493 = vmatmul.msk.bf16.gmra.mxu2 %vm1261_vm0, %v4656_v22  ;;  %4526 = vmatmul.msk.bf16.gmra.mxu3 %vm1261_vm0, %v4689_v25 }
  0xde   : > { %v2871_v35 = vadd.f32 %v4988_v49, %v2607_v23  ;;  %v5228_v45 = vadd.f32 %v4991_v51, %v2673_v34 }
  0xdf   : > { %v3250_v36 = vmax.f32 %v2994_v19, 0.0  ;;  %v3316_v37 = vmax.f32 %v3060_v33, 0.0  ;;  %v4595_v19 = vld [vmem:[%s4895_s13 + $0x68] sm:$0xff]  ;;  %v4628_v33 = vld [vmem:[%s4895_s13 + $0x170] sm:$0xff] }
  0xe0   : > { %v3127_v41 = vmax.f32 %v2871_v35, 0.0  ;;  %v1985_v47 = vpop.f32.mrf.mxu2  ;;  %v2150_v52 = vpop.f32.mrf.mxu3 }
  0xe1   : > { %v3526_v56 = vadd.f32 %v3525_v8, %v3250_v36  ;;  %v3602_v63 = vadd.f32 %v3601_v9, %v3316_v37  ;;  %v2467_v0 = vadd.f32 %v5056_v30, %v1985_v47  ;;  %v2533_v62 = vadd.f32 %v5111_v28, %v2150_v52  ;;  %v1677_v3 = vpop.f32.mrf.mxu0  ;;  %v1842_v5 = vpop.f32.mrf.mxu1 }
  0xe2   : > { %v3383_v12 = vadd.f32 %v3382_v27, %v3127_v41  ;;  %v2344_v18 = vadd.f32 %v5189_v32, %v1677_v3  ;;  %v2410_v38 = vadd.f32 %v5235_v59, %v1842_v5  ;;  %v4690_v3 = vld [vmem:[%s4895_s13 + $0x360] sm:$0xff] }
  0xe3   : > { %v2731_v8 = vmul.f32 %v5134_v55, %v2467_v0  ;;  %v2797_v30 = vmul.f32 %v5081_v50, %v2533_v62  ;;  %v5256_v0 = vld [vmem:[%s6467_s2 + $0x60] sm:$0xff]  ;;  %v4657_v62 = vld [vmem:[%s4895_s13 + $0x258] sm:$0xff] }
  0xe4   : > { %v2608_v9 = vmul.f32 %v4974_v39, %v2344_v18  ;;  %v2674_v20 = vmul.f32 %v4976_v40, %v2410_v38 }
  0xe5   : > { %v2995_v22 = vadd.f32 %v5137_v6, %v2731_v8  ;;  %v3061_v25 = vadd.f32 %v5084_v58, %v2797_v30 }
  0xe6   : > { %v2872_v27 = vadd.f32 %v4988_v49, %v2608_v9  ;;  %v5247_v29 = vadd.f32 %v4991_v51, %v2674_v20 }
  0xe7   : > { %v3251_v31 = vmax.f32 %v2995_v22, 0.0  ;;  %v3317_v24 = vmax.f32 %v3061_v25, 0.0 }
  0xe8   : > { %v3128_v7 = vmax.f32 %v2872_v27, 0.0  ;;  %v1987_v23 = vpop.f32.mrf.mxu2  ;;  %v2152_v34 = vpop.f32.mrf.mxu3 }
  0xe9   : > { %v3527_v35 = vadd.f32 %v3526_v56, %v3251_v31  ;;  %v3603_v36 = vadd.f32 %v3602_v63, %v3317_v24  ;;  %v2468_v37 = vadd.f32 %v5089_v1, %v1987_v23  ;;  %v2534_v41 = vadd.f32 %v5143_v10, %v2152_v34  ;;  %v1680_v47 = vpop.f32.mrf.mxu0  ;;  %v1845_v52 = vpop.f32.mrf.mxu1 }
  0xea   : > { %v3384_v5 = vadd.f32 %v3383_v12, %v3128_v7  ;;  %v2345_v18 = vadd.f32 %v5210_v21, %v1680_v47  ;;  %v2411_v38 = vadd.f32 %v5256_v0, %v1845_v52 }
  0xeb   : > { %v2732_v56 = vmul.f32 %v5134_v55, %v2468_v37  ;;  %v2798_v1 = vmul.f32 %v5081_v50, %v2534_v41  ;;  %v5281_v41 = vld [vmem:[%s6467_s2 + $0x68] sm:$0xff] }
  0xec   : > { %v2609_v63 = vmul.f32 %v4974_v39, %v2345_v18  ;;  %v2675_v8 = vmul.f32 %v4976_v40, %v2411_v38  ;;  %4432 = vmatmul.msk.bf16.gmra.mxu0 %vm1261_vm0, %v4595_v19  ;;  %4465 = vmatmul.msk.bf16.gmra.mxu1 %vm1261_vm0, %v4628_v33 }
  0xed   : > { %v2996_v30 = vadd.f32 %v5137_v6, %v2732_v56  ;;  %v3062_v12 = vadd.f32 %v5084_v58, %v2798_v1  ;;  %4494 = vmatmul.msk.bf16.gmra.mxu2 %vm1261_vm0, %v4657_v62  ;;  %4527 = vmatmul.msk.bf16.gmra.mxu3 %vm1261_vm0, %v4690_v3 }
  0xee   : > { %v2873_v9 = vadd.f32 %v4988_v49, %v2609_v63  ;;  %v5274_v20 = vadd.f32 %v4991_v51, %v2675_v8 }
  0xef   : > { %v3252_v22 = vmax.f32 %v2996_v30, 0.0  ;;  %v3318_v25 = vmax.f32 %v3062_v12, 0.0 }
  0xf0   : > { %v3129_v27 = vmax.f32 %v2873_v9, 0.0  ;;  %v1990_v31 = vpop.f32.mrf.mxu2  ;;  %v2155_v24 = vpop.f32.mrf.mxu3  ;;  %v4596_v9 = vld [vmem:[%s4895_s13 + $0x70] sm:$0xff] }
  0xf1   : > { %v3528_v7 = vadd.f32 %v3527_v35, %v3252_v22  ;;  %v3604_v23 = vadd.f32 %v3603_v36, %v3318_v25  ;;  %v2469_v34 = vadd.f32 %v5111_v28, %v1990_v31  ;;  %v2535_v19 = vadd.f32 %v5164_v42, %v2155_v24  ;;  %v1682_v33 = vpop.f32.mrf.mxu0  ;;  %v1847_v37 = vpop.f32.mrf.mxu1  ;;  %v4629_v22 = vld [vmem:[%s4895_s13 + $0x178] sm:$0xff] }
  0xf2   : > { %v3385_v47 = vadd.f32 %v3384_v5, %v3129_v27  ;;  %v2346_v52 = vadd.f32 %v5235_v59, %v1682_v33  ;;  %v2412_v62 = vadd.f32 %v5281_v41, %v1847_v37  ;;  %v5302_v33 = vld [vmem:[%s6467_s2 + $0x70] sm:$0xff]  ;;  %v4658_v37 = vld [vmem:[%s4895_s13 + $0x260] sm:$0xff] }
  0xf3   : > { %v2733_v35 = vmul.f32 %v5134_v55, %v2469_v34  ;;  %v2799_v28 = vmul.f32 %v5081_v50, %v2535_v19 }
  0xf4   : > { %v2610_v36 = vmul.f32 %v4974_v39, %v2346_v52  ;;  %v2676_v3 = vmul.f32 %v4976_v40, %v2412_v62  ;;  %v4691_v52 = vld [vmem:[%s4895_s13 + $0x368] sm:$0xff] }
  0xf5   : > { %v2997_v18 = vadd.f32 %v5137_v6, %v2733_v35  ;;  %v3063_v38 = vadd.f32 %v5084_v58, %v2799_v28 }
  0xf6   : > { %v2874_v5 = vadd.f32 %v4988_v49, %v2610_v36  ;;  %v5293_v56 = vadd.f32 %v4991_v51, %v2676_v3 }
  0xf7   : > { %v3253_v1 = vmax.f32 %v2997_v18, 0.0  ;;  %v3319_v63 = vmax.f32 %v3063_v38, 0.0 }
  0xf8   : > { %v3130_v8 = vmax.f32 %v2874_v5, 0.0  ;;  %v1992_v30 = vpop.f32.mrf.mxu2  ;;  %v2157_v12 = vpop.f32.mrf.mxu3 }
  0xf9   : > { %v3529_v25 = vadd.f32 %v3528_v7, %v3253_v1  ;;  %v3605_v27 = vadd.f32 %v3604_v23, %v3319_v63  ;;  %v2470_v31 = vadd.f32 %v5143_v10, %v1992_v30  ;;  %v2536_v24 = vadd.f32 %v5189_v32, %v2157_v12  ;;  %v1685_v34 = vpop.f32.mrf.mxu0  ;;  %v1850_v19 = vpop.f32.mrf.mxu1 }
  0xfa   : > { %v3386_v62 = vadd.f32 %v3385_v47, %v3130_v8  ;;  %v2347_v35 = vadd.f32 %v5256_v0, %v1685_v34  ;;  %v2413_v28 = vadd.f32 %v5302_v33, %v1850_v19  ;;  %v5327_v19 = vld [vmem:[%s6467_s2 + $0x78] sm:$0xff] }
  0xfb   : > { %v2734_v7 = vmul.f32 %v5134_v55, %v2470_v31  ;;  %v2800_v10 = vmul.f32 %v5081_v50, %v2536_v24 }
  0xfc   : > { %v2611_v23 = vmul.f32 %v4974_v39, %v2347_v35  ;;  %v2677_v36 = vmul.f32 %v4976_v40, %v2413_v28  ;;  %4433 = vmatmul.msk.bf16.gmra.mxu0 %vm1261_vm0, %v4596_v9  ;;  %4466 = vmatmul.msk.bf16.gmra.mxu1 %vm1261_vm0, %v4629_v22 }
  0xfd   : > { %v2998_v3 = vadd.f32 %v5137_v6, %v2734_v7  ;;  %v3064_v47 = vadd.f32 %v5084_v58, %v2800_v10  ;;  %4495 = vmatmul.msk.bf16.gmra.mxu2 %vm1261_vm0, %v4658_v37  ;;  %4528 = vmatmul.msk.bf16.gmra.mxu3 %vm1261_vm0, %v4691_v52 }
  0xfe   : > { %v2875_v18 = vadd.f32 %v4988_v49, %v2611_v23  ;;  %v5320_v38 = vadd.f32 %v4991_v51, %v2677_v36 }
  0xff   : > { %v3254_v5 = vmax.f32 %v2998_v3, 0.0  ;;  %v3320_v1 = vmax.f32 %v3064_v47, 0.0 }
 0x100   : > { %v3131_v63 = vmax.f32 %v2875_v18, 0.0  ;;  %v1995_v8 = vpop.f32.mrf.mxu2  ;;  %v2160_v30 = vpop.f32.mrf.mxu3 }
 0x101   : > { %v3530_v12 = vadd.f32 %v3529_v25, %v3254_v5  ;;  %v3606_v9 = vadd.f32 %v3605_v27, %v3320_v1  ;;  %v2471_v22 = vadd.f32 %v5164_v42, %v1995_v8  ;;  %v2537_v31 = vadd.f32 %v5210_v21, %v2160_v30  ;;  %v1687_v24 = vpop.f32.mrf.mxu0  ;;  %v1852_v34 = vpop.f32.mrf.mxu1  ;;  %v4597_v1 = vld [vmem:[%s4895_s13 + $0x78] sm:$0xff] }
 0x102   : > { %v3387_v37 = vadd.f32 %v3386_v62, %v3131_v63  ;;  %v2348_v52 = vadd.f32 %v5281_v41, %v1687_v24  ;;  %v2414_v35 = vadd.f32 %v5327_v19, %v1852_v34  ;;  %v4630_v63 = vld [vmem:[%s4895_s13 + $0x180] sm:$0xff] }
 0x103   : > { %v2735_v25 = vmul.f32 %v5134_v55, %v2471_v22  ;;  %v2801_v42 = vmul.f32 %v5081_v50, %v2537_v31 }
 0x104   : > { %v2612_v27 = vmul.f32 %v4974_v39, %v2348_v52  ;;  %v2678_v28 = vmul.f32 %v4976_v40, %v2414_v35  ;;  %v5348_v52 = vld [vmem:[%s6467_s2 + $0x80] sm:$0xff]  ;;  %v4659_v35 = vld [vmem:[%s4895_s13 + $0x268] sm:$0xff] }
 0x105   : > { %v2999_v7 = vadd.f32 %v5137_v6, %v2735_v25  ;;  %v3065_v10 = vadd.f32 %v5084_v58, %v2801_v42  ;;  %v4692_v25 = vld [vmem:[%s4895_s13 + $0x370] sm:$0xff] }
 0x106   : > { %v2876_v62 = vadd.f32 %v4988_v49, %v2612_v27  ;;  %v5339_v23 = vadd.f32 %v4991_v51, %v2678_v28 }
 0x107   : > { %v3255_v36 = vmax.f32 %v2999_v7, 0.0  ;;  %v3321_v3 = vmax.f32 %v3065_v10, 0.0 }
 0x108   : > { %6473 = vst [vmem:[#allocation3_spill] sm:$0xff] %v5339_v23  ;;  %v3132_v47 = vmax.f32 %v2876_v62, 0.0  ;;  %v1997_v18 = vpop.f32.mrf.mxu2  ;;  %v2162_v5 = vpop.f32.mrf.mxu3 }
 0x109   : > { %v3531_v8 = vadd.f32 %v3530_v12, %v3255_v36  ;;  %v3607_v30 = vadd.f32 %v3606_v9, %v3321_v3  ;;  %v2472_v22 = vadd.f32 %v5189_v32, %v1997_v18  ;;  %v2538_v31 = vadd.f32 %v5235_v59, %v2162_v5  ;;  %v1690_v24 = vpop.f32.mrf.mxu0  ;;  %v1855_v34 = vpop.f32.mrf.mxu1 }
 0x10a   : > { %v3388_v42 = vadd.f32 %v3387_v37, %v3132_v47  ;;  %v2349_v27 = vadd.f32 %v5302_v33, %v1690_v24  ;;  %v2415_v28 = vadd.f32 %v5348_v52, %v1855_v34 }
 0x10b   : > { %v2736_v12 = vmul.f32 %v5134_v55, %v2472_v22  ;;  %v2802_v32 = vmul.f32 %v5081_v50, %v2538_v31 }
 0x10c   : > { %v2613_v9 = vmul.f32 %v4974_v39, %v2349_v27  ;;  %v2679_v7 = vmul.f32 %v4976_v40, %v2415_v28  ;;  %4434 = vmatmul.msk.bf16.gmra.mxu0 %vm1261_vm0, %v4597_v1  ;;  %4467 = vmatmul.msk.bf16.gmra.mxu1 %vm1261_vm0, %v4630_v63 }
 0x10d   : > { %v3000_v10 = vadd.f32 %v5137_v6, %v2736_v12  ;;  %v3066_v37 = vadd.f32 %v5084_v58, %v2802_v32  ;;  %4496 = vmatmul.msk.bf16.gmra.mxu2 %vm1261_vm0, %v4659_v35  ;;  %4529 = vmatmul.msk.bf16.gmra.mxu3 %vm1261_vm0, %v4692_v25  ;;  %v5373_v25 = vld [vmem:[%s6467_s2 + $0x88] sm:$0xff] }
 0x10e   : > { %v2877_v62 = vadd.f32 %v4988_v49, %v2613_v9  ;;  %v5366_v36 = vadd.f32 %v4991_v51, %v2679_v7 }
 0x10f   : > { %v3256_v3 = vmax.f32 %v3000_v10, 0.0  ;;  %v3322_v47 = vmax.f32 %v3066_v37, 0.0 }
 0x110   : > { %6474 = vst [vmem:[#allocation4_spill] sm:$0xff] %v5366_v36  ;;  %v3133_v18 = vmax.f32 %v2877_v62, 0.0  ;;  %v2000_v5 = vpop.f32.mrf.mxu2  ;;  %v2165_v1 = vpop.f32.mrf.mxu3  ;;  %v4669_v36 = vld [vmem:[%s4895_s13 + $0x2b8] sm:$0xff] }
 0x111   : > { %v3532_v22 = vadd.f32 %v3531_v8, %v3256_v3  ;;  %v3608_v63 = vadd.f32 %v3607_v30, %v3322_v47  ;;  %v2473_v31 = vadd.f32 %v5210_v21, %v2000_v5  ;;  %v2539_v24 = vadd.f32 %v5256_v0, %v2165_v1  ;;  %v1692_v34 = vpop.f32.mrf.mxu0  ;;  %v1857_v35 = vpop.f32.mrf.mxu1  ;;  %v4721_v8 = vld [vmem:[%s6469_s4 + $0x38] sm:$0xff]  ;;  %v4598_v1 = vld [vmem:[%s4895_s13 + $0x80] sm:$0xff] }
 0x112   : > { %v3389_v27 = vadd.f32 %v3388_v42, %v3133_v18  ;;  %v2350_v28 = vadd.f32 %v5327_v19, %v1692_v34  ;;  %v2416_v12 = vadd.f32 %v5373_v25, %v1857_v35  ;;  %3770 = vmatpush.bf16.msrb.mxu1 %v4721_v8 }
 0x113   : > { %v2737_v21 = vmul.f32 %v5134_v55, %v2473_v31  ;;  %v2803_v30 = vmul.f32 %v5081_v50, %v2539_v24  ;;  %v4631_v31 = vld [vmem:[%s4895_s13 + $0x188] sm:$0xff] }
 0x114   : > { %v2614_v32 = vmul.f32 %v4974_v39, %v2350_v28  ;;  %v2680_v9 = vmul.f32 %v4976_v40, %v2416_v12 }
 0x115   : > { %v3001_v42 = vadd.f32 %v5137_v6, %v2737_v21  ;;  %v3067_v7 = vadd.f32 %v5084_v58, %v2803_v30  ;;  %v5397_v21 = vld [vmem:[%s6467_s2 + $0x90] sm:$0xff] }
 0x116   : > { %v2878_v10 = vadd.f32 %v4988_v49, %v2614_v32  ;;  %v5388_v37 = vadd.f32 %v4991_v51, %v2680_v9  ;;  %v4660_v30 = vld [vmem:[%s4895_s13 + $0x270] sm:$0xff]  ;;  %v4693_v32 = vld [vmem:[%s4895_s13 + $0x378] sm:$0xff] }
 0x117   : > { %v3257_v62 = vmax.f32 %v3001_v42, 0.0  ;;  %v3323_v3 = vmax.f32 %v3067_v7, 0.0 }
 0x118   : > { %6475 = vst [vmem:[#allocation5_spill] sm:$0xff] %v5388_v37  ;;  %v3134_v47 = vmax.f32 %v2878_v10, 0.0  ;;  %v2002_v18 = vpop.f32.mrf.mxu2  ;;  %v2167_v5 = vpop.f32.mrf.mxu3 }
 0x119   : > { %v3533_v24 = vadd.f32 %v3532_v22, %v3257_v62  ;;  %v3609_v34 = vadd.f32 %v3608_v63, %v3323_v3  ;;  %v2474_v35 = vadd.f32 %v5235_v59, %v2002_v18  ;;  %v2540_v28 = vadd.f32 %v5281_v41, %v2167_v5  ;;  %v1695_v12 = vpop.f32.mrf.mxu0  ;;  %v1860_v8 = vpop.f32.mrf.mxu1 }
 0x11a   : > { %v3390_v9 = vadd.f32 %v3389_v27, %v3134_v47  ;;  %v2351_v42 = vadd.f32 %v5348_v52, %v1695_v12  ;;  %v2417_v7 = vadd.f32 %v5397_v21, %v1860_v8 }
 0x11b   : > { %v2738_v22 = vmul.f32 %v5134_v55, %v2474_v35  ;;  %v2804_v59 = vmul.f32 %v5081_v50, %v2540_v28 }
 0x11c   : > { %v2615_v63 = vmul.f32 %v4974_v39, %v2351_v42  ;;  %v2681_v10 = vmul.f32 %v4976_v40, %v2417_v7  ;;  %4435 = vmatmul.msk.bf16.gmra.mxu0 %vm1261_vm0, %v4598_v1  ;;  %4468 = vmatmul.msk.bf16.gmra.mxu1 %vm1261_vm0, %v4631_v31 }
 0x11d   : > { %v3002_v62 = vadd.f32 %v5137_v6, %v2738_v22  ;;  %v3068_v27 = vadd.f32 %v5084_v58, %v2804_v59  ;;  %4497 = vmatmul.msk.bf16.gmra.mxu2 %vm1261_vm0, %v4660_v30  ;;  %4530 = vmatmul.msk.bf16.gmra.mxu3 %vm1261_vm0, %v4693_v32  ;;  %v5422_v32 = vld [vmem:[%s6467_s2 + $0x98] sm:$0xff] }
 0x11e   : > { %v2879_v3 = vadd.f32 %v4988_v49, %v2615_v63  ;;  %v5415_v47 = vadd.f32 %v4991_v51, %v2681_v10 }
 0x11f   : > { %v3258_v18 = vmax.f32 %v3002_v62, 0.0  ;;  %v3324_v5 = vmax.f32 %v3068_v27, 0.0 }
 0x120   : > { %6476 = vst [vmem:[#allocation6_spill] sm:$0xff] %v5415_v47  ;;  %v3135_v35 = vmax.f32 %v2879_v3, 0.0  ;;  %v2005_v28 = vpop.f32.mrf.mxu2  ;;  %v2170_v1 = vpop.f32.mrf.mxu3  ;;  %v4698_v47 = vld [vmem:[%s4895_s13 + $0x3a0] sm:$0xff] }
 0x121   : > { %v3534_v12 = vadd.f32 %v3533_v24, %v3258_v18  ;;  %v3610_v31 = vadd.f32 %v3609_v34, %v3324_v5  ;;  %v2475_v8 = vadd.f32 %v5256_v0, %v2005_v28  ;;  %v2541_v42 = vadd.f32 %v5302_v33, %v2170_v1  ;;  %v1697_v7 = vpop.f32.mrf.mxu0  ;;  %v1862_v30 = vpop.f32.mrf.mxu1 }
 0x122   : > { %v3391_v22 = vadd.f32 %v3390_v9, %v3135_v35  ;;  %v2352_v59 = vadd.f32 %v5373_v25, %v1697_v7  ;;  %v2418_v63 = vadd.f32 %v5422_v32, %v1862_v30 }
 0x123   : > { %v2739_v24 = vmul.f32 %v5134_v55, %v2475_v8  ;;  %v2805_v0 = vmul.f32 %v5081_v50, %v2541_v42  ;;  %v4599_v8 = vld [vmem:[%s4895_s13 + $0x88] sm:$0xff]  ;;  %v4632_v42 = vld [vmem:[%s4895_s13 + $0x190] sm:$0xff] }
 0x124   : > { %v2616_v34 = vmul.f32 %v4974_v39, %v2352_v59  ;;  %v2682_v10 = vmul.f32 %v4976_v40, %v2418_v63 }
 0x125   : > { %v3003_v62 = vadd.f32 %v5137_v6, %v2739_v24  ;;  %v3069_v27 = vadd.f32 %v5084_v58, %v2805_v0 }
 0x126   : > { %v2880_v9 = vadd.f32 %v4988_v49, %v2616_v34  ;;  %v5434_v3 = vadd.f32 %v4991_v51, %v2682_v10  ;;  %v5443_v34 = vld [vmem:[%s6467_s2 + $0xa0] sm:$0xff]  ;;  %v4661_v10 = vld [vmem:[%s4895_s13 + $0x278] sm:$0xff] }
 0x127   : > { %v3259_v18 = vmax.f32 %v3003_v62, 0.0  ;;  %v3325_v5 = vmax.f32 %v3069_v27, 0.0  ;;  %v4694_v62 = vld [vmem:[%s4895_s13 + $0x380] sm:$0xff] }
 0x128   : > { %6477 = vst [vmem:[#allocation7_spill] sm:$0xff] %v5434_v3  ;;  %v3136_v35 = vmax.f32 %v2880_v9, 0.0  ;;  %v2007_v28 = vpop.f32.mrf.mxu2  ;;  %v2172_v1 = vpop.f32.mrf.mxu3 }
 0x129   : > { %v3535_v7 = vadd.f32 %v3534_v12, %v3259_v18  ;;  %v3611_v30 = vadd.f32 %v3610_v31, %v3325_v5  ;;  %v2476_v59 = vadd.f32 %v5281_v41, %v2007_v28  ;;  %v2542_v63 = vadd.f32 %v5327_v19, %v2172_v1  ;;  %v1700_v24 = vpop.f32.mrf.mxu0  ;;  %v1865_v0 = vpop.f32.mrf.mxu1 }
 0x12a   : > { %v3392_v27 = vadd.f32 %v3391_v22, %v3136_v35  ;;  %v2353_v9 = vadd.f32 %v5397_v21, %v1700_v24  ;;  %v2419_v3 = vadd.f32 %v5443_v34, %v1865_v0 }
 0x12b   : > { %v2740_v12 = vmul.f32 %v5134_v55, %v2476_v59  ;;  %v2806_v41 = vmul.f32 %v5081_v50, %v2542_v63 }
 0x12c   : > { %v2617_v31 = vmul.f32 %v4974_v39, %v2353_v9  ;;  %v2683_v18 = vmul.f32 %v4976_v40, %v2419_v3  ;;  %4436 = vmatmul.msk.bf16.gmra.mxu0 %vm1261_vm0, %v4599_v8  ;;  %4469 = vmatmul.msk.bf16.gmra.mxu1 %vm1261_vm0, %v4632_v42 }
 0x12d   : > { %v3004_v5 = vadd.f32 %v5137_v6, %v2740_v12  ;;  %v3070_v22 = vadd.f32 %v5084_v58, %v2806_v41  ;;  %4498 = vmatmul.msk.bf16.gmra.mxu2 %vm1261_vm0, %v4661_v10  ;;  %4531 = vmatmul.msk.bf16.gmra.mxu3 %vm1261_vm0, %v4694_v62  ;;  %v5468_v62 = vld [vmem:[%s6467_s2 + $0xa8] sm:$0xff] }
 0x12e   : > { %v2881_v35 = vadd.f32 %v4988_v49, %v2617_v31  ;;  %v5461_v28 = vadd.f32 %v4991_v51, %v2683_v18 }
 0x12f   : > { %v3260_v1 = vmax.f32 %v3004_v5, 0.0  ;;  %v3326_v59 = vmax.f32 %v3070_v22, 0.0 }
 0x130   : > { %6478 = vst [vmem:[#allocation8_spill] sm:$0xff] %v5461_v28  ;;  %v3137_v3 = vmax.f32 %v2881_v35, 0.0  ;;  %v2010_v63 = vpop.f32.mrf.mxu2  ;;  %v2175_v8 = vpop.f32.mrf.mxu3 }
 0x131   : > { %v3536_v24 = vadd.f32 %v3535_v7, %v3260_v1  ;;  %v3612_v42 = vadd.f32 %v3611_v30, %v3326_v59  ;;  %v2477_v0 = vadd.f32 %v5302_v33, %v2010_v63  ;;  %v2543_v9 = vadd.f32 %v5348_v52, %v2175_v8  ;;  %v1702_v12 = vpop.f32.mrf.mxu0  ;;  %v1867_v10 = vpop.f32.mrf.mxu1 }
 0x132   : > { %v3393_v41 = vadd.f32 %v3392_v27, %v3137_v3  ;;  %v2354_v31 = vadd.f32 %v5422_v32, %v1702_v12  ;;  %v2420_v18 = vadd.f32 %v5468_v62, %v1867_v10  ;;  %v4633_v12 = vld [vmem:[%s4895_s13 + $0x198] sm:$0xff] }
 0x133   : > { %v2741_v7 = vmul.f32 %v5134_v55, %v2477_v0  ;;  %v2807_v33 = vmul.f32 %v5081_v50, %v2543_v9  ;;  %v4600_v9 = vld [vmem:[%s4895_s13 + $0x90] sm:$0xff] }
 0x134   : > { %v2618_v30 = vmul.f32 %v4974_v39, %v2354_v31  ;;  %v2684_v5 = vmul.f32 %v4976_v40, %v2420_v18 }
 0x135   : > { %v3005_v22 = vadd.f32 %v5137_v6, %v2741_v7  ;;  %v3071_v35 = vadd.f32 %v5084_v58, %v2807_v33 }
 0x136   : > { %v2882_v27 = vadd.f32 %v4988_v49, %v2618_v30  ;;  %v5480_v1 = vadd.f32 %v4991_v51, %v2684_v5  ;;  %v5489_v5 = vld [vmem:[%s6467_s2 + $0xb0] sm:$0xff] }
 0x137   : > { %v3261_v59 = vmax.f32 %v3005_v22, 0.0  ;;  %v3327_v3 = vmax.f32 %v3071_v35, 0.0  ;;  %v4662_v22 = vld [vmem:[%s4895_s13 + $0x280] sm:$0xff]  ;;  %v4695_v35 = vld [vmem:[%s4895_s13 + $0x388] sm:$0xff] }
 0x138   : > { %6479 = vst [vmem:[#allocation9_spill] sm:$0xff] %v5480_v1  ;;  %v3138_v63 = vmax.f32 %v2882_v27, 0.0  ;;  %v2012_v8 = vpop.f32.mrf.mxu2  ;;  %v2177_v0 = vpop.f32.mrf.mxu3 }
 0x139   : > { %v3537_v10 = vadd.f32 %v3536_v24, %v3261_v59  ;;  %v3613_v31 = vadd.f32 %v3612_v42, %v3327_v3  ;;  %v2478_v18 = vadd.f32 %v5327_v19, %v2012_v8  ;;  %v2544_v7 = vadd.f32 %v5373_v25, %v2177_v0  ;;  %v1705_v33 = vpop.f32.mrf.mxu0  ;;  %v1870_v30 = vpop.f32.mrf.mxu1 }
 0x13a   : > { %v3394_v27 = vadd.f32 %v3393_v41, %v3138_v63  ;;  %v2355_v1 = vadd.f32 %v5443_v34, %v1705_v33  ;;  %v2421_v28 = vadd.f32 %v5489_v5, %v1870_v30 }
 0x13b   : > { %v2742_v24 = vmul.f32 %v5134_v55, %v2478_v18  ;;  %v2808_v19 = vmul.f32 %v5081_v50, %v2544_v7 }
 0x13c   : > { %v2619_v42 = vmul.f32 %v4974_v39, %v2355_v1  ;;  %v2685_v59 = vmul.f32 %v4976_v40, %v2421_v28  ;;  %4437 = vmatmul.msk.bf16.gmra.mxu0 %vm1261_vm0, %v4600_v9  ;;  %4470 = vmatmul.msk.bf16.gmra.mxu1 %vm1261_vm0, %v4633_v12 }
 0x13d   : > { %v3006_v3 = vadd.f32 %v5137_v6, %v2742_v24  ;;  %v3072_v41 = vadd.f32 %v5084_v58, %v2808_v19  ;;  %4499 = vmatmul.msk.bf16.gmra.mxu2 %vm1261_vm0, %v4662_v22  ;;  %4532 = vmatmul.msk.bf16.gmra.mxu3 %vm1261_vm0, %v4695_v35  ;;  %v5514_v35 = vld [vmem:[%s6467_s2 + $0xb8] sm:$0xff] }
 0x13e   : > { %v2883_v63 = vadd.f32 %v4988_v49, %v2619_v42  ;;  %v5507_v8 = vadd.f32 %v4991_v51, %v2685_v59 }
 0x13f   : > { %v3262_v1 = vmax.f32 %v3006_v3, 0.0  ;;  %v3328_v0 = vmax.f32 %v3072_v41, 0.0 }
 0x140   : > { %6480 = vst [vmem:[#allocation10_spill] sm:$0xff] %v5507_v8  ;;  %v3139_v28 = vmax.f32 %v2883_v63, 0.0  ;;  %v2015_v18 = vpop.f32.mrf.mxu2  ;;  %v2180_v9 = vpop.f32.mrf.mxu3 }
 0x141   : > { %v3538_v7 = vadd.f32 %v3537_v10, %v3262_v1  ;;  %v3614_v12 = vadd.f32 %v3613_v31, %v3328_v0  ;;  %v2479_v33 = vadd.f32 %v5348_v52, %v2015_v18  ;;  %v2545_v30 = vadd.f32 %v5397_v21, %v2180_v9  ;;  %v1707_v24 = vpop.f32.mrf.mxu0  ;;  %v1872_v22 = vpop.f32.mrf.mxu1 }
 0x142   : > { %v3395_v19 = vadd.f32 %v3394_v27, %v3139_v28  ;;  %v2356_v42 = vadd.f32 %v5468_v62, %v1707_v24  ;;  %v2422_v59 = vadd.f32 %v5514_v35, %v1872_v22  ;;  %v4634_v24 = vld [vmem:[%s4895_s13 + $0x1a0] sm:$0xff] }
 0x143   : > { %v2743_v10 = vmul.f32 %v5134_v55, %v2479_v33  ;;  %v2809_v52 = vmul.f32 %v5081_v50, %v2545_v30  ;;  %v4601_v30 = vld [vmem:[%s4895_s13 + $0x98] sm:$0xff] }
 0x144   : > { %v2620_v31 = vmul.f32 %v4974_v39, %v2356_v42  ;;  %v2686_v3 = vmul.f32 %v4976_v40, %v2422_v59 }
 0x145   : > { %v3007_v41 = vadd.f32 %v5137_v6, %v2743_v10  ;;  %v3073_v63 = vadd.f32 %v5084_v58, %v2809_v52 }
 0x146   : > { %v2884_v27 = vadd.f32 %v4988_v49, %v2620_v31  ;;  %v5526_v1 = vadd.f32 %v4991_v51, %v2686_v3  ;;  %v5535_v3 = vld [vmem:[%s6467_s2 + $0xc0] sm:$0xff] }
 0x147   : > { %v3263_v0 = vmax.f32 %v3007_v41, 0.0  ;;  %v3329_v28 = vmax.f32 %v3073_v63, 0.0  ;;  %v4663_v41 = vld [vmem:[%s4895_s13 + $0x288] sm:$0xff]  ;;  %v4696_v63 = vld [vmem:[%s4895_s13 + $0x390] sm:$0xff] }
 0x148   : > { %6481 = vst [vmem:[#allocation11_spill] sm:$0xff] %v5526_v1  ;;  %v3140_v18 = vmax.f32 %v2884_v27, 0.0  ;;  %v2017_v9 = vpop.f32.mrf.mxu2  ;;  %v2182_v33 = vpop.f32.mrf.mxu3 }
 0x149   : > { %v3539_v22 = vadd.f32 %v3538_v7, %v3263_v0  ;;  %v3615_v42 = vadd.f32 %v3614_v12, %v3329_v28  ;;  %v2480_v59 = vadd.f32 %v5373_v25, %v2017_v9  ;;  %v2546_v10 = vadd.f32 %v5422_v32, %v2182_v33  ;;  %v1710_v52 = vpop.f32.mrf.mxu0  ;;  %v1875_v31 = vpop.f32.mrf.mxu1  ;;  %v4720_v25 = vld [vmem:[%s6469_s4 + $0x30] sm:$0xff] }
 0x14a   : > { %v3396_v27 = vadd.f32 %v3395_v19, %v3140_v18  ;;  %v2357_v1 = vadd.f32 %v5489_v5, %v1710_v52  ;;  %v2423_v8 = vadd.f32 %v5535_v3, %v1875_v31  ;;  %3771 = vmatpush.bf16.msrb.mxu1 %v4720_v25 }
 0x14b   : > { %v2744_v7 = vmul.f32 %v5134_v55, %v2480_v59  ;;  %v2810_v12 = vmul.f32 %v5081_v50, %v2546_v10 }
 0x14c   : > { %v2621_v0 = vmul.f32 %v4974_v39, %v2357_v1  ;;  %v2687_v28 = vmul.f32 %v4976_v40, %v2423_v8  ;;  %4438 = vmatmul.msk.bf16.gmra.mxu0 %vm1261_vm0, %v4601_v30  ;;  %4471 = vmatmul.msk.bf16.gmra.mxu1 %vm1261_vm0, %v4634_v24 }
 0x14d   : > { %v3008_v19 = vadd.f32 %v5137_v6, %v2744_v7  ;;  %v3074_v18 = vadd.f32 %v5084_v58, %v2810_v12  ;;  %4500 = vmatmul.msk.bf16.gmra.mxu2 %vm1261_vm0, %v4663_v41  ;;  %4533 = vmatmul.msk.bf16.gmra.mxu3 %vm1261_vm0, %v4696_v63  ;;  %v5563_v63 = vld [vmem:[%s6467_s2 + $0xc8] sm:$0xff] }
 0x14e   : > { %v2885_v9 = vadd.f32 %v4988_v49, %v2621_v0  ;;  %v5556_v33 = vadd.f32 %v4991_v51, %v2687_v28 }
 0x14f   : > { %v3264_v1 = vmax.f32 %v3008_v19, 0.0  ;;  %v3330_v8 = vmax.f32 %v3074_v18, 0.0 }
 0x150   : > { %6482 = vst [vmem:[#allocation12_spill] sm:$0xff] %v5556_v33  ;;  %v3141_v59 = vmax.f32 %v2885_v9, 0.0  ;;  %v2020_v30 = vpop.f32.mrf.mxu2  ;;  %v2185_v10 = vpop.f32.mrf.mxu3 }
 0x151   : > { %v3540_v24 = vadd.f32 %v3539_v22, %v3264_v1  ;;  %v3616_v52 = vadd.f32 %v3615_v42, %v3330_v8  ;;  %v2481_v31 = vadd.f32 %v5397_v21, %v2020_v30  ;;  %v2547_v7 = vadd.f32 %v5443_v34, %v2185_v10  ;;  %v1712_v41 = vpop.f32.mrf.mxu0  ;;  %v1877_v12 = vpop.f32.mrf.mxu1 }
 0x152   : > { %v3397_v0 = vadd.f32 %v3396_v27, %v3141_v59  ;;  %v2358_v25 = vadd.f32 %v5514_v35, %v1712_v41  ;;  %v2424_v28 = vadd.f32 %v5563_v63, %v1877_v12  ;;  %v4635_v41 = vld [vmem:[%s4895_s13 + $0x1a8] sm:$0xff] }
 0x153   : > { %v2745_v22 = vmul.f32 %v5134_v55, %v2481_v31  ;;  %v2811_v21 = vmul.f32 %v5081_v50, %v2547_v7  ;;  %v4602_v7 = vld [vmem:[%s4895_s13 + $0xa0] sm:$0xff] }
 0x154   : > { %v2622_v42 = vmul.f32 %v4974_v39, %v2358_v25  ;;  %v2688_v19 = vmul.f32 %v4976_v40, %v2424_v28 }
 0x155   : > { %v3009_v18 = vadd.f32 %v5137_v6, %v2745_v22  ;;  %v3075_v9 = vadd.f32 %v5084_v58, %v2811_v21 }
 0x156   : > { %v2886_v27 = vadd.f32 %v4988_v49, %v2622_v42  ;;  %v5575_v1 = vadd.f32 %v4991_v51, %v2688_v19  ;;  %v5584_v19 = vld [vmem:[%s6467_s2 + $0xd0] sm:$0xff] }
 0x157   : > { %v3265_v8 = vmax.f32 %v3009_v18, 0.0  ;;  %v3331_v59 = vmax.f32 %v3075_v9, 0.0  ;;  %v4664_v18 = vld [vmem:[%s4895_s13 + $0x290] sm:$0xff]  ;;  %v4697_v9 = vld [vmem:[%s4895_s13 + $0x398] sm:$0xff] }
 0x158   : > { %6483 = vst [vmem:[#allocation13_spill] sm:$0xff] %v5575_v1  ;;  %v3142_v30 = vmax.f32 %v2886_v27, 0.0  ;;  %v2022_v10 = vpop.f32.mrf.mxu2  ;;  %v2187_v31 = vpop.f32.mrf.mxu3 }
 0x159   : > { %v3541_v12 = vadd.f32 %v3540_v24, %v3265_v8  ;;  %v3617_v25 = vadd.f32 %v3616_v52, %v3331_v59  ;;  %v2482_v28 = vadd.f32 %v5422_v32, %v2022_v10  ;;  %v2548_v22 = vadd.f32 %v5468_v62, %v2187_v31  ;;  %v1715_v21 = vpop.f32.mrf.mxu0  ;;  %v1880_v42 = vpop.f32.mrf.mxu1 }
 0x15a   : > { %v3398_v27 = vadd.f32 %v3397_v0, %v3142_v30  ;;  %v2359_v1 = vadd.f32 %v5535_v3, %v1715_v21  ;;  %v2425_v33 = vadd.f32 %v5584_v19, %v1880_v42 }
 0x15b   : > { %v2746_v24 = vmul.f32 %v5134_v55, %v2482_v28  ;;  %v2812_v32 = vmul.f32 %v5081_v50, %v2548_v22 }
 0x15c   : > { %v2623_v52 = vmul.f32 %v4974_v39, %v2359_v1  ;;  %v2689_v8 = vmul.f32 %v4976_v40, %v2425_v33  ;;  %4439 = vmatmul.msk.bf16.gmra.mxu0 %vm1261_vm0, %v4602_v7  ;;  %4472 = vmatmul.msk.bf16.gmra.mxu1 %vm1261_vm0, %v4635_v41 }
 0x15d   : > { %v3010_v59 = vadd.f32 %v5137_v6, %v2746_v24  ;;  %v3076_v0 = vadd.f32 %v5084_v58, %v2812_v32  ;;  %4501 = vmatmul.msk.bf16.gmra.mxu2 %vm1261_vm0, %v4664_v18  ;;  %4534 = vmatmul.msk.bf16.gmra.mxu3 %vm1261_vm0, %v4697_v9  ;;  %v5609_v9 = vld [vmem:[%s6467_s2 + $0xd8] sm:$0xff] }
 0x15e   : > { %v2887_v30 = vadd.f32 %v4988_v49, %v2623_v52  ;;  %v5602_v10 = vadd.f32 %v4991_v51, %v2689_v8 }
 0x15f   : > { %v3266_v1 = vmax.f32 %v3010_v59, 0.0  ;;  %v3332_v31 = vmax.f32 %v3076_v0, 0.0 }
 0x160   : > { %6484 = vst [vmem:[#allocation14_spill] sm:$0xff] %v5602_v10  ;;  %v3143_v33 = vmax.f32 %v2887_v30, 0.0  ;;  %v2025_v28 = vpop.f32.mrf.mxu2  ;;  %v2190_v7 = vpop.f32.mrf.mxu3 }
 0x161   : > { %v3542_v22 = vadd.f32 %v3541_v12, %v3266_v1  ;;  %v3618_v41 = vadd.f32 %v3617_v25, %v3332_v31  ;;  %v2483_v21 = vadd.f32 %v5443_v34, %v2025_v28  ;;  %v2549_v42 = vadd.f32 %v5489_v5, %v2190_v7  ;;  %v1717_v24 = vpop.f32.mrf.mxu0  ;;  %v1882_v18 = vpop.f32.mrf.mxu1 }
 0x162   : > { %v3399_v32 = vadd.f32 %v3398_v27, %v3143_v33  ;;  %v2360_v52 = vadd.f32 %v5563_v63, %v1717_v24  ;;  %v2426_v8 = vadd.f32 %v5609_v9, %v1882_v18  ;;  %v4636_v24 = vld [vmem:[%s4895_s13 + $0x1b0] sm:$0xff] }
 0x163   : > { %v2747_v12 = vmul.f32 %v5134_v55, %v2483_v21  ;;  %v2813_v34 = vmul.f32 %v5081_v50, %v2549_v42  ;;  %v4603_v42 = vld [vmem:[%s4895_s13 + $0xa8] sm:$0xff] }
 0x164   : > { %v2624_v25 = vmul.f32 %v4974_v39, %v2360_v52  ;;  %v2690_v59 = vmul.f32 %v4976_v40, %v2426_v8 }
 0x165   : > { %v3011_v0 = vadd.f32 %v5137_v6, %v2747_v12  ;;  %v3077_v30 = vadd.f32 %v5084_v58, %v2813_v34 }
 0x166   : > { %v2888_v27 = vadd.f32 %v4988_v49, %v2624_v25  ;;  %v5621_v1 = vadd.f32 %v4991_v51, %v2690_v59  ;;  %v4665_v25 = vld [vmem:[%s4895_s13 + $0x298] sm:$0xff] }
 0x167   : > { %v3267_v31 = vmax.f32 %v3011_v0, 0.0  ;;  %v3333_v33 = vmax.f32 %v3077_v30, 0.0  ;;  %v5633_v0 = vld [vmem:[%s6467_s2 + $0xe0] sm:$0xff] }
 0x168   : > { %6485 = vst [vmem:[#allocation15_spill] sm:$0xff] %v5621_v1  ;;  %v3144_v28 = vmax.f32 %v2888_v27, 0.0  ;;  %v2027_v7 = vpop.f32.mrf.mxu2  ;;  %v2192_v21 = vpop.f32.mrf.mxu3 }
 0x169   : > { %v3543_v18 = vadd.f32 %v3542_v22, %v3267_v31  ;;  %v3619_v52 = vadd.f32 %v3618_v41, %v3333_v33  ;;  %v2484_v8 = vadd.f32 %v5468_v62, %v2027_v7  ;;  %v2550_v12 = vadd.f32 %v5514_v35, %v2192_v21  ;;  %v1720_v34 = vpop.f32.mrf.mxu0  ;;  %v1885_v10 = vpop.f32.mrf.mxu1 }
 0x16a   : > { %v3400_v37 = vadd.f32 %v3399_v32, %v3144_v28  ;;  %v2361_v59 = vadd.f32 %v5584_v19, %v1720_v34  ;;  %v2427_v30 = vadd.f32 %v5633_v0, %v1885_v10 }
 0x16b   : > { %v2748_v22 = vmul.f32 %v5134_v55, %v2484_v8  ;;  %v2814_v62 = vmul.f32 %v5081_v50, %v2550_v12 }
 0x16c   : > { %v2625_v41 = vmul.f32 %v4974_v39, %v2361_v59  ;;  %v2691_v27 = vmul.f32 %v4976_v40, %v2427_v30  ;;  %4440 = vmatmul.msk.bf16.gmra.mxu0 %vm1261_vm0, %v4603_v42  ;;  %4473 = vmatmul.msk.bf16.gmra.mxu1 %vm1261_vm0, %v4636_v24 }
 0x16d   : > { %v3012_v32 = vadd.f32 %v5137_v6, %v2748_v22  ;;  %v3078_v31 = vadd.f32 %v5084_v58, %v2814_v62  ;;  %4502 = vmatmul.msk.bf16.gmra.mxu2 %vm1261_vm0, %v4665_v25  ;;  %4535 = vmatmul.msk.bf16.gmra.mxu3 %vm1261_vm0, %v4698_v47  ;;  %v5656_v62 = vld [vmem:[%s6467_s2 + $0xe8] sm:$0xff] }
 0x16e   : > { %v2889_v10 = vadd.f32 %v4988_v49, %v2625_v41  ;;  %v5648_v33 = vadd.f32 %v4991_v51, %v2691_v27 }
 0x16f   : > { %v3268_v28 = vmax.f32 %v3012_v32, 0.0  ;;  %v3334_v7 = vmax.f32 %v3078_v31, 0.0 }
 0x170   : > { %6486 = vst [vmem:[#allocation16_spill] sm:$0xff] %v5648_v33  ;;  %v3145_v21 = vmax.f32 %v2889_v10, 0.0  ;;  %v2030_v8 = vpop.f32.mrf.mxu2  ;;  %v2195_v42 = vpop.f32.mrf.mxu3  ;;  %v4699_v33 = vld [vmem:[%s4895_s13 + $0x3a8] sm:$0xff] }
 0x171   : > { %v3544_v12 = vadd.f32 %v3543_v18, %v3268_v28  ;;  %v3620_v24 = vadd.f32 %v3619_v52, %v3334_v7  ;;  %v2485_v34 = vadd.f32 %v5489_v5, %v2030_v8  ;;  %v2551_v59 = vadd.f32 %v5535_v3, %v2195_v42  ;;  %v1722_v30 = vpop.f32.mrf.mxu0  ;;  %v1887_v25 = vpop.f32.mrf.mxu1 }
 0x172   : > { %v3401_v22 = vadd.f32 %v3400_v37, %v3145_v21  ;;  %v2362_v47 = vadd.f32 %v5609_v9, %v1722_v30  ;;  %v2428_v41 = vadd.f32 %v5656_v62, %v1887_v25 }
 0x173   : > { %v2749_v18 = vmul.f32 %v5134_v55, %v2485_v34  ;;  %v2815_v5 = vmul.f32 %v5081_v50, %v2551_v59  ;;  %v4604_v34 = vld [vmem:[%s4895_s13 + $0xb0] sm:$0xff]  ;;  %v4637_v59 = vld [vmem:[%s4895_s13 + $0x1b8] sm:$0xff] }
 0x174   : > { %v2626_v52 = vmul.f32 %v4974_v39, %v2362_v47  ;;  %v2692_v27 = vmul.f32 %v4976_v40, %v2428_v41 }
 0x175   : > { %v3013_v37 = vadd.f32 %v5137_v6, %v2749_v18  ;;  %v3079_v32 = vadd.f32 %v5084_v58, %v2815_v5 }
 0x176   : > { %v2890_v31 = vadd.f32 %v4988_v49, %v2626_v52  ;;  %v5667_v10 = vadd.f32 %v4991_v51, %v2692_v27  ;;  %v4666_v52 = vld [vmem:[%s4895_s13 + $0x2a0] sm:$0xff] }
 0x177   : > { %v3269_v28 = vmax.f32 %v3013_v37, 0.0  ;;  %v3335_v7 = vmax.f32 %v3079_v32, 0.0  ;;  %v5679_v37 = vld [vmem:[%s6467_s2 + $0xf0] sm:$0xff] }
 0x178   : > { %6487 = vst [vmem:[#allocation17_spill] sm:$0xff] %v5667_v10  ;;  %v3146_v21 = vmax.f32 %v2890_v31, 0.0  ;;  %v2032_v8 = vpop.f32.mrf.mxu2  ;;  %v2197_v42 = vpop.f32.mrf.mxu3 }
 0x179   : > { %v3545_v30 = vadd.f32 %v3544_v12, %v3269_v28  ;;  %v3621_v25 = vadd.f32 %v3620_v24, %v3335_v7  ;;  %v2486_v47 = vadd.f32 %v5514_v35, %v2032_v8  ;;  %v2552_v41 = vadd.f32 %v5563_v63, %v2197_v42  ;;  %v1725_v18 = vpop.f32.mrf.mxu0  ;;  %v1890_v5 = vpop.f32.mrf.mxu1 }
 0x17a   : > { %v3402_v1 = vadd.f32 %v3401_v22, %v3146_v21  ;;  %v2363_v27 = vadd.f32 %v5633_v0, %v1725_v18  ;;  %v2429_v32 = vadd.f32 %v5679_v37, %v1890_v5 }
 0x17b   : > { %v2750_v12 = vmul.f32 %v5134_v55, %v2486_v47  ;;  %v2816_v35 = vmul.f32 %v5081_v50, %v2552_v41 }
 0x17c   : > { %v2627_v24 = vmul.f32 %v4974_v39, %v2363_v27  ;;  %v2693_v31 = vmul.f32 %v4976_v40, %v2429_v32  ;;  %4441 = vmatmul.msk.bf16.gmra.mxu0 %vm1261_vm0, %v4604_v34  ;;  %4474 = vmatmul.msk.bf16.gmra.mxu1 %vm1261_vm0, %v4637_v59 }
 0x17d   : > { %v3014_v22 = vadd.f32 %v5137_v6, %v2750_v12  ;;  %v3080_v28 = vadd.f32 %v5084_v58, %v2816_v35  ;;  %4503 = vmatmul.msk.bf16.gmra.mxu2 %vm1261_vm0, %v4666_v52  ;;  %4536 = vmatmul.msk.bf16.gmra.mxu3 %vm1261_vm0, %v4699_v33  ;;  %v5702_v35 = vld [vmem:[%s6467_s2 + $0xf8] sm:$0xff] }
 0x17e   : > { %v2891_v7 = vadd.f32 %v4988_v49, %v2627_v24  ;;  %v5694_v21 = vadd.f32 %v4991_v51, %v2693_v31 }
 0x17f   : > { %v3270_v8 = vmax.f32 %v3014_v22, 0.0  ;;  %v3336_v42 = vmax.f32 %v3080_v28, 0.0 }
 0x180   : > { %6488 = vst [vmem:[#allocation18_spill] sm:$0xff] %v5694_v21  ;;  %v3147_v47 = vmax.f32 %v2891_v7, 0.0  ;;  %v2035_v41 = vpop.f32.mrf.mxu2  ;;  %v2200_v34 = vpop.f32.mrf.mxu3  ;;  %v4700_v21 = vld [vmem:[%s4895_s13 + $0x3b0] sm:$0xff] }
 0x181   : > { %v3546_v18 = vadd.f32 %v3545_v30, %v3270_v8  ;;  %v3622_v59 = vadd.f32 %v3621_v25, %v3336_v42  ;;  %v2487_v5 = vadd.f32 %v5535_v3, %v2035_v41  ;;  %v2553_v27 = vadd.f32 %v5584_v19, %v2200_v34  ;;  %v1727_v32 = vpop.f32.mrf.mxu0  ;;  %v1892_v52 = vpop.f32.mrf.mxu1 }
 0x182   : > { %v3403_v12 = vadd.f32 %v3402_v1, %v3147_v47  ;;  %v2364_v33 = vadd.f32 %v5656_v62, %v1727_v32  ;;  %v2430_v24 = vadd.f32 %v5702_v35, %v1892_v52 }
 0x183   : > { %v2751_v30 = vmul.f32 %v5134_v55, %v2487_v5  ;;  %v2817_v3 = vmul.f32 %v5081_v50, %v2553_v27  ;;  %v4605_v5 = vld [vmem:[%s4895_s13 + $0xb8] sm:$0xff]  ;;  %v4638_v27 = vld [vmem:[%s4895_s13 + $0x1c0] sm:$0xff] }
 0x184   : > { %v2628_v25 = vmul.f32 %v4974_v39, %v2364_v33  ;;  %v2694_v31 = vmul.f32 %v4976_v40, %v2430_v24 }
 0x185   : > { %v3015_v1 = vadd.f32 %v5137_v6, %v2751_v30  ;;  %v3081_v22 = vadd.f32 %v5084_v58, %v2817_v3 }
 0x186   : > { %v2892_v28 = vadd.f32 %v4988_v49, %v2628_v25  ;;  %v5713_v7 = vadd.f32 %v4991_v51, %v2694_v31  ;;  %v4667_v25 = vld [vmem:[%s4895_s13 + $0x2a8] sm:$0xff] }
 0x187   : > { %v3271_v8 = vmax.f32 %v3015_v1, 0.0  ;;  %v3337_v42 = vmax.f32 %v3081_v22, 0.0  ;;  %v4719_v31 = vld [vmem:[%s6469_s4 + $0x28] sm:$0xff] }
 0x188   : > { %6489 = vst [vmem:[#allocation19_spill] sm:$0xff] %v5713_v7  ;;  %v3148_v47 = vmax.f32 %v2892_v28, 0.0  ;;  %v2037_v41 = vpop.f32.mrf.mxu2  ;;  %v2202_v34 = vpop.f32.mrf.mxu3  ;;  %3772 = vmatpush.bf16.msrb.mxu1 %v4719_v31  ;;  %v4701_v7 = vld [vmem:[%s4895_s13 + $0x3b8] sm:$0xff] }
 0x189   : > { %v3547_v32 = vadd.f32 %v3546_v18, %v3271_v8  ;;  %v3623_v52 = vadd.f32 %v3622_v59, %v3337_v42  ;;  %v2488_v33 = vadd.f32 %v5563_v63, %v2037_v41  ;;  %v2554_v24 = vadd.f32 %v5609_v9, %v2202_v34  ;;  %v1730_v30 = vpop.f32.mrf.mxu0  ;;  %v1895_v3 = vpop.f32.mrf.mxu1  ;;  %v5728_v18 = vld [vmem:[%s6467_s2] sm:$0xff] }
 0x18a   : > { %v3404_v1 = vadd.f32 %v3403_v12, %v3148_v47  ;;  %v2365_v22 = vadd.f32 %v5679_v37, %v1730_v30  ;;  %v2431_v63 = vadd.f32 %v5728_v18, %v1895_v3 }
 0x18b   : > { %v2752_v59 = vmul.f32 %v5134_v55, %v2488_v33  ;;  %v2818_v28 = vmul.f32 %v5081_v50, %v2554_v24 }
 0x18c   : > { %v2629_v8 = vmul.f32 %v4974_v39, %v2365_v22  ;;  %v2695_v42 = vmul.f32 %v5011_v60, %v2431_v63  ;;  %4442 = vmatmul.msk.bf16.gmra.mxu0 %vm1261_vm0, %v4605_v5  ;;  %4475 = vmatmul.msk.bf16.gmra.mxu1 %vm1261_vm0, %v4638_v27 }
 0x18d   : > { %v3016_v12 = vadd.f32 %v5137_v6, %v2752_v59  ;;  %v3082_v47 = vadd.f32 %v5084_v58, %v2818_v28  ;;  %4504 = vmatmul.msk.bf16.gmra.mxu2 %vm1261_vm0, %v4667_v25  ;;  %4537 = vmatmul.msk.bf16.gmra.mxu3 %vm1261_vm0, %v4700_v21 }
 0x18e   : > { %v2893_v41 = vadd.f32 %v4988_v49, %v2629_v8  ;;  %v2959_v34 = vadd.f32 %v5020_v2, %v2695_v42  ;;  %v5749_v8 = vld [vmem:[%s6467_s2 + $0x8] sm:$0xff] }
 0x18f   : > { %v3272_v33 = vmax.f32 %v3016_v12, 0.0  ;;  %v3338_v24 = vmax.f32 %v3082_v47, 0.0 }
 0x190   : > { %v3149_v30 = vmax.f32 %v2893_v41, 0.0  ;;  %v2040_v3 = vpop.f32.mrf.mxu2  ;;  %v2205_v31 = vpop.f32.mrf.mxu3  ;;  %v2296_v41 = vld [vmem:[%s4965_s17 + $0x2] sm:$0x3] }
 0x191   : > { %v3548_v5 = vadd.f32 %v3547_v32, %v3272_v33  ;;  %v3624_v27 = vadd.f32 %v3623_v52, %v3338_v24  ;;  %v2489_v22 = vadd.f32 %v5584_v19, %v2040_v3  ;;  %v2555_v63 = vadd.f32 %v5633_v0, %v2205_v31  ;;  %v1732_v59 = vpop.f32.mrf.mxu0  ;;  %v1897_v25 = vpop.f32.mrf.mxu1 }
 0x192   : > { %v3405_v28 = vadd.f32 %v3404_v1, %v3149_v30  ;;  %v2366_v21 = vadd.f32 %v5702_v35, %v1732_v59  ;;  %v2432_v42 = vadd.f32 %v5749_v8, %v1897_v25  ;;  %v3215_v33 = vmax.f32 %v2959_v34, 0.0 }
 0x193   : > { %v2753_v32 = vmul.f32 %v5134_v55, %v2489_v22  ;;  %v2819_v52 = vmul.f32 %v5081_v50, %v2555_v63  ;;  %v5761_v25 = vperm.slane %v2296_v41, 0 }
 0x194   : > { %v2630_v19 = vmul.f32 %v4974_v39, %v2366_v21  ;;  %v2696_v12 = vmul.f32 %v5011_v60, %v2432_v42  ;;  %v5763_v21 = vperm.slane %v2296_v41, 1  ;;  %v4606_v42 = vld [vmem:[%s4895_s13 + $0xc0] sm:$0xff]  ;;  %v5777_v41 = vld [vmem:[%s6467_s2 + $0x10] sm:$0xff] }
 0x195   : > { %v3017_v1 = vadd.f32 %v5137_v6, %v2753_v32  ;;  %v3083_v47 = vadd.f32 %v5084_v58, %v2819_v52  ;;  %v4639_v32 = vld [vmem:[%s4895_s13 + $0x1c8] sm:$0xff] }
 0x196   : > { %v2894_v24 = vadd.f32 %v4988_v49, %v2630_v19  ;;  %v2960_v30 = vadd.f32 %v5020_v2, %v2696_v12 }
 0x197   : > { %v3273_v3 = vmax.f32 %v3017_v1, 0.0  ;;  %v3339_v31 = vmax.f32 %v3083_v47, 0.0  ;;  %v4668_v47 = vld [vmem:[%s4895_s13 + $0x2b0] sm:$0xff] }
 0x198   : > { %v3150_v22 = vmax.f32 %v2894_v24, 0.0  ;;  %v3216_v39 = vmax.f32 %v2960_v30, 0.0  ;;  %v2042_v63 = vpop.f32.mrf.mxu2  ;;  %v2207_v59 = vpop.f32.mrf.mxu3 }
 0x199   : > { %v3549_v52 = vadd.f32 %v3548_v5, %v3273_v3  ;;  %v3625_v34 = vadd.f32 %v3624_v27, %v3339_v31  ;;  %v2490_v49 = vadd.f32 %v5609_v9, %v2042_v63  ;;  %v2556_v19 = vadd.f32 %v5656_v62, %v2207_v59  ;;  %v1735_v12 = vpop.f32.mrf.mxu0  ;;  %v1900_v1 = vpop.f32.mrf.mxu1 }
 0x19a   : > { %v5771_v24 = vadd.f32 %v3405_v28, %v3150_v22  ;;  %v3487_v30 = vadd.f32 %v3216_v39, %v3215_v33  ;;  %v2367_v10 = vadd.f32 %v5728_v18, %v1735_v12  ;;  %v2433_v5 = vadd.f32 %v5777_v41, %v1900_v1 }
 0x19b   : > { %v2754_v9 = vmul.f32 %v5134_v55, %v2490_v49  ;;  %v2820_v27 = vmul.f32 %v5081_v50, %v2556_v19 }
 0x19c   : > { %v2631_v3 = vmul.f32 %v5761_v25, %v2367_v10  ;;  %v2697_v31 = vmul.f32 %v5011_v60, %v2433_v5  ;;  %4443 = vmatmul.msk.bf16.gmra.mxu0 %vm1261_vm0, %v4606_v42  ;;  %4476 = vmatmul.msk.bf16.gmra.mxu1 %vm1261_vm0, %v4639_v32 }
 0x19d   : > { %v3018_v28 = vadd.f32 %v5137_v6, %v2754_v9  ;;  %v3084_v33 = vadd.f32 %v5084_v58, %v2820_v27  ;;  %4505 = vmatmul.msk.bf16.gmra.mxu2 %vm1261_vm0, %v4668_v47  ;;  %4538 = vmatmul.msk.bf16.gmra.mxu3 %vm1261_vm0, %v4701_v7  ;;  %v5798_v27 = vld [vmem:[%s6467_s2 + $0x18] sm:$0xff] }
 0x19e   : > { %v2895_v22 = vadd.f32 %v5763_v21, %v2631_v3  ;;  %v2961_v39 = vadd.f32 %v5020_v2, %v2697_v31 }
 0x19f   : > { %v3274_v63 = vmax.f32 %v3018_v28, 0.0  ;;  %v3340_v10 = vmax.f32 %v3084_v33, 0.0 }
 0x1a0   : > { %v3217_v59 = vmax.f32 %v2961_v39, 0.0  ;;  %v2045_v49 = vpop.f32.mrf.mxu2  ;;  %v2210_v19 = vpop.f32.mrf.mxu3 }
 0x1a1   : > { %v3550_v42 = vadd.f32 %v3549_v52, %v3274_v63  ;;  %v3626_v12 = vadd.f32 %v3625_v34, %v3340_v10  ;;  %v2491_v32 = vadd.f32 %v5633_v0, %v2045_v49  ;;  %v2557_v1 = vadd.f32 %v5679_v37, %v2210_v19  ;;  %v1737_v5 = vpop.f32.mrf.mxu0  ;;  %v1902_v9 = vpop.f32.mrf.mxu1 }
 0x1a2   : > { %v3488_v47 = vadd.f32 %v3487_v30, %v3217_v59  ;;  %v2368_v7 = vadd.f32 %v5749_v8, %v1737_v5  ;;  %v2434_v3 = vadd.f32 %v5798_v27, %v1902_v9  ;;  %v3151_v59 = vmax.f32 %v2895_v22, 0.0  ;;  %v4607_v5 = vld [vmem:[%s4895_s13 + $0xc8] sm:$0xff]  ;;  %v4640_v9 = vld [vmem:[%s4895_s13 + $0x1d0] sm:$0xff] }
 0x1a3   : > { %v2755_v52 = vmul.f32 %v5134_v55, %v2491_v32  ;;  %v2821_v0 = vmul.f32 %v5081_v50, %v2557_v1 }
 0x1a4   : > { %v2632_v34 = vmul.f32 %v5761_v25, %v2368_v7  ;;  %v2698_v31 = vmul.f32 %v5011_v60, %v2434_v3 }
 0x1a5   : > { %v3019_v30 = vadd.f32 %v5137_v6, %v2755_v52  ;;  %v3085_v28 = vadd.f32 %v5084_v58, %v2821_v0 }
 0x1a6   : > { %v2896_v33 = vadd.f32 %v5763_v21, %v2632_v34  ;;  %v2962_v39 = vadd.f32 %v5020_v2, %v2698_v31 }
 0x1a7   : > { %v3275_v63 = vmax.f32 %v3019_v30, 0.0  ;;  %v3341_v10 = vmax.f32 %v3085_v28, 0.0  ;;  %v4702_v30 = vld [vmem:[%s4895_s13 + $0x3c0] sm:$0xff] }
 0x1a8   : > { %v3152_v49 = vmax.f32 %v2896_v33, 0.0  ;;  %v3218_v19 = vmax.f32 %v2962_v39, 0.0  ;;  %v2047_v32 = vpop.f32.mrf.mxu2  ;;  %v2212_v1 = vpop.f32.mrf.mxu3  ;;  %v5819_v33 = vld [vmem:[%s6467_s2 + $0x20] sm:$0xff] }
 0x1a9   : > { %v3551_v7 = vadd.f32 %v3550_v42, %v3275_v63  ;;  %v3627_v3 = vadd.f32 %v3626_v12, %v3341_v10  ;;  %v2492_v52 = vadd.f32 %v5656_v62, %v2047_v32  ;;  %v2558_v0 = vadd.f32 %v5702_v35, %v2212_v1  ;;  %v1740_v34 = vpop.f32.mrf.mxu0  ;;  %v1905_v31 = vpop.f32.mrf.mxu1 }
 0x1aa   : > { %v3413_v23 = vadd.f32 %v3152_v49, %v3151_v59  ;;  %v3489_v28 = vadd.f32 %v3488_v47, %v3218_v19  ;;  %v2369_v22 = vadd.f32 %v5777_v41, %v1740_v34  ;;  %v2435_v42 = vadd.f32 %v5819_v33, %v1905_v31  ;;  %v2302_v47 = vld [vmem:[%s4965_s17 + $0xe] sm:$0x3] }
 0x1ab   : > { %v2756_v62 = vmul.f32 %v5134_v55, %v2492_v52  ;;  %v2822_v12 = vmul.f32 %v5081_v50, %v2558_v0  ;;  %v5835_v1 = vperm.slane %v2302_v47, 0  ;;  %v5837_v34 = vperm.slane %v2302_v47, 1 }
 0x1ac   : > { %v2633_v39 = vmul.f32 %v5761_v25, %v2369_v22  ;;  %v2699_v63 = vmul.f32 %v5011_v60, %v2435_v42  ;;  %4444 = vmatmul.msk.bf16.gmra.mxu0 %vm1261_vm0, %v4607_v5  ;;  %4477 = vmatmul.msk.bf16.gmra.mxu1 %vm1261_vm0, %v4640_v9 }
 0x1ad   : > { %v3020_v10 = vadd.f32 %v5137_v6, %v2756_v62  ;;  %v3086_v59 = vadd.f32 %v5084_v58, %v2822_v12  ;;  %4506 = vmatmul.msk.bf16.gmra.mxu2 %vm1261_vm0, %v4669_v36  ;;  %4539 = vmatmul.msk.bf16.gmra.mxu3 %vm1261_vm0, %v4702_v30 }
 0x1ae   : > { %v2897_v49 = vadd.f32 %v5763_v21, %v2633_v39  ;;  %v2963_v50 = vadd.f32 %v5020_v2, %v2699_v63  ;;  %v5847_v63 = vld [vmem:[%s6467_s2 + $0x28] sm:$0xff] }
 0x1af   : > { %v3276_v19 = vmax.f32 %v3020_v10, 0.0  ;;  %v3342_v32 = vmax.f32 %v3086_v59, 0.0 }
 0x1b0   : > { %v3153_v5 = vmax.f32 %v2897_v49, 0.0  ;;  %v3219_v52 = vmax.f32 %v2963_v50, 0.0  ;;  %v2050_v9 = vpop.f32.mrf.mxu2  ;;  %v2215_v0 = vpop.f32.mrf.mxu3 }
 0x1b1   : > { %v3552_v31 = vadd.f32 %v3551_v7, %v3276_v19  ;;  %v5839_v58 = vadd.f32 %v3627_v3, %v3342_v32  ;;  %v2493_v36 = vadd.f32 %v5679_v37, %v2050_v9  ;;  %v2559_v30 = vadd.f32 %v5728_v18, %v2215_v0  ;;  %v1742_v22 = vpop.f32.mrf.mxu0  ;;  %v1907_v42 = vpop.f32.mrf.mxu1  ;;  %v4608_v9 = vld [vmem:[%s4895_s13 + $0xd0] sm:$0xff]  ;;  %v4641_v0 = vld [vmem:[%s4895_s13 + $0x1d8] sm:$0xff] }
 0x1b2   : > { %v3414_v62 = vadd.f32 %v3413_v23, %v3153_v5  ;;  %v3490_v12 = vadd.f32 %v3489_v28, %v3219_v52  ;;  %v2370_v39 = vadd.f32 %v5798_v27, %v1742_v22  ;;  %v2436_v7 = vadd.f32 %v5847_v63, %v1907_v42 }
 0x1b3   : > { %6490 = vst [vmem:[#allocation20_spill] sm:$0xff] %v5839_v58  ;;  %v2757_v3 = vmul.f32 %v5134_v55, %v2493_v36  ;;  %v2823_v37 = vmul.f32 %v5835_v1, %v2559_v30 }
 0x1b4   : > { %v2634_v47 = vmul.f32 %v5761_v25, %v2370_v39  ;;  %v2700_v23 = vmul.f32 %v5011_v60, %v2436_v7  ;;  %v4670_v7 = vld [vmem:[%s4895_s13 + $0x2c0] sm:$0xff] }
 0x1b5   : > { %v3021_v28 = vadd.f32 %v5137_v6, %v2757_v3  ;;  %v3087_v10 = vadd.f32 %v5837_v34, %v2823_v37  ;;  %v4703_v3 = vld [vmem:[%s4895_s13 + $0x3c8] sm:$0xff] }
 0x1b6   : > { %v2898_v59 = vadd.f32 %v5763_v21, %v2634_v47  ;;  %v2964_v49 = vadd.f32 %v5020_v2, %v2700_v23 }
 0x1b7   : > { %v3277_v50 = vmax.f32 %v3021_v28, 0.0  ;;  %v5868_v28 = vld [vmem:[%s6467_s2 + $0x30] sm:$0xff] }
 0x1b8   : > { %v3154_v19 = vmax.f32 %v2898_v59, 0.0  ;;  %v3220_v32 = vmax.f32 %v2964_v49, 0.0  ;;  %v2052_v5 = vpop.f32.mrf.mxu2  ;;  %v2217_v52 = vpop.f32.mrf.mxu3 }
 0x1b9   : > { %v3553_v36 = vadd.f32 %v3552_v31, %v3277_v50  ;;  %v2494_v30 = vadd.f32 %v5702_v35, %v2052_v5  ;;  %v2560_v22 = vadd.f32 %v5749_v8, %v2217_v52  ;;  %v1745_v42 = vpop.f32.mrf.mxu0  ;;  %v1910_v39 = vpop.f32.mrf.mxu1 }
 0x1ba   : > { %v3415_v37 = vadd.f32 %v3414_v62, %v3154_v19  ;;  %v3491_v47 = vadd.f32 %v3490_v12, %v3220_v32  ;;  %v2371_v23 = vadd.f32 %v5819_v33, %v1745_v42  ;;  %v2437_v59 = vadd.f32 %v5868_v28, %v1910_v39 }
 0x1bb   : > { %v2758_v31 = vmul.f32 %v5134_v55, %v2494_v30  ;;  %v2824_v35 = vmul.f32 %v5835_v1, %v2560_v22  ;;  %v3343_v62 = vmax.f32 %v3087_v10, 0.0 }
 0x1bc   : > { %v2635_v49 = vmul.f32 %v5761_v25, %v2371_v23  ;;  %v2701_v50 = vmul.f32 %v5011_v60, %v2437_v59  ;;  %4445 = vmatmul.msk.bf16.gmra.mxu0 %vm1261_vm0, %v4608_v9  ;;  %4478 = vmatmul.msk.bf16.gmra.mxu1 %vm1261_vm0, %v4641_v0 }
 0x1bd   : > { %v3022_v12 = vadd.f32 %v5137_v6, %v2758_v31  ;;  %v3088_v19 = vadd.f32 %v5837_v34, %v2824_v35  ;;  %4507 = vmatmul.msk.bf16.gmra.mxu2 %vm1261_vm0, %v4670_v7  ;;  %4540 = vmatmul.msk.bf16.gmra.mxu3 %vm1261_vm0, %v4703_v3  ;;  %v5891_v35 = vld [vmem:[%s6467_s2 + $0x38] sm:$0xff] }
 0x1be   : > { %v2899_v55 = vadd.f32 %v5763_v21, %v2635_v49  ;;  %v2965_v32 = vadd.f32 %v5020_v2, %v2701_v50 }
 0x1bf   : > { %v3278_v5 = vmax.f32 %v3022_v12, 0.0  ;;  %v3344_v52 = vmax.f32 %v3088_v19, 0.0 }
 0x1c0   : > { %v3155_v30 = vmax.f32 %v2899_v55, 0.0  ;;  %v3221_v22 = vmax.f32 %v2965_v32, 0.0  ;;  %v2055_v9 = vpop.f32.mrf.mxu2  ;;  %v2220_v42 = vpop.f32.mrf.mxu3 }
 0x1c1   : > { %v5883_v0 = vadd.f32 %v3553_v36, %v3278_v5  ;;  %v3635_v10 = vadd.f32 %v3344_v52, %v3343_v62  ;;  %v2495_v6 = vadd.f32 %v5728_v18, %v2055_v9  ;;  %v2561_v39 = vadd.f32 %v5777_v41, %v2220_v42  ;;  %v1747_v7 = vpop.f32.mrf.mxu0  ;;  %v1912_v23 = vpop.f32.mrf.mxu1  ;;  %v4718_v18 = vld [vmem:[%s6469_s4 + $0x20] sm:$0xff]  ;;  %v4609_v9 = vld [vmem:[%s4895_s13 + $0xd8] sm:$0xff] }
 0x1c2   : > { %v3416_v3 = vadd.f32 %v3415_v37, %v3155_v30  ;;  %v3492_v59 = vadd.f32 %v3491_v47, %v3221_v22  ;;  %v2372_v31 = vadd.f32 %v5847_v63, %v1747_v7  ;;  %v2438_v49 = vadd.f32 %v5891_v35, %v1912_v23  ;;  %3773 = vmatpush.bf16.msrb.mxu1 %v4718_v18  ;;  %v4642_v42 = vld [vmem:[%s4895_s13 + $0x1e0] sm:$0xff]  ;;  %v4704_v18 = vld [vmem:[%s4895_s13 + $0x3d0] sm:$0xff] }
 0x1c3   : > { %v2759_v36 = vmul.f32 %v5013_v61, %v2495_v6  ;;  %v2825_v37 = vmul.f32 %v5835_v1, %v2561_v39 }
 0x1c4   : > { %v2636_v47 = vmul.f32 %v5761_v25, %v2372_v31  ;;  %v2702_v50 = vmul.f32 %v5011_v60, %v2438_v49  ;;  %v4671_v49 = vld [vmem:[%s4895_s13 + $0x2c8] sm:$0xff] }
 0x1c5   : > { %v3023_v62 = vadd.f32 %v5022_v4, %v2759_v36  ;;  %v3089_v12 = vadd.f32 %v5837_v34, %v2825_v37 }
 0x1c6   : > { %v2900_v19 = vadd.f32 %v5763_v21, %v2636_v47  ;;  %v2966_v55 = vadd.f32 %v5020_v2, %v2702_v50  ;;  %v5915_v50 = vld [vmem:[%s6467_s2 + $0x40] sm:$0xff] }
 0x1c7   : > { %v3345_v32 = vmax.f32 %v3089_v12, 0.0 }
 0x1c8   : > { %v3156_v5 = vmax.f32 %v2900_v19, 0.0  ;;  %v3222_v52 = vmax.f32 %v2966_v55, 0.0  ;;  %v2057_v30 = vpop.f32.mrf.mxu2  ;;  %v2222_v22 = vpop.f32.mrf.mxu3 }
 0x1c9   : > { %v3636_v6 = vadd.f32 %v3635_v10, %v3345_v32  ;;  %v2496_v39 = vadd.f32 %v5749_v8, %v2057_v30  ;;  %v2562_v7 = vadd.f32 %v5798_v27, %v2222_v22  ;;  %v1750_v23 = vpop.f32.mrf.mxu0  ;;  %v1915_v31 = vpop.f32.mrf.mxu1 }
 0x1ca   : > { %v3417_v36 = vadd.f32 %v3416_v3, %v3156_v5  ;;  %v3493_v37 = vadd.f32 %v3492_v59, %v3222_v52  ;;  %v2373_v47 = vadd.f32 %v5868_v28, %v1750_v23  ;;  %v2439_v12 = vadd.f32 %v5915_v50, %v1915_v31 }
 0x1cb   : > { %v2760_v10 = vmul.f32 %v5013_v61, %v2496_v39  ;;  %v2826_v8 = vmul.f32 %v5835_v1, %v2562_v7  ;;  %v3279_v3 = vmax.f32 %v3023_v62, 0.0 }
 0x1cc   : > { %v2637_v19 = vmul.f32 %v5761_v25, %v2373_v47  ;;  %v2703_v55 = vmul.f32 %v5011_v60, %v2439_v12  ;;  %4446 = vmatmul.msk.bf16.gmra.mxu0 %vm1261_vm0, %v4609_v9  ;;  %4479 = vmatmul.msk.bf16.gmra.mxu1 %vm1261_vm0, %v4642_v42 }
 0x1cd   : > { %v3024_v59 = vadd.f32 %v5022_v4, %v2760_v10  ;;  %v3090_v32 = vadd.f32 %v5837_v34, %v2826_v8  ;;  %4508 = vmatmul.msk.bf16.gmra.mxu2 %vm1261_vm0, %v4671_v49  ;;  %4541 = vmatmul.msk.bf16.gmra.mxu3 %vm1261_vm0, %v4704_v18 }
 0x1ce   : > { %v2901_v5 = vadd.f32 %v5763_v21, %v2637_v19  ;;  %v2967_v52 = vadd.f32 %v5020_v2, %v2703_v55  ;;  %v5936_v19 = vld [vmem:[%s6467_s2 + $0x48] sm:$0xff] }
 0x1cf   : > { %v3280_v30 = vmax.f32 %v3024_v59, 0.0  ;;  %v3346_v22 = vmax.f32 %v3090_v32, 0.0 }
 0x1d0   : > { %v3157_v39 = vmax.f32 %v2901_v5, 0.0  ;;  %v3223_v7 = vmax.f32 %v2967_v52, 0.0  ;;  %v2060_v9 = vpop.f32.mrf.mxu2  ;;  %v2225_v23 = vpop.f32.mrf.mxu3 }
 0x1d1   : > { %v3561_v42 = vadd.f32 %v3280_v30, %v3279_v3  ;;  %v3637_v62 = vadd.f32 %v3636_v6, %v3346_v22  ;;  %v2497_v31 = vadd.f32 %v5777_v41, %v2060_v9  ;;  %v2563_v47 = vadd.f32 %v5819_v33, %v2225_v23  ;;  %v1752_v12 = vpop.f32.mrf.mxu0  ;;  %v1917_v49 = vpop.f32.mrf.mxu1  ;;  %v4610_v23 = vld [vmem:[%s4895_s13 + $0xe0] sm:$0xff] }
 0x1d2   : > { %v3418_v10 = vadd.f32 %v3417_v36, %v3157_v39  ;;  %v3494_v18 = vadd.f32 %v3493_v37, %v3223_v7  ;;  %v2374_v8 = vadd.f32 %v5891_v35, %v1752_v12  ;;  %v2440_v55 = vadd.f32 %v5936_v19, %v1917_v49 }
 0x1d3   : > { %v2761_v6 = vmul.f32 %v5013_v61, %v2497_v31  ;;  %v2827_v41 = vmul.f32 %v5835_v1, %v2563_v47  ;;  %v4643_v31 = vld [vmem:[%s4895_s13 + $0x1e8] sm:$0xff] }
 0x1d4   : > { %v2638_v3 = vmul.f32 %v5761_v25, %v2374_v8  ;;  %v2704_v36 = vmul.f32 %v5011_v60, %v2440_v55 }
 0x1d5   : > { %v3025_v37 = vadd.f32 %v5022_v4, %v2761_v6  ;;  %v3091_v59 = vadd.f32 %v5837_v34, %v2827_v41  ;;  %v4672_v41 = vld [vmem:[%s4895_s13 + $0x2d0] sm:$0xff] }
 0x1d6   : > { %v2902_v32 = vadd.f32 %v5763_v21, %v2638_v3  ;;  %v2968_v5 = vadd.f32 %v5020_v2, %v2704_v36  ;;  %v4705_v3 = vld [vmem:[%s4895_s13 + $0x3d8] sm:$0xff] }
 0x1d7   : > { %v3281_v52 = vmax.f32 %v3025_v37, 0.0  ;;  %v3347_v30 = vmax.f32 %v3091_v59, 0.0  ;;  %v5957_v59 = vld [vmem:[%s6467_s2 + $0x50] sm:$0xff] }
 0x1d8   : > { %v3158_v22 = vmax.f32 %v2902_v32, 0.0  ;;  %v3224_v39 = vmax.f32 %v2968_v5, 0.0  ;;  %v2062_v7 = vpop.f32.mrf.mxu2  ;;  %v2227_v9 = vpop.f32.mrf.mxu3 }
 0x1d9   : > { %v3562_v47 = vadd.f32 %v3561_v42, %v3281_v52  ;;  %v3638_v12 = vadd.f32 %v3637_v62, %v3347_v30  ;;  %v2498_v49 = vadd.f32 %v5798_v27, %v2062_v7  ;;  %v2564_v8 = vadd.f32 %v5847_v63, %v2227_v9  ;;  %v1755_v55 = vpop.f32.mrf.mxu0  ;;  %v1920_v6 = vpop.f32.mrf.mxu1 }
 0x1da   : > { %v3419_v36 = vadd.f32 %v3418_v10, %v3158_v22  ;;  %v3495_v58 = vadd.f32 %v3494_v18, %v3224_v39  ;;  %v2375_v37 = vadd.f32 %v5915_v50, %v1755_v55  ;;  %v2441_v42 = vadd.f32 %v5957_v59, %v1920_v6 }
 0x1db   : > { %v2762_v62 = vmul.f32 %v5013_v61, %v2498_v49  ;;  %v2828_v27 = vmul.f32 %v5835_v1, %v2564_v8 }
 0x1dc   : > { %v2639_v32 = vmul.f32 %v5761_v25, %v2375_v37  ;;  %v2705_v5 = vmul.f32 %v5011_v60, %v2441_v42  ;;  %4447 = vmatmul.msk.bf16.gmra.mxu0 %vm1261_vm0, %v4610_v23  ;;  %4480 = vmatmul.msk.bf16.gmra.mxu1 %vm1261_vm0, %v4643_v31 }
 0x1dd   : > { %v3026_v10 = vadd.f32 %v5022_v4, %v2762_v62  ;;  %v3092_v18 = vadd.f32 %v5837_v34, %v2828_v27  ;;  %4509 = vmatmul.msk.bf16.gmra.mxu2 %vm1261_vm0, %v4672_v41  ;;  %4542 = vmatmul.msk.bf16.gmra.mxu3 %vm1261_vm0, %v4705_v3  ;;  %v5978_v27 = vld [vmem:[%s6467_s2 + $0x58] sm:$0xff] }
 0x1de   : > { %v2903_v52 = vadd.f32 %v5763_v21, %v2639_v32  ;;  %v2969_v30 = vadd.f32 %v5020_v2, %v2705_v5 }
 0x1df   : > { %v3282_v22 = vmax.f32 %v3026_v10, 0.0  ;;  %v3348_v39 = vmax.f32 %v3092_v18, 0.0 }
 0x1e0   : > { %v3159_v7 = vmax.f32 %v2903_v52, 0.0  ;;  %v3225_v9 = vmax.f32 %v2969_v30, 0.0  ;;  %v2065_v49 = vpop.f32.mrf.mxu2  ;;  %v2230_v23 = vpop.f32.mrf.mxu3 }
 0x1e1   : > { %v3563_v8 = vadd.f32 %v3562_v47, %v3282_v22  ;;  %v3639_v31 = vadd.f32 %v3638_v12, %v3348_v39  ;;  %v2499_v55 = vadd.f32 %v5819_v33, %v2065_v49  ;;  %v2565_v6 = vadd.f32 %v5868_v28, %v2230_v23  ;;  %v1757_v37 = vpop.f32.mrf.mxu0  ;;  %v1922_v41 = vpop.f32.mrf.mxu1  ;;  %v4611_v49 = vld [vmem:[%s4895_s13 + $0xe8] sm:$0xff] }
 0x1e2   : > { %v3420_v42 = vadd.f32 %v3419_v36, %v3159_v7  ;;  %v3496_v3 = vadd.f32 %v3495_v58, %v3225_v9  ;;  %v2376_v62 = vadd.f32 %v5936_v19, %v1757_v37  ;;  %v2442_v32 = vadd.f32 %v5978_v27, %v1922_v41 }
 0x1e3   : > { %v2763_v47 = vmul.f32 %v5013_v61, %v2499_v55  ;;  %v2829_v33 = vmul.f32 %v5835_v1, %v2565_v6 }
 0x1e4   : > { %v2640_v12 = vmul.f32 %v5761_v25, %v2376_v62  ;;  %v2706_v5 = vmul.f32 %v5011_v60, %v2442_v32  ;;  %v4673_v32 = vld [vmem:[%s4895_s13 + $0x2d8] sm:$0xff] }
 0x1e5   : > { %v3027_v58 = vadd.f32 %v5022_v4, %v2763_v47  ;;  %v3093_v36 = vadd.f32 %v5837_v34, %v2829_v33  ;;  %v4706_v47 = vld [vmem:[%s4895_s13 + $0x3e0] sm:$0xff] }
 0x1e6   : > { %v2904_v10 = vadd.f32 %v5763_v21, %v2640_v12  ;;  %v2970_v18 = vadd.f32 %v5020_v2, %v2706_v5 }
 0x1e7   : > { %v3283_v52 = vmax.f32 %v3027_v58, 0.0  ;;  %v3349_v30 = vmax.f32 %v3093_v36, 0.0  ;;  %v5998_v58 = vld [vmem:[%s6467_s2 + $0x60] sm:$0xff] }
 0x1e8   : > { %v3160_v22 = vmax.f32 %v2904_v10, 0.0  ;;  %v3226_v39 = vmax.f32 %v2970_v18, 0.0  ;;  %v2067_v7 = vpop.f32.mrf.mxu2  ;;  %v2232_v9 = vpop.f32.mrf.mxu3 }
 0x1e9   : > { %v3564_v23 = vadd.f32 %v3563_v8, %v3283_v52  ;;  %v3640_v55 = vadd.f32 %v3639_v31, %v3349_v30  ;;  %v2500_v6 = vadd.f32 %v5847_v63, %v2067_v7  ;;  %v2566_v37 = vadd.f32 %v5891_v35, %v2232_v9  ;;  %v1760_v41 = vpop.f32.mrf.mxu0  ;;  %v1925_v62 = vpop.f32.mrf.mxu1 }
 0x1ea   : > { %v3421_v33 = vadd.f32 %v3420_v42, %v3160_v22  ;;  %v3497_v12 = vadd.f32 %v3496_v3, %v3226_v39  ;;  %v2377_v5 = vadd.f32 %v5957_v59, %v1760_v41  ;;  %v2443_v8 = vadd.f32 %v5998_v58, %v1925_v62 }
 0x1eb   : > { %v2764_v31 = vmul.f32 %v5013_v61, %v2500_v6  ;;  %v2830_v63 = vmul.f32 %v5835_v1, %v2566_v37 }
 0x1ec   : > { %v2641_v36 = vmul.f32 %v5761_v25, %v2377_v5  ;;  %v2707_v10 = vmul.f32 %v5011_v60, %v2443_v8  ;;  %4448 = vmatmul.msk.bf16.gmra.mxu0 %vm1261_vm0, %v4611_v49 }
 0x1ed   : > { %v3028_v42 = vadd.f32 %v5022_v4, %v2764_v31  ;;  %v3094_v3 = vadd.f32 %v5837_v34, %v2830_v63  ;;  %4510 = vmatmul.msk.bf16.gmra.mxu2 %vm1261_vm0, %v4673_v32  ;;  %4543 = vmatmul.msk.bf16.gmra.mxu3 %vm1261_vm0, %v4706_v47  ;;  %v6018_v63 = vld [vmem:[%s6467_s2 + $0x68] sm:$0xff] }
 0x1ee   : > { %v2905_v18 = vadd.f32 %v5763_v21, %v2641_v36  ;;  %v2971_v52 = vadd.f32 %v5020_v2, %v2707_v10 }
 0x1ef   : > { %v3284_v30 = vmax.f32 %v3028_v42, 0.0  ;;  %v3350_v22 = vmax.f32 %v3094_v3, 0.0 }
 0x1f0   : > { %v3161_v39 = vmax.f32 %v2905_v18, 0.0  ;;  %v3227_v7 = vmax.f32 %v2971_v52, 0.0  ;;  %v2070_v9 = vpop.f32.mrf.mxu2  ;;  %v2235_v6 = vpop.f32.mrf.mxu3 }
 0x1f1   : > { %v3565_v37 = vadd.f32 %v3564_v23, %v3284_v30  ;;  %v3641_v49 = vadd.f32 %v3640_v55, %v3350_v22  ;;  %v2501_v41 = vadd.f32 %v5868_v28, %v2070_v9  ;;  %v2567_v62 = vadd.f32 %v5915_v50, %v2235_v6  ;;  %v1762_v5 = vpop.f32.mrf.mxu0  ;;  %v1927_v32 = vpop.f32.mrf.mxu1  ;;  %v4612_v9 = vld [vmem:[%s4895_s13 + $0xf0] sm:$0xff] }
 0x1f2   : > { %v3422_v8 = vadd.f32 %v3421_v33, %v3161_v39  ;;  %v3498_v47 = vadd.f32 %v3497_v12, %v3227_v7  ;;  %v2378_v31 = vadd.f32 %v5978_v27, %v1762_v5  ;;  %v2444_v36 = vadd.f32 %v6018_v63, %v1927_v32 }
 0x1f3   : > { %v2765_v23 = vmul.f32 %v5013_v61, %v2501_v41  ;;  %v2831_v28 = vmul.f32 %v5835_v1, %v2567_v62 }
 0x1f4   : > { %v2642_v55 = vmul.f32 %v5761_v25, %v2378_v31  ;;  %v2708_v10 = vmul.f32 %v5011_v60, %v2444_v36  ;;  %v4674_v36 = vld [vmem:[%s4895_s13 + $0x2e0] sm:$0xff] }
 0x1f5   : > { %v3029_v33 = vadd.f32 %v5022_v4, %v2765_v23  ;;  %v3095_v12 = vadd.f32 %v5837_v34, %v2831_v28  ;;  %v4707_v23 = vld [vmem:[%s4895_s13 + $0x3e8] sm:$0xff] }
 0x1f6   : > { %v2906_v42 = vadd.f32 %v5763_v21, %v2642_v55  ;;  %v2972_v3 = vadd.f32 %v5020_v2, %v2708_v10 }
 0x1f7   : > { %v3285_v18 = vmax.f32 %v3029_v33, 0.0  ;;  %v3351_v52 = vmax.f32 %v3095_v12, 0.0  ;;  %v6038_v33 = vld [vmem:[%s6467_s2 + $0x70] sm:$0xff] }
 0x1f8   : > { %v3162_v30 = vmax.f32 %v2906_v42, 0.0  ;;  %v3228_v22 = vmax.f32 %v2972_v3, 0.0  ;;  %v2072_v39 = vpop.f32.mrf.mxu2  ;;  %v2237_v7 = vpop.f32.mrf.mxu3 }
 0x1f9   : > { %v3566_v6 = vadd.f32 %v3565_v37, %v3285_v18  ;;  %v3642_v41 = vadd.f32 %v3641_v49, %v3351_v52  ;;  %v2502_v62 = vadd.f32 %v5891_v35, %v2072_v39  ;;  %v2568_v5 = vadd.f32 %v5936_v19, %v2237_v7  ;;  %v1765_v32 = vpop.f32.mrf.mxu0  ;;  %v1930_v31 = vpop.f32.mrf.mxu1  ;;  %v4717_v35 = vld [vmem:[%s6469_s4 + $0x18] sm:$0xff] }
 0x1fa   : > { %v3423_v28 = vadd.f32 %v3422_v8, %v3162_v30  ;;  %v3499_v55 = vadd.f32 %v3498_v47, %v3228_v22  ;;  %v2379_v10 = vadd.f32 %v5998_v58, %v1765_v32  ;;  %v2445_v37 = vadd.f32 %v6038_v33, %v1930_v31  ;;  %3774 = vmatpush.bf16.msrb.mxu1 %v4717_v35 }
 0x1fb   : > { %v2766_v49 = vmul.f32 %v5013_v61, %v2502_v62  ;;  %v2832_v12 = vmul.f32 %v5835_v1, %v2568_v5 }
 0x1fc   : > { %v2643_v8 = vmul.f32 %v5761_v25, %v2379_v10  ;;  %v2709_v47 = vmul.f32 %v5011_v60, %v2445_v37  ;;  %4449 = vmatmul.msk.bf16.gmra.mxu0 %vm1261_vm0, %v4612_v9 }
 0x1fd   : > { %v3030_v42 = vadd.f32 %v5022_v4, %v2766_v49  ;;  %v3096_v3 = vadd.f32 %v5837_v34, %v2832_v12  ;;  %4511 = vmatmul.msk.bf16.gmra.mxu2 %vm1261_vm0, %v4674_v36  ;;  %4544 = vmatmul.msk.bf16.gmra.mxu3 %vm1261_vm0, %v4707_v23  ;;  %v6061_v12 = vld [vmem:[%s6467_s2 + $0x78] sm:$0xff] }
 0x1fe   : > { %v2907_v18 = vadd.f32 %v5763_v21, %v2643_v8  ;;  %v2973_v52 = vadd.f32 %v5020_v2, %v2709_v47 }
 0x1ff   : > { %v3286_v30 = vmax.f32 %v3030_v42, 0.0  ;;  %v3352_v22 = vmax.f32 %v3096_v3, 0.0 }
 0x200   : > { %v3163_v39 = vmax.f32 %v2907_v18, 0.0  ;;  %v3229_v7 = vmax.f32 %v2973_v52, 0.0  ;;  %v2075_v62 = vpop.f32.mrf.mxu2  ;;  %v2240_v5 = vpop.f32.mrf.mxu3 }
 0x201   : > { %v3567_v9 = vadd.f32 %v3566_v6, %v3286_v30  ;;  %v3643_v32 = vadd.f32 %v3642_v41, %v3352_v22  ;;  %v2503_v31 = vadd.f32 %v5915_v50, %v2075_v62  ;;  %v2569_v10 = vadd.f32 %v5957_v59, %v2240_v5  ;;  %v1767_v37 = vpop.f32.mrf.mxu0  ;;  %v1932_v36 = vpop.f32.mrf.mxu1  ;;  %v4613_v62 = vld [vmem:[%s4895_s13 + $0xf8] sm:$0xff] }
 0x202   : > { %v3424_v35 = vadd.f32 %v3423_v28, %v3163_v39  ;;  %v3500_v23 = vadd.f32 %v3499_v55, %v3229_v7  ;;  %v2380_v49 = vadd.f32 %v6018_v63, %v1767_v37  ;;  %v2446_v8 = vadd.f32 %v6061_v12, %v1932_v36 }
 0x203   : > { %v2767_v6 = vmul.f32 %v5013_v61, %v2503_v31  ;;  %v2833_v50 = vmul.f32 %v5835_v1, %v2569_v10 }
 0x204   : > { %v2644_v41 = vmul.f32 %v5761_v25, %v2380_v49  ;;  %v2710_v47 = vmul.f32 %v5011_v60, %v2446_v8  ;;  %v4675_v8 = vld [vmem:[%s4895_s13 + $0x2e8] sm:$0xff] }
 0x205   : > { %v3031_v28 = vadd.f32 %v5022_v4, %v2767_v6  ;;  %v3097_v55 = vadd.f32 %v5837_v34, %v2833_v50  ;;  %v4708_v6 = vld [vmem:[%s4895_s13 + $0x3f0] sm:$0xff] }
 0x206   : > { %v2908_v42 = vadd.f32 %v5763_v21, %v2644_v41  ;;  %v2974_v3 = vadd.f32 %v5020_v2, %v2710_v47 }
 0x207   : > { %v3287_v18 = vmax.f32 %v3031_v28, 0.0  ;;  %v3353_v52 = vmax.f32 %v3097_v55, 0.0  ;;  %v6081_v28 = vld [vmem:[%s6467_s2 + $0x80] sm:$0xff] }
 0x208   : > { %v3164_v30 = vmax.f32 %v2908_v42, 0.0  ;;  %v3230_v22 = vmax.f32 %v2974_v3, 0.0  ;;  %v2077_v39 = vpop.f32.mrf.mxu2  ;;  %v2242_v7 = vpop.f32.mrf.mxu3 }
 0x209   : > { %v3568_v5 = vadd.f32 %v3567_v9, %v3287_v18  ;;  %v3644_v31 = vadd.f32 %v3643_v32, %v3353_v52  ;;  %v2504_v10 = vadd.f32 %v5936_v19, %v2077_v39  ;;  %v2570_v37 = vadd.f32 %v5978_v27, %v2242_v7  ;;  %v1770_v36 = vpop.f32.mrf.mxu0  ;;  %v1935_v49 = vpop.f32.mrf.mxu1 }
 0x20a   : > { %v3425_v50 = vadd.f32 %v3424_v35, %v3164_v30  ;;  %v3501_v41 = vadd.f32 %v3500_v23, %v3230_v22  ;;  %v2381_v47 = vadd.f32 %v6038_v33, %v1770_v36  ;;  %v2447_v9 = vadd.f32 %v6081_v28, %v1935_v49 }
 0x20b   : > { %v2768_v32 = vmul.f32 %v5013_v61, %v2504_v10  ;;  %v2834_v19 = vmul.f32 %v5835_v1, %v2570_v37 }
 0x20c   : > { %v2645_v55 = vmul.f32 %v5761_v25, %v2381_v47  ;;  %v2711_v42 = vmul.f32 %v5011_v60, %v2447_v9  ;;  %4450 = vmatmul.msk.bf16.gmra.mxu0 %vm1261_vm0, %v4613_v62 }
 0x20d   : > { %v3032_v35 = vadd.f32 %v5022_v4, %v2768_v32  ;;  %v3098_v23 = vadd.f32 %v5837_v34, %v2834_v19  ;;  %4512 = vmatmul.msk.bf16.gmra.mxu2 %vm1261_vm0, %v4675_v8  ;;  %4545 = vmatmul.msk.bf16.gmra.mxu3 %vm1261_vm0, %v4708_v6  ;;  %v6101_v19 = vld [vmem:[%s6467_s2 + $0x88] sm:$0xff] }
 0x20e   : > { %v2909_v3 = vadd.f32 %v5763_v21, %v2645_v55  ;;  %v2975_v18 = vadd.f32 %v5020_v2, %v2711_v42 }
 0x20f   : > { %v3288_v52 = vmax.f32 %v3032_v35, 0.0  ;;  %v3354_v30 = vmax.f32 %v3098_v23, 0.0 }
 0x210   : > { %v3165_v22 = vmax.f32 %v2909_v3, 0.0  ;;  %v3231_v39 = vmax.f32 %v2975_v18, 0.0  ;;  %v2080_v7 = vpop.f32.mrf.mxu2  ;;  %v2245_v10 = vpop.f32.mrf.mxu3 }
 0x211   : > { %v3569_v37 = vadd.f32 %v3568_v5, %v3288_v52  ;;  %v3645_v62 = vadd.f32 %v3644_v31, %v3354_v30  ;;  %v2505_v36 = vadd.f32 %v5957_v59, %v2080_v7  ;;  %v2571_v49 = vadd.f32 %v5998_v58, %v2245_v10  ;;  %v1772_v47 = vpop.f32.mrf.mxu0  ;;  %v1937_v8 = vpop.f32.mrf.mxu1  ;;  %v4614_v7 = vld [vmem:[%s4895_s13 + $0x100] sm:$0xff] }
 0x212   : > { %v3426_v9 = vadd.f32 %v3425_v50, %v3165_v22  ;;  %v3502_v6 = vadd.f32 %v3501_v41, %v3231_v39  ;;  %v2382_v32 = vadd.f32 %v6061_v12, %v1772_v47  ;;  %v2448_v55 = vadd.f32 %v6101_v19, %v1937_v8 }
 0x213   : > { %v2769_v5 = vmul.f32 %v5013_v61, %v2505_v36  ;;  %v2835_v59 = vmul.f32 %v5835_v1, %v2571_v49 }
 0x214   : > { %v2646_v31 = vmul.f32 %v5761_v25, %v2382_v32  ;;  %v2712_v42 = vmul.f32 %v5011_v60, %v2448_v55  ;;  %v4676_v55 = vld [vmem:[%s4895_s13 + $0x2f0] sm:$0xff] }
 0x215   : > { %v3033_v50 = vadd.f32 %v5022_v4, %v2769_v5  ;;  %v3099_v41 = vadd.f32 %v5837_v34, %v2835_v59  ;;  %v4709_v5 = vld [vmem:[%s4895_s13 + $0x3f8] sm:$0xff] }
 0x216   : > { %v2910_v35 = vadd.f32 %v5763_v21, %v2646_v31  ;;  %v2976_v23 = vadd.f32 %v5020_v2, %v2712_v42 }
 0x217   : > { %v3289_v3 = vmax.f32 %v3033_v50, 0.0  ;;  %v3355_v18 = vmax.f32 %v3099_v41, 0.0  ;;  %v6121_v50 = vld [vmem:[%s6467_s2 + $0x90] sm:$0xff] }
 0x218   : > { %v3166_v52 = vmax.f32 %v2910_v35, 0.0  ;;  %v3232_v30 = vmax.f32 %v2976_v23, 0.0  ;;  %v2082_v22 = vpop.f32.mrf.mxu2  ;;  %v2247_v39 = vpop.f32.mrf.mxu3 }
 0x219   : > { %v3570_v10 = vadd.f32 %v3569_v37, %v3289_v3  ;;  %v3646_v36 = vadd.f32 %v3645_v62, %v3355_v18  ;;  %v2506_v49 = vadd.f32 %v5978_v27, %v2082_v22  ;;  %v2572_v47 = vadd.f32 %v6018_v63, %v2247_v39  ;;  %v1775_v8 = vpop.f32.mrf.mxu0  ;;  %v1940_v32 = vpop.f32.mrf.mxu1 }
 0x21a   : > { %v3427_v59 = vadd.f32 %v3426_v9, %v3166_v52  ;;  %v3503_v31 = vadd.f32 %v3502_v6, %v3232_v30  ;;  %v2383_v42 = vadd.f32 %v6081_v28, %v1775_v8  ;;  %v2449_v37 = vadd.f32 %v6121_v50, %v1940_v32 }
 0x21b   : > { %v2770_v62 = vmul.f32 %v5013_v61, %v2506_v49  ;;  %v2836_v27 = vmul.f32 %v5835_v1, %v2572_v47 }
 0x21c   : > { %v2647_v41 = vmul.f32 %v5761_v25, %v2383_v42  ;;  %v2713_v35 = vmul.f32 %v5011_v60, %v2449_v37  ;;  %4451 = vmatmul.msk.bf16.gmra.mxu0 %vm1261_vm0, %v4614_v7 }
 0x21d   : > { %v3034_v9 = vadd.f32 %v5022_v4, %v2770_v62  ;;  %v3100_v6 = vadd.f32 %v5837_v34, %v2836_v27  ;;  %4513 = vmatmul.msk.bf16.gmra.mxu2 %vm1261_vm0, %v4676_v55  ;;  %4546 = vmatmul.msk.bf16.gmra.mxu3 %vm1261_vm0, %v4709_v5  ;;  %v6141_v27 = vld [vmem:[%s6467_s2 + $0x98] sm:$0xff] }
 0x21e   : > { %v2911_v23 = vadd.f32 %v5763_v21, %v2647_v41  ;;  %v2977_v3 = vadd.f32 %v5020_v2, %v2713_v35 }
 0x21f   : > { %v3290_v18 = vmax.f32 %v3034_v9, 0.0  ;;  %v3356_v52 = vmax.f32 %v3100_v6, 0.0 }
 0x220   : > { %v3167_v30 = vmax.f32 %v2911_v23, 0.0  ;;  %v3233_v22 = vmax.f32 %v2977_v3, 0.0  ;;  %v2085_v39 = vpop.f32.mrf.mxu2  ;;  %v2250_v49 = vpop.f32.mrf.mxu3 }
 0x221   : > { %v3571_v47 = vadd.f32 %v3570_v10, %v3290_v18  ;;  %v3647_v7 = vadd.f32 %v3646_v36, %v3356_v52  ;;  %v2507_v8 = vadd.f32 %v5998_v58, %v2085_v39  ;;  %v2573_v32 = vadd.f32 %v6038_v33, %v2250_v49  ;;  %v1777_v42 = vpop.f32.mrf.mxu0  ;;  %v1942_v55 = vpop.f32.mrf.mxu1 }
 0x222   : > { %v3428_v37 = vadd.f32 %v3427_v59, %v3167_v30  ;;  %v3504_v5 = vadd.f32 %v3503_v31, %v3233_v22  ;;  %v2384_v62 = vadd.f32 %v6101_v19, %v1777_v42  ;;  %v2450_v41 = vadd.f32 %v6141_v27, %v1942_v55 }
 0x223   : > { %v2771_v10 = vmul.f32 %v5013_v61, %v2507_v8  ;;  %v2837_v36 = vmul.f32 %v5835_v1, %v2573_v32 }
 0x224   : > { %v2648_v58 = vmul.f32 %v5761_v25, %v2384_v62  ;;  %v2714_v35 = vmul.f32 %v5011_v60, %v2450_v41 }
 0x225   : > { %v3035_v59 = vadd.f32 %v5022_v4, %v2771_v10  ;;  %v3101_v31 = vadd.f32 %v5837_v34, %v2837_v36  ;;  %v6158_v36 = vld [vmem:[%s6467_s2 + $0xa0] sm:$0xff] }
 0x226   : > { %v2912_v9 = vadd.f32 %v5763_v21, %v2648_v58  ;;  %v2978_v6 = vadd.f32 %v5020_v2, %v2714_v35 }
 0x227   : > { %v3291_v23 = vmax.f32 %v3035_v59, 0.0  ;;  %v3357_v3 = vmax.f32 %v3101_v31, 0.0 }
 0x228   : > { %v3168_v18 = vmax.f32 %v2912_v9, 0.0  ;;  %v3234_v52 = vmax.f32 %v2978_v6, 0.0  ;;  %v2087_v30 = vpop.f32.mrf.mxu2  ;;  %v2252_v22 = vpop.f32.mrf.mxu3 }
 0x229   : > { %v3572_v39 = vadd.f32 %v3571_v47, %v3291_v23  ;;  %v3648_v49 = vadd.f32 %v3647_v7, %v3357_v3  ;;  %v2508_v8 = vadd.f32 %v6018_v63, %v2087_v30  ;;  %v2574_v32 = vadd.f32 %v6061_v12, %v2252_v22  ;;  %v1780_v42 = vpop.f32.mrf.mxu0  ;;  %v1945_v55 = vpop.f32.mrf.mxu1 }
 0x22a   : > { %v3429_v62 = vadd.f32 %v3428_v37, %v3168_v18  ;;  %v3505_v41 = vadd.f32 %v3504_v5, %v3234_v52  ;;  %v2385_v10 = vadd.f32 %v6121_v50, %v1780_v42  ;;  %v2451_v58 = vadd.f32 %v6158_v36, %v1945_v55 }
 0x22b   : > { %v2772_v47 = vmul.f32 %v5013_v61, %v2508_v8  ;;  %v2838_v7 = vmul.f32 %v5835_v1, %v2574_v32 }
 0x22c   : > { %v2649_v63 = vmul.f32 %v5761_v25, %v2385_v10  ;;  %v2715_v35 = vmul.f32 %v5011_v60, %v2451_v58 }
 0x22d   : > { %v3036_v37 = vadd.f32 %v5022_v4, %v2772_v47  ;;  %v3102_v5 = vadd.f32 %v5837_v34, %v2838_v7  ;;  %v6175_v7 = vld [vmem:[%s6467_s2 + $0xa8] sm:$0xff] }
 0x22e   : > { %v2913_v59 = vadd.f32 %v5763_v21, %v2649_v63  ;;  %v2979_v31 = vadd.f32 %v5020_v2, %v2715_v35 }
 0x22f   : > { %v3292_v9 = vmax.f32 %v3036_v37, 0.0  ;;  %v3358_v6 = vmax.f32 %v3102_v5, 0.0 }
 0x230   : > { %v3169_v23 = vmax.f32 %v2913_v59, 0.0  ;;  %v3235_v3 = vmax.f32 %v2979_v31, 0.0  ;;  %v2090_v18 = vpop.f32.mrf.mxu2  ;;  %v2255_v52 = vpop.f32.mrf.mxu3 }
 0x231   : > { %v3573_v30 = vadd.f32 %v3572_v39, %v3292_v9  ;;  %v3649_v22 = vadd.f32 %v3648_v49, %v3358_v6  ;;  %v2509_v8 = vadd.f32 %v6038_v33, %v2090_v18  ;;  %v2575_v32 = vadd.f32 %v6081_v28, %v2255_v52  ;;  %v1782_v42 = vpop.f32.mrf.mxu0  ;;  %v1947_v55 = vpop.f32.mrf.mxu1  ;;  %v4716_v39 = vld [vmem:[%s6469_s4 + $0x10] sm:$0xff] }
 0x232   : > { %v3430_v10 = vadd.f32 %v3429_v62, %v3169_v23  ;;  %v3506_v58 = vadd.f32 %v3505_v41, %v3235_v3  ;;  %v2386_v47 = vadd.f32 %v6141_v27, %v1782_v42  ;;  %v2452_v63 = vadd.f32 %v6175_v7, %v1947_v55  ;;  %3775 = vmatpush.bf16.msrb.mxu1 %v4716_v39 }
 0x233   : > { %v2773_v33 = vmul.f32 %v5013_v61, %v2509_v8  ;;  %v2839_v49 = vmul.f32 %v5835_v1, %v2575_v32 }
 0x234   : > { %v2650_v62 = vmul.f32 %v5761_v25, %v2386_v47  ;;  %v2716_v41 = vmul.f32 %v5011_v60, %v2452_v63 }
 0x235   : > { %v3037_v35 = vadd.f32 %v5022_v4, %v2773_v33  ;;  %v3103_v37 = vadd.f32 %v5837_v34, %v2839_v49  ;;  %v6195_v49 = vld [vmem:[%s6467_s2 + $0xb0] sm:$0xff] }
 0x236   : > { %v2914_v5 = vadd.f32 %v5763_v21, %v2650_v62  ;;  %v2980_v59 = vadd.f32 %v5020_v2, %v2716_v41 }
 0x237   : > { %v3293_v31 = vmax.f32 %v3037_v35, 0.0  ;;  %v3359_v9 = vmax.f32 %v3103_v37, 0.0 }
 0x238   : > { %v3170_v6 = vmax.f32 %v2914_v5, 0.0  ;;  %v3236_v23 = vmax.f32 %v2980_v59, 0.0  ;;  %v2092_v3 = vpop.f32.mrf.mxu2  ;;  %v2257_v18 = vpop.f32.mrf.mxu3 }
 0x239   : > { %v3574_v52 = vadd.f32 %v3573_v30, %v3293_v31  ;;  %v3650_v8 = vadd.f32 %v3649_v22, %v3359_v9  ;;  %v2510_v32 = vadd.f32 %v6061_v12, %v2092_v3  ;;  %v2576_v42 = vadd.f32 %v6101_v19, %v2257_v18  ;;  %v1785_v55 = vpop.f32.mrf.mxu0  ;;  %v1950_v47 = vpop.f32.mrf.mxu1 }
 0x23a   : > { %v3431_v63 = vadd.f32 %v3430_v10, %v3170_v6  ;;  %v3507_v39 = vadd.f32 %v3506_v58, %v3236_v23  ;;  %v2387_v33 = vadd.f32 %v6158_v36, %v1785_v55  ;;  %v2453_v62 = vadd.f32 %v6195_v49, %v1950_v47 }
 0x23b   : > { %v2774_v30 = vmul.f32 %v5013_v61, %v2510_v32  ;;  %v2840_v22 = vmul.f32 %v5835_v1, %v2576_v42 }
 0x23c   : > { %v2651_v12 = vmul.f32 %v5761_v25, %v2387_v33  ;;  %v2717_v41 = vmul.f32 %v5011_v60, %v2453_v62 }
 0x23d   : > { %v3038_v10 = vadd.f32 %v5022_v4, %v2774_v30  ;;  %v3104_v58 = vadd.f32 %v5837_v34, %v2840_v22  ;;  %v6212_v22 = vld [vmem:[%s6467_s2 + $0xb8] sm:$0xff] }
 0x23e   : > { %v2915_v35 = vadd.f32 %v5763_v21, %v2651_v12  ;;  %v2981_v37 = vadd.f32 %v5020_v2, %v2717_v41 }
 0x23f   : > { %v3294_v5 = vmax.f32 %v3038_v10, 0.0  ;;  %v3360_v59 = vmax.f32 %v3104_v58, 0.0 }
 0x240   : > { %v3171_v31 = vmax.f32 %v2915_v35, 0.0  ;;  %v3237_v9 = vmax.f32 %v2981_v37, 0.0  ;;  %v2095_v6 = vpop.f32.mrf.mxu2  ;;  %v2260_v23 = vpop.f32.mrf.mxu3 }
 0x241   : > { %v3575_v3 = vadd.f32 %v3574_v52, %v3294_v5  ;;  %v3651_v18 = vadd.f32 %v3650_v8, %v3360_v59  ;;  %v2511_v32 = vadd.f32 %v6081_v28, %v2095_v6  ;;  %v2577_v42 = vadd.f32 %v6121_v50, %v2260_v23  ;;  %v1787_v55 = vpop.f32.mrf.mxu0  ;;  %v1952_v47 = vpop.f32.mrf.mxu1 }
 0x242   : > { %v3432_v33 = vadd.f32 %v3431_v63, %v3171_v31  ;;  %v3508_v62 = vadd.f32 %v3507_v39, %v3237_v9  ;;  %v2388_v30 = vadd.f32 %v6175_v7, %v1787_v55  ;;  %v2454_v12 = vadd.f32 %v6212_v22, %v1952_v47 }
 0x243   : > { %v2775_v52 = vmul.f32 %v5013_v61, %v2511_v32  ;;  %v2841_v8 = vmul.f32 %v5835_v1, %v2577_v42 }
 0x244   : > { %v2652_v28 = vmul.f32 %v5761_v25, %v2388_v30  ;;  %v2718_v41 = vmul.f32 %v5011_v60, %v2454_v12 }
 0x245   : > { %v3039_v63 = vadd.f32 %v5022_v4, %v2775_v52  ;;  %v3105_v39 = vadd.f32 %v5837_v34, %v2841_v8  ;;  %v6229_v8 = vld [vmem:[%s6467_s2 + $0xc0] sm:$0xff] }
 0x246   : > { %v2916_v10 = vadd.f32 %v5763_v21, %v2652_v28  ;;  %v2982_v58 = vadd.f32 %v5020_v2, %v2718_v41 }
 0x247   : > { %v3295_v35 = vmax.f32 %v3039_v63, 0.0  ;;  %v3361_v37 = vmax.f32 %v3105_v39, 0.0 }
 0x248   : > { %v3172_v5 = vmax.f32 %v2916_v10, 0.0  ;;  %v3238_v59 = vmax.f32 %v2982_v58, 0.0  ;;  %v2097_v31 = vpop.f32.mrf.mxu2  ;;  %v2262_v9 = vpop.f32.mrf.mxu3 }
 0x249   : > { %v3576_v6 = vadd.f32 %v3575_v3, %v3295_v35  ;;  %v3652_v23 = vadd.f32 %v3651_v18, %v3361_v37  ;;  %v2512_v32 = vadd.f32 %v6101_v19, %v2097_v31  ;;  %v2578_v42 = vadd.f32 %v6141_v27, %v2262_v9  ;;  %v1790_v55 = vpop.f32.mrf.mxu0  ;;  %v1955_v47 = vpop.f32.mrf.mxu1 }
 0x24a   : > { %v3433_v30 = vadd.f32 %v3432_v33, %v3172_v5  ;;  %v3509_v12 = vadd.f32 %v3508_v62, %v3238_v59  ;;  %v2389_v52 = vadd.f32 %v6195_v49, %v1790_v55  ;;  %v2455_v28 = vadd.f32 %v6229_v8, %v1955_v47 }
 0x24b   : > { %v2776_v3 = vmul.f32 %v5013_v61, %v2512_v32  ;;  %v2842_v18 = vmul.f32 %v5835_v1, %v2578_v42 }
 0x24c   : > { %v2653_v19 = vmul.f32 %v5761_v25, %v2389_v52  ;;  %v2719_v41 = vmul.f32 %v5011_v60, %v2455_v28 }
 0x24d   : > { %v3040_v33 = vadd.f32 %v5022_v4, %v2776_v3  ;;  %v3106_v62 = vadd.f32 %v5837_v34, %v2842_v18  ;;  %v6246_v18 = vld [vmem:[%s6467_s2 + $0xc8] sm:$0xff] }
 0x24e   : > { %v2917_v63 = vadd.f32 %v5763_v21, %v2653_v19  ;;  %v2983_v39 = vadd.f32 %v5020_v2, %v2719_v41 }
 0x24f   : > { %v3296_v10 = vmax.f32 %v3040_v33, 0.0  ;;  %v3362_v58 = vmax.f32 %v3106_v62, 0.0 }
 0x250   : > { %v3173_v35 = vmax.f32 %v2917_v63, 0.0  ;;  %v3239_v37 = vmax.f32 %v2983_v39, 0.0  ;;  %v2100_v5 = vpop.f32.mrf.mxu2  ;;  %v2265_v59 = vpop.f32.mrf.mxu3 }
 0x251   : > { %v3577_v31 = vadd.f32 %v3576_v6, %v3296_v10  ;;  %v3653_v9 = vadd.f32 %v3652_v23, %v3362_v58  ;;  %v2513_v32 = vadd.f32 %v6121_v50, %v2100_v5  ;;  %v2579_v42 = vadd.f32 %v6158_v36, %v2265_v59  ;;  %v1792_v55 = vpop.f32.mrf.mxu0  ;;  %v1957_v47 = vpop.f32.mrf.mxu1 }
 0x252   : > { %v3434_v52 = vadd.f32 %v3433_v30, %v3173_v35  ;;  %v3510_v28 = vadd.f32 %v3509_v12, %v3239_v37  ;;  %v2390_v3 = vadd.f32 %v6212_v22, %v1792_v55  ;;  %v2456_v19 = vadd.f32 %v6246_v18, %v1957_v47 }
 0x253   : > { %v2777_v6 = vmul.f32 %v5013_v61, %v2513_v32  ;;  %v2843_v23 = vmul.f32 %v5835_v1, %v2579_v42 }
 0x254   : > { %v2654_v50 = vmul.f32 %v5761_v25, %v2390_v3  ;;  %v2720_v41 = vmul.f32 %v5011_v60, %v2456_v19 }
 0x255   : > { %v3041_v30 = vadd.f32 %v5022_v4, %v2777_v6  ;;  %v3107_v12 = vadd.f32 %v5837_v34, %v2843_v23  ;;  %v6263_v23 = vld [vmem:[%s6467_s2 + $0xd0] sm:$0xff] }
 0x256   : > { %v2918_v33 = vadd.f32 %v5763_v21, %v2654_v50  ;;  %v2984_v62 = vadd.f32 %v5020_v2, %v2720_v41 }
 0x257   : > { %v3297_v63 = vmax.f32 %v3041_v30, 0.0  ;;  %v3363_v39 = vmax.f32 %v3107_v12, 0.0 }
 0x258   : > { %v3174_v10 = vmax.f32 %v2918_v33, 0.0  ;;  %v3240_v58 = vmax.f32 %v2984_v62, 0.0  ;;  %v2102_v35 = vpop.f32.mrf.mxu2  ;;  %v2267_v37 = vpop.f32.mrf.mxu3 }
 0x259   : > { %v3578_v5 = vadd.f32 %v3577_v31, %v3297_v63  ;;  %v3654_v59 = vadd.f32 %v3653_v9, %v3363_v39  ;;  %v2514_v32 = vadd.f32 %v6141_v27, %v2102_v35  ;;  %v2580_v42 = vadd.f32 %v6175_v7, %v2267_v37  ;;  %v1795_v55 = vpop.f32.mrf.mxu0  ;;  %v1960_v47 = vpop.f32.mrf.mxu1 }
 0x25a   : > { %v3435_v3 = vadd.f32 %v3434_v52, %v3174_v10  ;;  %v3511_v19 = vadd.f32 %v3510_v28, %v3240_v58  ;;  %v2391_v6 = vadd.f32 %v6229_v8, %v1795_v55  ;;  %v2457_v50 = vadd.f32 %v6263_v23, %v1960_v47 }
 0x25b   : > { %v2778_v31 = vmul.f32 %v5013_v61, %v2514_v32  ;;  %v2844_v9 = vmul.f32 %v5835_v1, %v2580_v42 }
 0x25c   : > { %v2655_v27 = vmul.f32 %v5761_v25, %v2391_v6  ;;  %v2721_v41 = vmul.f32 %v5011_v60, %v2457_v50 }
 0x25d   : > { %v3042_v52 = vadd.f32 %v5022_v4, %v2778_v31  ;;  %v3108_v28 = vadd.f32 %v5837_v34, %v2844_v9  ;;  %v6280_v9 = vld [vmem:[%s6467_s2 + $0xd8] sm:$0xff] }
 0x25e   : > { %v2919_v30 = vadd.f32 %v5763_v21, %v2655_v27  ;;  %v2985_v12 = vadd.f32 %v5020_v2, %v2721_v41 }
 0x25f   : > { %v3298_v33 = vmax.f32 %v3042_v52, 0.0  ;;  %v3364_v62 = vmax.f32 %v3108_v28, 0.0 }
 0x260   : > { %v3175_v63 = vmax.f32 %v2919_v30, 0.0  ;;  %v3241_v39 = vmax.f32 %v2985_v12, 0.0  ;;  %v2105_v10 = vpop.f32.mrf.mxu2  ;;  %v2270_v58 = vpop.f32.mrf.mxu3 }
 0x261   : > { %v3579_v35 = vadd.f32 %v3578_v5, %v3298_v33  ;;  %v3655_v37 = vadd.f32 %v3654_v59, %v3364_v62  ;;  %v2515_v32 = vadd.f32 %v6158_v36, %v2105_v10  ;;  %v2581_v42 = vadd.f32 %v6195_v49, %v2270_v58  ;;  %v1797_v55 = vpop.f32.mrf.mxu0  ;;  %v1962_v47 = vpop.f32.mrf.mxu1 }
 0x262   : > { %v3436_v6 = vadd.f32 %v3435_v3, %v3175_v63  ;;  %v3512_v50 = vadd.f32 %v3511_v19, %v3241_v39  ;;  %v2392_v31 = vadd.f32 %v6246_v18, %v1797_v55  ;;  %v2458_v27 = vadd.f32 %v6280_v9, %v1962_v47 }
 0x263   : > { %v2779_v5 = vmul.f32 %v5013_v61, %v2515_v32  ;;  %v2845_v59 = vmul.f32 %v5835_v1, %v2581_v42  ;;  %v3243_v55 = vmax.f32 %v5036_v14, 0.0 }
 0x264   : > { %v2656_v36 = vmul.f32 %v5761_v25, %v2392_v31  ;;  %v2722_v41 = vmul.f32 %v5011_v60, %v2458_v27 }
 0x265   : > { %v3043_v3 = vadd.f32 %v5022_v4, %v2779_v5  ;;  %v3109_v19 = vadd.f32 %v5837_v34, %v2845_v59  ;;  %v3244_v59 = vmax.f32 %v5070_v44, 0.0 }
 0x266   : > { %v2920_v52 = vadd.f32 %v5763_v21, %v2656_v36  ;;  %v2986_v28 = vadd.f32 %v5020_v2, %v2722_v41  ;;  %v3245_v41 = vmax.f32 %v5098_v11, 0.0  ;;  %v4715_v11 = vld [vmem:[%s6469_s4 + $0x8] sm:$0xff] }
 0x267   : > { %v3299_v30 = vmax.f32 %v3043_v3, 0.0  ;;  %v3365_v12 = vmax.f32 %v3109_v19, 0.0  ;;  %v3246_v19 = vmax.f32 %v5125_v43, 0.0  ;;  %3776 = vmatpush.bf16.msrb.mxu1 %v4715_v11 }
 0x268   : > { %v3176_v33 = vmax.f32 %v2920_v52, 0.0  ;;  %v3242_v62 = vmax.f32 %v2986_v28, 0.0  ;;  %v2107_v63 = vpop.f32.mrf.mxu2  ;;  %v2272_v39 = vpop.f32.mrf.mxu3 }
 0x269   : > { %v3580_v10 = vadd.f32 %v3579_v35, %v3299_v30  ;;  %v3656_v58 = vadd.f32 %v3655_v37, %v3365_v12  ;;  %v2516_v32 = vadd.f32 %v6175_v7, %v2107_v63  ;;  %v2582_v60 = vadd.f32 %v6212_v22, %v2272_v39  ;;  %v1800_v42 = vpop.f32.mrf.mxu0 }
 0x26a   : > { %v3437_v47 = vadd.f32 %v3436_v6, %v3176_v33  ;;  %v3513_v31 = vadd.f32 %v3512_v50, %v3242_v62  ;;  %v2393_v27 = vadd.f32 %v6263_v23, %v1800_v42 }
 0x26b   : > { %v2780_v2 = vmul.f32 %v5013_v61, %v2516_v32  ;;  %v2846_v5 = vmul.f32 %v5835_v1, %v2582_v60 }
 0x26c   : > { %v3514_v36 = vadd.f32 %v3513_v31, %v3243_v55  ;;  %v2657_v35 = vmul.f32 %v5761_v25, %v2393_v27 }
 0x26d   : > { %v3044_v7 = vadd.f32 %v5022_v4, %v2780_v2  ;;  %v3110_v37 = vadd.f32 %v5837_v34, %v2846_v5 }
 0x26e   : > { %v3515_v14 = vadd.f32 %v3514_v36, %v3244_v59  ;;  %v2921_v6 = vadd.f32 %v5763_v21, %v2657_v35 }
 0x26f   : > { %v3300_v50 = vmax.f32 %v3044_v7, 0.0  ;;  %v3366_v3 = vmax.f32 %v3110_v37, 0.0 }
 0x270   : > { %v3516_v52 = vadd.f32 %v3515_v14, %v3245_v41  ;;  %v3177_v28 = vmax.f32 %v2921_v6, 0.0  ;;  %v2110_v30 = vpop.f32.mrf.mxu2  ;;  %v2275_v44 = vpop.f32.mrf.mxu3  ;;  %v6323_v6 = vld [vmem:[%s6467_s2 + $0xe0] sm:$0xff] }
 0x271   : > { %v3581_v12 = vadd.f32 %v3580_v10, %v3300_v50  ;;  %v3657_v33 = vadd.f32 %v3656_v58, %v3366_v3  ;;  %v2517_v62 = vadd.f32 %v6195_v49, %v2110_v30  ;;  %v2583_v63 = vadd.f32 %v6229_v8, %v2275_v44  ;;  %v1802_v39 = vpop.f32.mrf.mxu0 }
 0x272   : > { %v6309_v32 = vadd.f32 %v3516_v52, %v3246_v19  ;;  %v3438_v60 = vadd.f32 %v3437_v47, %v3177_v28  ;;  %v2394_v43 = vadd.f32 %v6280_v9, %v1802_v39 }
 0x273   : > { %v2781_v42 = vmul.f32 %v5013_v61, %v2517_v62  ;;  %v2847_v55 = vmul.f32 %v5835_v1, %v2583_v63 }
 0x274   : > { %v2658_v10 = vmul.f32 %v5761_v25, %v2394_v43 }
 0x275   : > { %v3045_v49 = vadd.f32 %v5022_v4, %v2781_v42  ;;  %v3111_v58 = vadd.f32 %v5837_v34, %v2847_v55 }
 0x276   : > { %v2922_v31 = vadd.f32 %v5763_v21, %v2658_v10  ;;  %v6337_v10 = vld [vmem:[%s6467_s2 + $0xe8] sm:$0xff] }
 0x277   : > { %v3301_v27 = vmax.f32 %v3045_v49, 0.0  ;;  %v3367_v2 = vmax.f32 %v3111_v58, 0.0 }
 0x278   : > { %v3178_v5 = vmax.f32 %v2922_v31, 0.0  ;;  %v2112_v59 = vpop.f32.mrf.mxu2  ;;  %v2277_v47 = vpop.f32.mrf.mxu3 }
 0x279   : > { %v3582_v36 = vadd.f32 %v3581_v12, %v3301_v27  ;;  %v3658_v35 = vadd.f32 %v3657_v33, %v3367_v2  ;;  %v2518_v7 = vadd.f32 %v6212_v22, %v2112_v59  ;;  %v2584_v37 = vadd.f32 %v6246_v18, %v2277_v47  ;;  %v1805_v41 = vpop.f32.mrf.mxu0 }
 0x27a   : > { %v3439_v14 = vadd.f32 %v3438_v60, %v3178_v5  ;;  %v2395_v50 = vadd.f32 %v6323_v6, %v1805_v41 }
 0x27b   : > { %v2782_v3 = vmul.f32 %v5013_v61, %v2518_v7  ;;  %v2848_v19 = vmul.f32 %v5835_v1, %v2584_v37 }
 0x27c   : > { %v2659_v52 = vmul.f32 %v5761_v25, %v2395_v50 }
 0x27d   : > { %v3046_v28 = vadd.f32 %v5022_v4, %v2782_v3  ;;  %v3112_v22 = vadd.f32 %v5837_v34, %v2848_v19 }
 0x27e   : > { %v2923_v30 = vadd.f32 %v5763_v21, %v2659_v52  ;;  %v4793_v52 = vld [vmem:[%s6467_s2 + $0xf0] sm:$0xff] }
 0x27f   : > { %v3302_v44 = vmax.f32 %v3046_v28, 0.0  ;;  %v3368_v12 = vmax.f32 %v3112_v22, 0.0 }
 0x280   : > { %v3179_v33 = vmax.f32 %v2923_v30, 0.0  ;;  %v2115_v62 = vpop.f32.mrf.mxu2  ;;  %v2280_v63 = vpop.f32.mrf.mxu3 }
 0x281   : > { %v3583_v39 = vadd.f32 %v3582_v36, %v3302_v44  ;;  %v3659_v11 = vadd.f32 %v3658_v35, %v3368_v12  ;;  %v2519_v60 = vadd.f32 %v6229_v8, %v2115_v62  ;;  %v2585_v43 = vadd.f32 %v6263_v23, %v2280_v63  ;;  %v1807_v42 = vpop.f32.mrf.mxu0 }
 0x282   : > { %v3440_v55 = vadd.f32 %v3439_v14, %v3179_v33  ;;  %v2396_v49 = vadd.f32 %v6337_v10, %v1807_v42 }
 0x283   : > { %v2783_v58 = vmul.f32 %v5013_v61, %v2519_v60  ;;  %v2849_v31 = vmul.f32 %v5835_v1, %v2585_v43 }
 0x284   : > { %v2660_v27 = vmul.f32 %v5761_v25, %v2396_v49 }
 0x285   : > { %v3047_v2 = vadd.f32 %v5022_v4, %v2783_v58  ;;  %v3113_v8 = vadd.f32 %v5837_v34, %v2849_v31  ;;  %v3407_v31 = vrot.slane %v5771_v24, 4 }
 0x286   : > { %v2924_v5 = vadd.f32 %v5763_v21, %v2660_v27 }
 0x287   : > { %v3303_v59 = vmax.f32 %v3047_v2, 0.0  ;;  %v3369_v47 = vmax.f32 %v3113_v8, 0.0  ;;  %v6363_v2 = vld [vmem:[%s6467_s2 + $0xf8] sm:$0xff] }
 0x288   : > { %v3180_v36 = vmax.f32 %v2924_v5, 0.0  ;;  %v2117_v35 = vpop.f32.mrf.mxu2  ;;  %v2282_v7 = vpop.f32.mrf.mxu3 }
 0x289   : > { %v3584_v37 = vadd.f32 %v3583_v39, %v3303_v59  ;;  %v3660_v41 = vadd.f32 %v3659_v11, %v3369_v47  ;;  %v2520_v14 = vadd.f32 %v6246_v18, %v2117_v35  ;;  %v2586_v50 = vadd.f32 %v6280_v9, %v2282_v7  ;;  %v1810_v3 = vpop.f32.mrf.mxu0 }
 0x28a   : > { %v3441_v19 = vadd.f32 %v3440_v55, %v3180_v36  ;;  %v2397_v28 = vadd.f32 %v4793_v52, %v1810_v3  ;;  %v3408_v35 = vadd.f32 %v3407_v31, %v5771_v24 }
 0x28b   : > { %v2784_v22 = vmul.f32 %v5013_v61, %v2520_v14  ;;  %v2850_v30 = vmul.f32 %v5835_v1, %v2586_v50 }
 0x28c   : > { %v2661_v44 = vmul.f32 %v5761_v25, %v2397_v28 }
 0x28d   : > { %v3048_v12 = vadd.f32 %v5022_v4, %v2784_v22  ;;  %v3114_v33 = vadd.f32 %v5837_v34, %v2850_v30 }
 0x28e   : > { %v2925_v18 = vadd.f32 %v5763_v21, %v2661_v44  ;;  %v3409_v44 = vrot.slane %v3408_v35, 2 }
 0x28f   : > { %v3304_v62 = vmax.f32 %v3048_v12, 0.0  ;;  %v3370_v63 = vmax.f32 %v3114_v33, 0.0 }
 0x290   : > { %v3181_v39 = vmax.f32 %v2925_v18, 0.0  ;;  %v2120_v11 = vpop.f32.mrf.mxu2  ;;  %v2285_v60 = vpop.f32.mrf.mxu3 }
 0x291   : > { %v3585_v43 = vadd.f32 %v3584_v37, %v3304_v62  ;;  %v3661_v42 = vadd.f32 %v3660_v41, %v3370_v63  ;;  %v2521_v55 = vadd.f32 %v6263_v23, %v2120_v11  ;;  %v2587_v49 = vadd.f32 %v6323_v6, %v2285_v60  ;;  %v1812_v58 = vpop.f32.mrf.mxu0 }
 0x292   : > { %v3442_v27 = vadd.f32 %v3441_v19, %v3181_v39  ;;  %v2398_v8 = vadd.f32 %v6363_v2, %v1812_v58 }
 0x293   : > { %v2785_v5 = vmul.f32 %v5013_v61, %v2521_v55  ;;  %v2851_v59 = vmul.f32 %v5835_v1, %v2587_v49 }
 0x294   : > { %v2662_v47 = vmul.f32 %v5761_v25, %v2398_v8 }
 0x295   : > { %v3049_v23 = vadd.f32 %v5022_v4, %v2785_v5  ;;  %v3115_v36 = vadd.f32 %v5837_v34, %v2851_v59 }
 0x296   : > { %v2926_v7 = vadd.f32 %v5763_v21, %v2662_v47  ;;  %v4795_v21 = vld [vmem:[%s6467_s2] sm:$0xff] }
 0x297   : > { %v3305_v37 = vmax.f32 %v3049_v23, 0.0  ;;  %v3371_v41 = vmax.f32 %v3115_v36, 0.0  ;;  %v4796_v36 = vld [vmem:[%s6467_s2 + $0x8] sm:$0xff] }
 0x298   : > { %v3182_v14 = vmax.f32 %v2926_v7, 0.0  ;;  %v2122_v50 = vpop.f32.mrf.mxu2  ;;  %v2287_v3 = vpop.f32.mrf.mxu3 }
 0x299   : > { %v3586_v19 = vadd.f32 %v3585_v43, %v3305_v37  ;;  %v3662_v28 = vadd.f32 %v3661_v42, %v3371_v41  ;;  %v2522_v22 = vadd.f32 %v6280_v9, %v2122_v50  ;;  %v2588_v30 = vadd.f32 %v6337_v10, %v2287_v3  ;;  %v1815_v25 = vpop.f32.mrf.mxu0 }
 0x29a   : > { %v3443_v12 = vadd.f32 %v3442_v27, %v3182_v14  ;;  %v2399_v62 = vadd.f32 %v4795_v21, %v1815_v25  ;;  %v3410_v9 = vadd.f32 %v3409_v44, %v3408_v35 }
 0x29b   : > { %v2786_v33 = vmul.f32 %v5013_v61, %v2522_v22  ;;  %v2852_v24 = vmul.f32 %v5835_v1, %v2588_v30 }
 0x29c   : > { %v3444_v18 = vrot.slane %v3443_v12, 4  ;;  %v2663_v55 = vmul.f32 %v4976_v40, %v2399_v62  ;;  %v3411_v47 = vrot.slane %v3410_v9, 1 }
 0x29d   : > { %v3050_v63 = vadd.f32 %v5022_v4, %v2786_v33  ;;  %v3116_v39 = vadd.f32 %v5837_v34, %v2852_v24 }
 0x29e   : > { %v3445_v11 = vadd.f32 %v3444_v18, %v3443_v12  ;;  %v2927_v14 = vadd.f32 %v4991_v51, %v2663_v55  ;;  %v3412_v3 = vadd.f32 %v3411_v47, %v3410_v9  ;;  %v3187_v55 = vmax.f32 %v5079_v48, 0.0 }
 0x29f   : > { %v3306_v60 = vmax.f32 %v3050_v63, 0.0  ;;  %v3372_v43 = vmax.f32 %v3116_v39, 0.0  ;;  %v3185_v63 = vmax.f32 %v5003_v57, 0.0  ;;  %v3310_v48 = vmax.f32 %v5073_v46, 0.0 }
 0x2a0   : > { %v3446_v42 = vrot.slane %v3445_v11, 2  ;;  %v2125_v49 = vpop.f32.mrf.mxu2  ;;  %v2290_v58 = vpop.f32.mrf.mxu3  ;;  %v3183_v44 = vmax.f32 %v2927_v14, 0.0  ;;  %v3192_v47 = vmax.f32 %v5201_v54, 0.0  ;;  %v3195_v46 = vmax.f32 %v5274_v20, 0.0  ;;  %v6492_v54 = vld [vmem:[#allocation4_spill] sm:$0xff]  ;;  %v6495_v20 = vld [vmem:[#allocation7_spill] sm:$0xff] }
 0x2a1   : > { %v3587_v31 = vadd.f32 %v3586_v19, %v3306_v60  ;;  %v3663_v27 = vadd.f32 %v3662_v28, %v3372_v43  ;;  %v2523_v8 = vadd.f32 %v6323_v6, %v2125_v49  ;;  %v2589_v5 = vadd.f32 %v4793_v52, %v2290_v58  ;;  %v1817_v59 = vpop.f32.mrf.mxu0 }
 0x2a2   : > { %v3447_v23 = vadd.f32 %v3446_v42, %v3445_v11  ;;  %v2400_v35 = vadd.f32 %v4796_v36, %v1817_v59  ;;  %v3186_v11 = vmax.f32 %v5043_v17, 0.0  ;;  %v3189_v17 = vmax.f32 %v5132_v53, 0.0 }
 0x2a3   : > { %v2787_v7 = vmul.f32 %v5013_v61, %v2523_v8  ;;  %v2853_v37 = vmul.f32 %v5835_v1, %v2589_v5  ;;  %v3190_v8 = vmax.f32 %v5155_v26, 0.0  ;;  %v3193_v53 = vmax.f32 %v5228_v45, 0.0  ;;  %v6493_v45 = vld [vmem:[#allocation5_spill] sm:$0xff] }
 0x2a4   : > { %v3448_v41 = vrot.slane %v3447_v23, 1  ;;  %v2664_v50 = vmul.f32 %v4976_v40, %v2400_v35  ;;  %v3194_v35 = vmax.f32 %v5247_v29, 0.0  ;;  %v3196_v26 = vmax.f32 %v5293_v56, 0.0  ;;  %v6494_v29 = vld [vmem:[#allocation6_spill] sm:$0xff]  ;;  %v6496_v56 = vld [vmem:[#allocation8_spill] sm:$0xff] }
 0x2a5   : > { %v3051_v6 = vadd.f32 %v5022_v4, %v2787_v7  ;;  %v3117_v52 = vadd.f32 %v5837_v34, %v2853_v37  ;;  %v3197_v14 = vmax.f32 %v5320_v38, 0.0  ;;  %v6497_v38 = vld [vmem:[#allocation9_spill] sm:$0xff] }
 0x2a6   : > { %v3449_v19 = vadd.f32 %v3448_v41, %v3447_v23  ;;  %v2928_v28 = vadd.f32 %v4991_v51, %v2664_v50 }
 0x2a7   : > { %v3307_v22 = vmax.f32 %v3051_v6, 0.0  ;;  %v3373_v30 = vmax.f32 %v3117_v52, 0.0 }
 0x2a8   : > { %v6394_v25 = vsel %vm3680_vm1, %v3449_v19, %v3412_v3  ;;  %v3184_v12 = vmax.f32 %v2928_v28, 0.0  ;;  %v2127_v33 = vpop.f32.mrf.mxu2  ;;  %v2292_v24 = vpop.f32.mrf.mxu3  ;;  %v3199_v3 = vmax.f32 %v6492_v54, 0.0  ;;  %v3200_v28 = vmax.f32 %v6493_v45, 0.0 }
 0x2a9   : > { %v3588_v18 = vadd.f32 %v3587_v31, %v3307_v22  ;;  %v3664_v21 = vadd.f32 %v3663_v27, %v3373_v30  ;;  %v2524_v40 = vadd.f32 %v6337_v10, %v2127_v33  ;;  %v2590_v62 = vadd.f32 %v6363_v2, %v2292_v24 }
 0x2aa   : > { %v3450_v39 = vadd.f32 %v3184_v12, %v3183_v44  ;;  %v3188_v2 = vmax.f32 %v5103_v16, 0.0  ;;  %v3309_v31 = vmax.f32 %v5039_v15, 0.0  ;;  %v3191_v15 = vmax.f32 %v5182_v13, 0.0  ;;  %v6491_v13 = vld [vmem:[#allocation3_spill] sm:$0xff] }
 0x2ab   : > { %v2788_v9 = vmul.f32 %v5013_v61, %v2524_v40  ;;  %v2854_v51 = vmul.f32 %v5835_v1, %v2590_v62  ;;  %v3198_v6 = vmax.f32 %v6491_v13, 0.0  ;;  %v3201_v30 = vmax.f32 %v6494_v29, 0.0  ;;  %v6498_v62 = vld [vmem:[#allocation10_spill] sm:$0xff] }
 0x2ac   : > { %v3451_v60 = vadd.f32 %v3450_v39, %v3185_v63  ;;  %v3202_v12 = vmax.f32 %v6495_v20, 0.0  ;;  %v3203_v24 = vmax.f32 %v6496_v56, 0.0  ;;  %v3205_v63 = vmax.f32 %v6498_v62, 0.0 }
 0x2ad   : > { %v3052_v43 = vadd.f32 %v5022_v4, %v2788_v9  ;;  %v3118_v42 = vadd.f32 %v5837_v34, %v2854_v51  ;;  %v4714_v4 = vld [vmem:[%s6469_s4] sm:$0xff] }
 0x2ae   : > { %v3452_v49 = vadd.f32 %v3451_v60, %v3186_v11  ;;  %3777 = vmatpush.bf16.msrb.mxu1 %v4714_v4  ;;  %v6499_v9 = vld [vmem:[#allocation11_spill] sm:$0xff]  ;;  %v6500_v60 = vld [vmem:[#allocation12_spill] sm:$0xff] }
 0x2af   : > { %v3308_v10 = vmax.f32 %v3052_v43, 0.0  ;;  %v3374_v58 = vmax.f32 %v3118_v42, 0.0  ;;  %v3206_v51 = vmax.f32 %v6499_v9, 0.0  ;;  %v3207_v43 = vmax.f32 %v6500_v60, 0.0 }
 0x2b0   : > { %v3453_v57 = vadd.f32 %v3452_v49, %v3187_v55  ;;  %v6501_v55 = vld [vmem:[#allocation13_spill] sm:$0xff] }
 0x2b1   : > { %v3589_v61 = vadd.f32 %v3588_v18, %v3308_v10  ;;  %v6407_v27 = vadd.f32 %v3664_v21, %v3374_v58  ;;  %v3204_v21 = vmax.f32 %v6497_v38, 0.0  ;;  %v3208_v49 = vmax.f32 %v6501_v55, 0.0  ;;  %v6502_v58 = vld [vmem:[#allocation14_spill] sm:$0xff] }
 0x2b2   : > { %v3454_v1 = vadd.f32 %v3453_v57, %v3188_v2  ;;  %v3209_v2 = vmax.f32 %v6502_v58, 0.0 }
 0x2b3   : > { %v3590_v34 = vadd.f32 %v3589_v61, %v3309_v31  ;;  %v6503_v31 = vld [vmem:[#allocation15_spill] sm:$0xff] }
 0x2b4   : > { %v3455_v5 = vadd.f32 %v3454_v1, %v3189_v17  ;;  %v3210_v61 = vmax.f32 %v6503_v31, 0.0  ;;  %v6504_v1 = vld [vmem:[#allocation16_spill] sm:$0xff] }
 0x2b5   : > { %v3591_v16 = vadd.f32 %v3590_v34, %v3310_v48  ;;  %v3211_v4 = vmax.f32 %v6504_v1, 0.0  ;;  %v3518_v34 = vrot.slane %v6309_v32, 4 }
 0x2b6   : > { %v3456_v59 = vadd.f32 %v3455_v5, %v3190_v8  ;;  %v6505_v8 = vld [vmem:[#allocation17_spill] sm:$0xff] }
 0x2b7   : > { %v3212_v5 = vmax.f32 %v6505_v8, 0.0 }
 0x2b8   : > { %v3457_v23 = vadd.f32 %v3456_v59, %v3191_v15  ;;  %v3555_v15 = vrot.slane %v5883_v0, 4 }
 0x2ba   : > { %v3458_v36 = vadd.f32 %v3457_v23, %v3192_v47  ;;  %v3592_v47 = vrot.slane %v3591_v16, 4  ;;  %v6506_v23 = vld [vmem:[#allocation18_spill] sm:$0xff] }
 0x2bc   : > { %v3459_v7 = vadd.f32 %v3458_v36, %v3193_v53  ;;  %v3213_v53 = vmax.f32 %v6506_v23, 0.0  ;;  %v6507_v36 = vld [vmem:[#allocation20_spill] sm:$0xff]  ;;  %v3593_v13 = vadd.f32 %v3592_v47, %v3591_v16 }
 0x2be   : > { %v3460_v37 = vadd.f32 %v3459_v7, %v3194_v35  ;;  %v3629_v35 = vrot.slane %v6507_v36, 4 }
 0x2c0   : > { %v3461_v41 = vadd.f32 %v3460_v37, %v3195_v46  ;;  %v3519_v46 = vadd.f32 %v3518_v34, %v6309_v32  ;;  %v3666_v37 = vrot.slane %v6407_v27, 4 }
 0x2c2   : > { %v3462_v50 = vadd.f32 %v3461_v41, %v3196_v26  ;;  %v6508_v26 = vld [vmem:[#allocation19_spill] sm:$0xff]  ;;  %v3520_v54 = vrot.slane %v3519_v46, 2 }
 0x2c3   : > { %v3214_v41 = vmax.f32 %v6508_v26, 0.0 }
 0x2c4   : > { %v3463_v52 = vadd.f32 %v3462_v50, %v3197_v14  ;;  %v3556_v14 = vadd.f32 %v3555_v15, %v5883_v0  ;;  %v3521_v32 = vadd.f32 %v3520_v54, %v3519_v46 }
 0x2c6   : > { %v3464_v19 = vadd.f32 %v3463_v52, %v3198_v6  ;;  %v3630_v6 = vadd.f32 %v3629_v35, %v6507_v36  ;;  %v3522_v56 = vrot.slane %v3521_v32, 1 }
 0x2c8   : > { %v3465_v22 = vadd.f32 %v3464_v19, %v3199_v3  ;;  %v3667_v3 = vadd.f32 %v3666_v37, %v6407_v27  ;;  %v3557_v19 = vrot.slane %v3556_v14, 2 }
 0x2ca   : > { %v3466_v44 = vadd.f32 %v3465_v22, %v3200_v28  ;;  %v3594_v28 = vrot.slane %v3593_v13, 2  ;;  %v3631_v22 = vrot.slane %v3630_v6, 2 }
 0x2cc   : > { %v3467_v33 = vadd.f32 %v3466_v44, %v3201_v30  ;;  %v3668_v30 = vrot.slane %v3667_v3, 2  ;;  %v3558_v44 = vadd.f32 %v3557_v19, %v3556_v14 }
 0x2ce   : > { %v3468_v18 = vadd.f32 %v3467_v33, %v3202_v12  ;;  %v3595_v12 = vadd.f32 %v3594_v28, %v3593_v13  ;;  %v3632_v33 = vadd.f32 %v3631_v22, %v3630_v6  ;;  %v3669_v16 = vadd.f32 %v3668_v30, %v3667_v3 }
 0x2d0   : > { %v3469_v40 = vadd.f32 %v3468_v18, %v3203_v24  ;;  %v3559_v24 = vrot.slane %v3558_v44, 1  ;;  %v3596_v38 = vrot.slane %v3595_v12, 1  ;;  %v3670_v62 = vrot.slane %v3669_v16, 1 }
 0x2d2   : > { %v3470_v39 = vadd.f32 %v3469_v40, %v3204_v21  ;;  %v3633_v21 = vrot.slane %v3632_v33, 1  ;;  %v3523_v40 = vadd.f32 %v3522_v56, %v3521_v32  ;;  %v3597_v9 = vadd.f32 %v3596_v38, %v3595_v12 }
 0x2d4   : > { %v3471_v11 = vadd.f32 %v3470_v39, %v3205_v63  ;;  %v3560_v63 = vadd.f32 %v3559_v24, %v3558_v44 }
 0x2d6   : > { %v3472_v42 = vadd.f32 %v3471_v11, %v3206_v51  ;;  %v3634_v11 = vadd.f32 %v3633_v21, %v3632_v33 }
 0x2d8   : > { %v3473_v10 = vadd.f32 %v3472_v42, %v3207_v43  ;;  %v3671_v43 = vadd.f32 %v3670_v62, %v3669_v16 }
 0x2da   : > { %v3474_v57 = vadd.f32 %v3473_v10, %v3208_v49 }
 0x2dc   : > { %v3475_v17 = vadd.f32 %v3474_v57, %v3209_v2 }
 0x2de   : > { %v3476_v48 = vadd.f32 %v3475_v17, %v3210_v61 }
 0x2e0   : > { %v3477_v59 = vadd.f32 %v3476_v48, %v3211_v4 }
 0x2e2   : > { %v3478_v7 = vadd.f32 %v3477_v59, %v3212_v5 }
 0x2e4   : > { %v3479_v50 = vadd.f32 %v3478_v7, %v3213_v53 }
 0x2e6   : > { %v3480_v52 = vadd.f32 %v3479_v50, %v3214_v41 }
 0x2e8   : > { %v3481_v45 = vrot.slane %v3480_v52, 4 }
 0x2ea   : > { %v3482_v29 = vadd.f32 %v3481_v45, %v3480_v52 }
 0x2ec   : > { %v3483_v20 = vrot.slane %v3482_v29, 2 }
 0x2ee   : > { %v3484_v0 = vadd.f32 %v3483_v20, %v3482_v29 }
 0x2f0   : > { %v3485_v18 = vrot.slane %v3484_v0, 1 }
 0x2f2   : > { %v3486_v27 = vadd.f32 %v3485_v18, %v3484_v0 }
 0x2f4   : > { %v3683_v39 = vsel %vm3682_vm2, %v3486_v27, %v6394_v25  ;;  %v4758_v25 = vld [vmem:[%s6470_s5] ss:$0 sm:$0xff] }
 0x2f5   : > { %v3685_v51 = vsel %vm3684_vm3, %v3523_v40, %v3683_v39 }
 0x2f6   : > { %v3687_v60 = vsel %vm3686_vm4, %v3560_v63, %v3685_v51 }
 0x2f7   : > { %v3689_v42 = vsel %vm3688_vm5, %v3597_v9, %v3687_v60 }
 0x2f8   : > { %v3691_v55 = vsel %vm3690_vm6, %v3634_v11, %v3689_v42 }
 0x2f9   : > { %v3693_v49 = vsel %vm3692_vm7, %v3671_v43, %v3691_v55 }
 0x2fa   : > { %v3701_v10 = vpack.c.bf16 %v3693_v49, %v3693_v49 }
 0x2fc   : > { %3778 = vmatmul.bf16.vlgmr.msrb.gmra.mxu1 %v3701_v10 }
 0x379   : > { %v3779_v58 = vpop.f32.mrf.mxu1 }
 0x37a   : > { %v3780_v2 = vadd.f32 %v4758_v25, %v3779_v58 }
 0x37c   : > { %3783 = vst [vmem:[%s326_s8] sm:$0xff] %v3780_v2 }
 0x381   : > { %v3781_v57 = vpop.f32.mrf.mxu1 }
 0x382 PF: > { %s16_s23 = sadd.s32 1, %s4819_s23   ;;  %s6509_s21 = smov %s4815_s22 }
 0x383   : > { %p13_p6 = scmp.ge.s32.totalorder %s16_s23, 4   ;;  %s6510_s22 = smov %s6512_s24 }
 0x385   :  { %15 = sbr.rel (!%p13_p6) target bundleno = 2 (0x2), region = 88 }

</bundles_post_ra>
